<compile_context>
chip_gen: v5e
topology: v5e:2x2
jax: 0.10.0
libtpu: 0.0.40
codegen_flags: <defaults>
</compile_context>

<pallas_src>
import jax
import jax.numpy as jnp
from jax.experimental import pallas as pl
from jax.experimental.pallas import tpu as pltpu

BN_EPS = 1e-5
LANE = 128


def _round_up(x, m):
    return (x + m - 1) // m * m


# ----------------------------- Pallas kernel ------------------------------- #

def _down_fused_kernel(x_ref, w1_ref, g1_ref, b1_ref, w2_ref, g2_ref, b2_ref,
                       o_ref, xpad_ref):
    # x_ref    : (N, H, W, C)          pre-pool input, C already lane-padded
    # w*_ref   : (9*C, C)              3x3 filters, rows ordered (dy, dx, cin)
    # g*_ref, b*_ref : (1, C)          BN affine params (zero in padded lanes)
    # o_ref    : (N, H/2, W/2, C)      output (lane-dense store, C = 128k)
    # xpad_ref : (N, H/2+2, W/2+2, C)  VMEM halo scratch shared by both convs
    n, h, w, c = x_ref.shape
    hh, wh = h // 2, w // 2
    rows = n * hh * wh

    # ------------------------- MaxPool2d(2, 2) ----------------------------- #
    x = x_ref[...]
    x5 = x.reshape(n, hh, 2, w, c)
    xh = jnp.maximum(x5[:, :, 0, :, :], x5[:, :, 1, :, :])        # pool H pairs
    x5w = xh.reshape(n, hh, wh, 2, c)
    pooled = jnp.maximum(x5w[:, :, :, 0, :], x5w[:, :, :, 1, :])  # pool W pairs

    # Zero the halo scratch once; only the interior is rewritten per conv, the
    # 1-pixel border stays zero (== Conv2d padding=1 semantics).
    xpad_ref[...] = jnp.zeros_like(xpad_ref)

    def conv3x3_bn_relu(xin, w_ref, g_ref, b_ref):
        # xin: (n, hh, wh, c) f32  ->  (rows, c) f32 normalized activations.
        xpad_ref[:, 1:hh + 1, 1:wh + 1, :] = xin
        taps = [xpad_ref[:, dy:dy + hh, dx:dx + wh, :]
                for dy in range(3) for dx in range(3)]
        patches = jnp.concatenate(taps, axis=-1).reshape(rows, 9 * c)
        acc = jnp.dot(patches, w_ref[...],
                      preferred_element_type=jnp.float32)           # (rows, c)

        # BatchNorm (training mode: batch stats over N*H*W per channel),
        # single f32 pass, folded into one scale/shift FMA.
        inv_rows = 1.0 / rows
        mean = jnp.sum(acc, axis=0, keepdims=True) * inv_rows        # (1, c)
        meansq = jnp.sum(acc * acc, axis=0, keepdims=True) * inv_rows
        var = jnp.maximum(meansq - mean * mean, 0.0)                 # biased var
        scale = g_ref[...] * jax.lax.rsqrt(var + BN_EPS)
        shift = b_ref[...] - mean * scale
        return jnp.maximum(acc * scale + shift, 0.0)                 # ReLU

    y1 = conv3x3_bn_relu(pooled, w1_ref, g1_ref, b1_ref)
    y2 = conv3x3_bn_relu(y1.reshape(n, hh, wh, c), w2_ref, g2_ref, b2_ref)
    o_ref[...] = y2.reshape(n, hh, wh, c).astype(o_ref.dtype)


# ------------------------------ JAX wrapper -------------------------------- #

_VMEM = pl.BlockSpec(memory_space=pltpu.MemorySpace.VMEM)


def down_forward(x_nchw, w1, g1, b1, w2, g2, b2):
    """Down.forward: maxpool(2,2) -> (conv3x3 -> BN -> ReLU) x 2. NCHW in/out."""
    n, cin, h, w = x_nchw.shape
    cmid = w1.shape[-1]                     # HWIO
    cout = w2.shape[-1]
    cp = _round_up(max(cin, cmid, cout), LANE)   # common lane-padded channel dim

    # NCHW -> NHWC, zero-pad channels to the lane width (lane-dense everywhere).
    x = jnp.transpose(x_nchw, (0, 2, 3, 1)).astype(jnp.float32)
    x = jnp.pad(x, ((0, 0), (0, 0), (0, 0), (0, cp - cin)))

    def pack_w(wk, ci, co):
        wk = jnp.pad(wk.astype(jnp.float32),
                     ((0, 0), (0, 0), (0, cp - ci), (0, cp - co)))
        return wk.reshape(9 * cp, cp)        # rows ordered (dy, dx, cin)

    def pack_v(v, co):
        return jnp.pad(v.astype(jnp.float32), (0, cp - co)).reshape(1, cp)

    w1p, w2p = pack_w(w1, cin, cmid), pack_w(w2, cmid, cout)
    g1p, b1p = pack_v(g1, cmid), pack_v(b1, cmid)
    g2p, b2p = pack_v(g2, cout), pack_v(b2, cout)

    hh, wh = h // 2, w // 2
    out = pl.pallas_call(
        _down_fused_kernel,
        out_shape=jax.ShapeDtypeStruct((n, hh, wh, cp), jnp.float32),
        in_specs=[_VMEM] * 7,
        out_specs=_VMEM,
        scratch_shapes=[pltpu.VMEM((n, hh + 2, wh + 2, cp), jnp.float32)],
    )(x, w1p, g1p, b1p, w2p, g2p, b2p)

    # Drop padded channels, NHWC -> NCHW.
    return jnp.transpose(out[..., :cout], (0, 3, 1, 2))


# ---------------------------- Pure-JAX reference ---------------------------- #

def ref_down(x_nchw, w1, g1, b1, w2, g2, b2):
    x = jnp.transpose(x_nchw, (0, 2, 3, 1))
    n, h, w, c = x.shape
    x = jnp.max(x.reshape(n, h // 2, 2, w // 2, 2, c), axis=(2, 4))
    for wk, g, b in ((w1, g1, b1), (w2, g2, b2)):
        y = jax.lax.conv_general_dilated(
            x, wk, window_strides=(1, 1), padding="SAME",
            dimension_numbers=("NHWC", "HWIO", "NHWC"))
        mu = jnp.mean(y, axis=(0, 1, 2))
        var = jnp.mean((y - mu) ** 2, axis=(0, 1, 2))
        y = (y - mu) * jax.lax.rsqrt(var + BN_EPS) * g + b
        x = jnp.maximum(y, 0.0)
    return jnp.transpose(x, (0, 3, 1, 2))


# ----------------------------------- main ----------------------------------- #

if __name__ == "__main__":
    N, C_IN, H, W = 2, 4, 16, 16
    C_OUT = 8                                # mid_channels == out_channels

    key = jax.random.PRNGKey(0)
    kx, kw1, kg1, kb1, kw2, kg2, kb2 = jax.random.split(key, 7)

    x = jax.random.normal(kx, (N, C_IN, H, W), dtype=jnp.float32)

    # Conv weights stored HWIO (3,3,Cin,Cout); BN gamma/beta per channel.
    w1 = 0.2 * jax.random.normal(kw1, (3, 3, C_IN, C_OUT), dtype=jnp.float32)
    g1 = 1.0 + 0.1 * jax.random.normal(kg1, (C_OUT,), dtype=jnp.float32)
    b1 = 0.1 * jax.random.normal(kb1, (C_OUT,), dtype=jnp.float32)
    w2 = 0.2 * jax.random.normal(kw2, (3, 3, C_OUT, C_OUT), dtype=jnp.float32)
    g2 = 1.0 + 0.1 * jax.random.normal(kg2, (C_OUT,), dtype=jnp.float32)
    b2 = 0.1 * jax.random.normal(kb2, (C_OUT,), dtype=jnp.float32)

    out = jax.jit(down_forward)(x, w1, g1, b1, w2, g2, b2)
    out = jax.block_until_ready(out)
    assert out.shape == (N, C_OUT, H // 2, W // 2), out.shape

    ref = jax.block_until_ready(ref_down(x, w1, g1, b1, w2, g2, b2))
    max_err = float(jnp.max(jnp.abs(out - ref)))
    assert max_err < 5e-3, f"mismatch vs reference: {max_err}"

    print("KERNEL_OK")
</pallas_src>

<mosaic_0001>
module attributes {stable_mosaic.version = 11 : i64} {
  func.func @_down_fused_kernel(%arg0: memref<2x16x16x128xf32, #tpu.memory_space<vmem>>, %arg1: memref<1152x128xf32, #tpu.memory_space<vmem>>, %arg2: memref<1x128xf32, #tpu.memory_space<vmem>>, %arg3: memref<1x128xf32, #tpu.memory_space<vmem>>, %arg4: memref<1152x128xf32, #tpu.memory_space<vmem>>, %arg5: memref<1x128xf32, #tpu.memory_space<vmem>>, %arg6: memref<1x128xf32, #tpu.memory_space<vmem>>, %arg7: memref<2x8x8x128xf32, #tpu.memory_space<vmem>>, %arg8: memref<2x10x10x128xf32, #tpu.memory_space<vmem>>) attributes {dimension_semantics = [], scalar_prefetch = 0 : i64, scratch_operands = 1 : i64, tpu.core_type = #tpu.core_type<tc>} {
    %c0 = arith.constant 0 : index
    %c0_0 = arith.constant 0 : index
    %c0_1 = arith.constant 0 : index
    %c0_2 = arith.constant 0 : index
    %0 = vector.load %arg0[%c0, %c0_0, %c0_1, %c0_2] : memref<2x16x16x128xf32, #tpu.memory_space<vmem>>, vector<2x16x16x128xf32>
    %1 = vector.shape_cast %0 : vector<2x16x16x128xf32> to vector<2x8x2x16x128xf32>
    %2 = vector.extract_strided_slice %1 {offsets = [0, 0, 0, 0, 0], sizes = [2, 8, 1, 16, 128], strides = [1, 1, 1, 1, 1]} : vector<2x8x2x16x128xf32> to vector<2x8x1x16x128xf32>
    %3 = vector.shape_cast %2 : vector<2x8x1x16x128xf32> to vector<2x8x16x128xf32>
    %4 = vector.extract_strided_slice %1 {offsets = [0, 0, 1, 0, 0], sizes = [2, 8, 1, 16, 128], strides = [1, 1, 1, 1, 1]} : vector<2x8x2x16x128xf32> to vector<2x8x1x16x128xf32>
    %5 = vector.shape_cast %4 : vector<2x8x1x16x128xf32> to vector<2x8x16x128xf32>
    %6 = arith.maximumf %3, %5 : vector<2x8x16x128xf32>
    %7 = vector.shape_cast %6 : vector<2x8x16x128xf32> to vector<2x8x8x2x128xf32>
    %8 = vector.extract_strided_slice %7 {offsets = [0, 0, 0, 0, 0], sizes = [2, 8, 8, 1, 128], strides = [1, 1, 1, 1, 1]} : vector<2x8x8x2x128xf32> to vector<2x8x8x1x128xf32>
    %9 = vector.shape_cast %8 : vector<2x8x8x1x128xf32> to vector<2x8x8x128xf32>
    %10 = vector.extract_strided_slice %7 {offsets = [0, 0, 0, 1, 0], sizes = [2, 8, 8, 1, 128], strides = [1, 1, 1, 1, 1]} : vector<2x8x8x2x128xf32> to vector<2x8x8x1x128xf32>
    %11 = vector.shape_cast %10 : vector<2x8x8x1x128xf32> to vector<2x8x8x128xf32>
    %12 = arith.maximumf %9, %11 : vector<2x8x8x128xf32>
    %cst = arith.constant 0.000000e+00 : f32
    %13 = vector.broadcast %cst : f32 to vector<2x10x10x128xf32>
    %c0_3 = arith.constant 0 : index
    %c0_4 = arith.constant 0 : index
    %c0_5 = arith.constant 0 : index
    %c0_6 = arith.constant 0 : index
    %14 = vector.load %arg8[%c0_3, %c0_4, %c0_5, %c0_6] : memref<2x10x10x128xf32, #tpu.memory_space<vmem>>, vector<2x10x10x128xf32>
    tpu.vector_store %arg8[%c0_3, %c0_4, %c0_5, %c0_6], %13 {strides = array<i32>} : memref<2x10x10x128xf32, #tpu.memory_space<vmem>>, vector<2x10x10x128xf32>,
    %c0_7 = arith.constant 0 : index
    %c1 = arith.constant 1 : index
    %c1_8 = arith.constant 1 : index
    %c0_9 = arith.constant 0 : index
    %15 = vector.load %arg8[%c0_7, %c1, %c1_8, %c0_9] : memref<2x10x10x128xf32, #tpu.memory_space<vmem>>, vector<2x8x8x128xf32>
    tpu.vector_store %arg8[%c0_7, %c1, %c1_8, %c0_9], %12 {strides = array<i32>} : memref<2x10x10x128xf32, #tpu.memory_space<vmem>>, vector<2x8x8x128xf32>,
    %c0_10 = arith.constant 0 : index
    %c0_11 = arith.constant 0 : index
    %c0_12 = arith.constant 0 : index
    %c0_13 = arith.constant 0 : index
    %16 = vector.load %arg8[%c0_10, %c0_11, %c0_12, %c0_13] : memref<2x10x10x128xf32, #tpu.memory_space<vmem>>, vector<2x8x8x128xf32>
    %c0_14 = arith.constant 0 : index
    %c0_15 = arith.constant 0 : index
    %c1_16 = arith.constant 1 : index
    %c0_17 = arith.constant 0 : index
    %17 = vector.load %arg8[%c0_14, %c0_15, %c1_16, %c0_17] : memref<2x10x10x128xf32, #tpu.memory_space<vmem>>, vector<2x8x8x128xf32>
    %c0_18 = arith.constant 0 : index
    %c0_19 = arith.constant 0 : index
    %c2 = arith.constant 2 : index
    %c0_20 = arith.constant 0 : index
    %18 = vector.load %arg8[%c0_18, %c0_19, %c2, %c0_20] : memref<2x10x10x128xf32, #tpu.memory_space<vmem>>, vector<2x8x8x128xf32>
    %c0_21 = arith.constant 0 : index
    %c1_22 = arith.constant 1 : index
    %c0_23 = arith.constant 0 : index
    %c0_24 = arith.constant 0 : index
    %19 = vector.load %arg8[%c0_21, %c1_22, %c0_23, %c0_24] : memref<2x10x10x128xf32, #tpu.memory_space<vmem>>, vector<2x8x8x128xf32>
    %c0_25 = arith.constant 0 : index
    %c1_26 = arith.constant 1 : index
    %c1_27 = arith.constant 1 : index
    %c0_28 = arith.constant 0 : index
    %20 = vector.load %arg8[%c0_25, %c1_26, %c1_27, %c0_28] : memref<2x10x10x128xf32, #tpu.memory_space<vmem>>, vector<2x8x8x128xf32>
    %c0_29 = arith.constant 0 : index
    %c1_30 = arith.constant 1 : index
    %c2_31 = arith.constant 2 : index
    %c0_32 = arith.constant 0 : index
    %21 = vector.load %arg8[%c0_29, %c1_30, %c2_31, %c0_32] : memref<2x10x10x128xf32, #tpu.memory_space<vmem>>, vector<2x8x8x128xf32>
    %c0_33 = arith.constant 0 : index
    %c2_34 = arith.constant 2 : index
    %c0_35 = arith.constant 0 : index
    %c0_36 = arith.constant 0 : index
    %22 = vector.load %arg8[%c0_33, %c2_34, %c0_35, %c0_36] : memref<2x10x10x128xf32, #tpu.memory_space<vmem>>, vector<2x8x8x128xf32>
    %c0_37 = arith.constant 0 : index
    %c2_38 = arith.constant 2 : index
    %c1_39 = arith.constant 1 : index
    %c0_40 = arith.constant 0 : index
    %23 = vector.load %arg8[%c0_37, %c2_38, %c1_39, %c0_40] : memref<2x10x10x128xf32, #tpu.memory_space<vmem>>, vector<2x8x8x128xf32>
    %c0_41 = arith.constant 0 : index
    %c2_42 = arith.constant 2 : index
    %c2_43 = arith.constant 2 : index
    %c0_44 = arith.constant 0 : index
    %24 = vector.load %arg8[%c0_41, %c2_42, %c2_43, %c0_44] : memref<2x10x10x128xf32, #tpu.memory_space<vmem>>, vector<2x8x8x128xf32>
    %25 = tpu.concatenate %16, %17, %18, %19, %20, %21, %22, %23, %24 in 3 : vector<2x8x8x128xf32>, vector<2x8x8x128xf32>, vector<2x8x8x128xf32>, vector<2x8x8x128xf32>, vector<2x8x8x128xf32>, vector<2x8x8x128xf32>, vector<2x8x8x128xf32>, vector<2x8x8x128xf32>, vector<2x8x8x128xf32> -> vector<2x8x8x1152xf32>
    %26 = vector.shape_cast %25 : vector<2x8x8x1152xf32> to vector<128x1152xf32>
    %c0_45 = arith.constant 0 : index
    %c0_46 = arith.constant 0 : index
    %27 = vector.load %arg1[%c0_45, %c0_46] : memref<1152x128xf32, #tpu.memory_space<vmem>>, vector<1152x128xf32>
    %cst_47 = arith.constant dense<0.000000e+00> : vector<128x128xf32>
    %28 = tpu.matmul %26, %27, %cst_47 {dimension_numbers = #tpu.dot_dimension_numbers<[1], [0], [0], [1], [0, 0, 1, 1], [], []>} : vector<128x1152xf32>, vector<1152x128xf32>, vector<128x128xf32> -> vector<128x128xf32>
    %cst_48 = arith.constant dense<0.000000e+00> : vector<128xf32>
    %29 = vector.multi_reduction <add>, %28, %cst_48 [0] : vector<128x128xf32> to vector<128xf32>
    %30 = vector.shape_cast %29 : vector<128xf32> to vector<1x128xf32>
    %cst_49 = arith.constant 7.812500e-03 : f32
    %31 = vector.broadcast %cst_49 : f32 to vector<1x128xf32>
    %32 = arith.mulf %30, %31 : vector<1x128xf32>
    %33 = arith.mulf %28, %28 : vector<128x128xf32>
    %cst_50 = arith.constant dense<0.000000e+00> : vector<128xf32>
    %34 = vector.multi_reduction <add>, %33, %cst_50 [0] : vector<128x128xf32> to vector<128xf32>
    %35 = vector.shape_cast %34 : vector<128xf32> to vector<1x128xf32>
    %cst_51 = arith.constant 7.812500e-03 : f32
    %36 = vector.broadcast %cst_51 : f32 to vector<1x128xf32>
    %37 = arith.mulf %35, %36 : vector<1x128xf32>
    %38 = arith.mulf %32, %32 : vector<1x128xf32>
    %39 = arith.subf %37, %38 : vector<1x128xf32>
    %cst_52 = arith.constant 0.000000e+00 : f32
    %40 = vector.broadcast %cst_52 : f32 to vector<1x128xf32>
    %41 = arith.maximumf %39, %40 : vector<1x128xf32>
    %c0_53 = arith.constant 0 : index
    %c0_54 = arith.constant 0 : index
    %42 = vector.load %arg2[%c0_53, %c0_54] : memref<1x128xf32, #tpu.memory_space<vmem>>, vector<1x128xf32>
    %cst_55 = arith.constant 9.99999974E-6 : f32
    %43 = vector.broadcast %cst_55 : f32 to vector<1x128xf32>
    %44 = arith.addf %41, %43 : vector<1x128xf32>
    %45 = math.rsqrt %44 : vector<1x128xf32>
    %46 = arith.mulf %42, %45 : vector<1x128xf32>
    %c0_56 = arith.constant 0 : index
    %c0_57 = arith.constant 0 : index
    %47 = vector.load %arg3[%c0_56, %c0_57] : memref<1x128xf32, #tpu.memory_space<vmem>>, vector<1x128xf32>
    %48 = arith.mulf %32, %46 : vector<1x128xf32>
    %49 = arith.subf %47, %48 : vector<1x128xf32>
    %50 = vector.broadcast %46 : vector<1x128xf32> to vector<128x128xf32>
    %51 = arith.mulf %28, %50 : vector<128x128xf32>
    %52 = vector.broadcast %49 : vector<1x128xf32> to vector<128x128xf32>
    %53 = arith.addf %51, %52 : vector<128x128xf32>
    %cst_58 = arith.constant 0.000000e+00 : f32
    %54 = vector.broadcast %cst_58 : f32 to vector<128x128xf32>
    %55 = arith.maximumf %53, %54 : vector<128x128xf32>
    %56 = vector.shape_cast %55 : vector<128x128xf32> to vector<2x8x8x128xf32>
    %c0_59 = arith.constant 0 : index
    %c1_60 = arith.constant 1 : index
    %c1_61 = arith.constant 1 : index
    %c0_62 = arith.constant 0 : index
    %57 = vector.load %arg8[%c0_59, %c1_60, %c1_61, %c0_62] : memref<2x10x10x128xf32, #tpu.memory_space<vmem>>, vector<2x8x8x128xf32>
    tpu.vector_store %arg8[%c0_59, %c1_60, %c1_61, %c0_62], %56 {strides = array<i32>} : memref<2x10x10x128xf32, #tpu.memory_space<vmem>>, vector<2x8x8x128xf32>,
    %c0_63 = arith.constant 0 : index
    %c0_64 = arith.constant 0 : index
    %c0_65 = arith.constant 0 : index
    %c0_66 = arith.constant 0 : index
    %58 = vector.load %arg8[%c0_63, %c0_64, %c0_65, %c0_66] : memref<2x10x10x128xf32, #tpu.memory_space<vmem>>, vector<2x8x8x128xf32>
    %c0_67 = arith.constant 0 : index
    %c0_68 = arith.constant 0 : index
    %c1_69 = arith.constant 1 : index
    %c0_70 = arith.constant 0 : index
    %59 = vector.load %arg8[%c0_67, %c0_68, %c1_69, %c0_70] : memref<2x10x10x128xf32, #tpu.memory_space<vmem>>, vector<2x8x8x128xf32>
    %c0_71 = arith.constant 0 : index
    %c0_72 = arith.constant 0 : index
    %c2_73 = arith.constant 2 : index
    %c0_74 = arith.constant 0 : index
    %60 = vector.load %arg8[%c0_71, %c0_72, %c2_73, %c0_74] : memref<2x10x10x128xf32, #tpu.memory_space<vmem>>, vector<2x8x8x128xf32>
    %c0_75 = arith.constant 0 : index
    %c1_76 = arith.constant 1 : index
    %c0_77 = arith.constant 0 : index
    %c0_78 = arith.constant 0 : index
    %61 = vector.load %arg8[%c0_75, %c1_76, %c0_77, %c0_78] : memref<2x10x10x128xf32, #tpu.memory_space<vmem>>, vector<2x8x8x128xf32>
    %c0_79 = arith.constant 0 : index
    %c1_80 = arith.constant 1 : index
    %c1_81 = arith.constant 1 : index
    %c0_82 = arith.constant 0 : index
    %62 = vector.load %arg8[%c0_79, %c1_80, %c1_81, %c0_82] : memref<2x10x10x128xf32, #tpu.memory_space<vmem>>, vector<2x8x8x128xf32>
    %c0_83 = arith.constant 0 : index
    %c1_84 = arith.constant 1 : index
    %c2_85 = arith.constant 2 : index
    %c0_86 = arith.constant 0 : index
    %63 = vector.load %arg8[%c0_83, %c1_84, %c2_85, %c0_86] : memref<2x10x10x128xf32, #tpu.memory_space<vmem>>, vector<2x8x8x128xf32>
    %c0_87 = arith.constant 0 : index
    %c2_88 = arith.constant 2 : index
    %c0_89 = arith.constant 0 : index
    %c0_90 = arith.constant 0 : index
    %64 = vector.load %arg8[%c0_87, %c2_88, %c0_89, %c0_90] : memref<2x10x10x128xf32, #tpu.memory_space<vmem>>, vector<2x8x8x128xf32>
    %c0_91 = arith.constant 0 : index
    %c2_92 = arith.constant 2 : index
    %c1_93 = arith.constant 1 : index
    %c0_94 = arith.constant 0 : index
    %65 = vector.load %arg8[%c0_91, %c2_92, %c1_93, %c0_94] : memref<2x10x10x128xf32, #tpu.memory_space<vmem>>, vector<2x8x8x128xf32>
    %c0_95 = arith.constant 0 : index
    %c2_96 = arith.constant 2 : index
    %c2_97 = arith.constant 2 : index
    %c0_98 = arith.constant 0 : index
    %66 = vector.load %arg8[%c0_95, %c2_96, %c2_97, %c0_98] : memref<2x10x10x128xf32, #tpu.memory_space<vmem>>, vector<2x8x8x128xf32>
    %67 = tpu.concatenate %58, %59, %60, %61, %62, %63, %64, %65, %66 in 3 : vector<2x8x8x128xf32>, vector<2x8x8x128xf32>, vector<2x8x8x128xf32>, vector<2x8x8x128xf32>, vector<2x8x8x128xf32>, vector<2x8x8x128xf32>, vector<2x8x8x128xf32>, vector<2x8x8x128xf32>, vector<2x8x8x128xf32> -> vector<2x8x8x1152xf32>
    %68 = vector.shape_cast %67 : vector<2x8x8x1152xf32> to vector<128x1152xf32>
    %c0_99 = arith.constant 0 : index
    %c0_100 = arith.constant 0 : index
    %69 = vector.load %arg4[%c0_99, %c0_100] : memref<1152x128xf32, #tpu.memory_space<vmem>>, vector<1152x128xf32>
    %cst_101 = arith.constant dense<0.000000e+00> : vector<128x128xf32>
    %70 = tpu.matmul %68, %69, %cst_101 {dimension_numbers = #tpu.dot_dimension_numbers<[1], [0], [0], [1], [0, 0, 1, 1], [], []>} : vector<128x1152xf32>, vector<1152x128xf32>, vector<128x128xf32> -> vector<128x128xf32>
    %cst_102 = arith.constant dense<0.000000e+00> : vector<128xf32>
    %71 = vector.multi_reduction <add>, %70, %cst_102 [0] : vector<128x128xf32> to vector<128xf32>
    %72 = vector.shape_cast %71 : vector<128xf32> to vector<1x128xf32>
    %cst_103 = arith.constant 7.812500e-03 : f32
    %73 = vector.broadcast %cst_103 : f32 to vector<1x128xf32>
    %74 = arith.mulf %72, %73 : vector<1x128xf32>
    %75 = arith.mulf %70, %70 : vector<128x128xf32>
    %cst_104 = arith.constant dense<0.000000e+00> : vector<128xf32>
    %76 = vector.multi_reduction <add>, %75, %cst_104 [0] : vector<128x128xf32> to vector<128xf32>
    %77 = vector.shape_cast %76 : vector<128xf32> to vector<1x128xf32>
    %cst_105 = arith.constant 7.812500e-03 : f32
    %78 = vector.broadcast %cst_105 : f32 to vector<1x128xf32>
    %79 = arith.mulf %77, %78 : vector<1x128xf32>
    %80 = arith.mulf %74, %74 : vector<1x128xf32>
    %81 = arith.subf %79, %80 : vector<1x128xf32>
    %cst_106 = arith.constant 0.000000e+00 : f32
    %82 = vector.broadcast %cst_106 : f32 to vector<1x128xf32>
    %83 = arith.maximumf %81, %82 : vector<1x128xf32>
    %c0_107 = arith.constant 0 : index
    %c0_108 = arith.constant 0 : index
    %84 = vector.load %arg5[%c0_107, %c0_108] : memref<1x128xf32, #tpu.memory_space<vmem>>, vector<1x128xf32>
    %cst_109 = arith.constant 9.99999974E-6 : f32
    %85 = vector.broadcast %cst_109 : f32 to vector<1x128xf32>
    %86 = arith.addf %83, %85 : vector<1x128xf32>
    %87 = math.rsqrt %86 : vector<1x128xf32>
    %88 = arith.mulf %84, %87 : vector<1x128xf32>
    %c0_110 = arith.constant 0 : index
    %c0_111 = arith.constant 0 : index
    %89 = vector.load %arg6[%c0_110, %c0_111] : memref<1x128xf32, #tpu.memory_space<vmem>>, vector<1x128xf32>
    %90 = arith.mulf %74, %88 : vector<1x128xf32>
    %91 = arith.subf %89, %90 : vector<1x128xf32>
    %92 = vector.broadcast %88 : vector<1x128xf32> to vector<128x128xf32>
    %93 = arith.mulf %70, %92 : vector<128x128xf32>
    %94 = vector.broadcast %91 : vector<1x128xf32> to vector<128x128xf32>
    %95 = arith.addf %93, %94 : vector<128x128xf32>
    %cst_112 = arith.constant 0.000000e+00 : f32
    %96 = vector.broadcast %cst_112 : f32 to vector<128x128xf32>
    %97 = arith.maximumf %95, %96 : vector<128x128xf32>
    %98 = vector.shape_cast %97 : vector<128x128xf32> to vector<2x8x8x128xf32>
    %c0_113 = arith.constant 0 : index
    %c0_114 = arith.constant 0 : index
    %c0_115 = arith.constant 0 : index
    %c0_116 = arith.constant 0 : index
    %99 = vector.load %arg7[%c0_113, %c0_114, %c0_115, %c0_116] : memref<2x8x8x128xf32, #tpu.memory_space<vmem>>, vector<2x8x8x128xf32>
    tpu.vector_store %arg7[%c0_113, %c0_114, %c0_115, %c0_116], %98 {strides = array<i32>} : memref<2x8x8x128xf32, #tpu.memory_space<vmem>>, vector<2x8x8x128xf32>,
    return
  }
}

</mosaic_0001>

<bundles_post_ra>
// kernel: down_forward.1
= control target key start
LH: loop header
LB: loop body
LE: loop exit
PB: predicated region body
PF: predicated region fallthrough
CT: control target
= control target key end

     0   :  { %v3522_v3 = vmov 0.0   ;;  %vm1154_vm0 = vcmask 1041409   ;;  %vm1156_vm1 = vcmask 1042434   ;;  %vm1158_vm2 = vcmask 1043459   ;;  %s6045_s1 = inlined_call_operand.vmem [shape: f32[1152,128], index: 1, kind: input, shape index: {}]   ;;  %s6046_s0 = inlined_call_operand.vmem [shape: f32[2,16,16,128], index: 0, kind: input, shape index: {}]   ;;  %s6047_s4 = inlined_call_operand.vmem [shape: f32[1152,128], index: 4, kind: input, shape index: {}]   ;;  %s6048_s2 = inlined_call_operand.vmem [shape: f32[1,128], index: 2, kind: input, shape index: {}]   ;;  %s6049_s3 = inlined_call_operand.vmem [shape: f32[1,128], index: 3, kind: input, shape index: {}]   ;;  %s6050_s5 = inlined_call_operand.vmem [shape: f32[1,128], index: 5, kind: input, shape index: {}]   ;;  %s6051_s6 = inlined_call_operand.vmem [shape: f32[1,128], index: 6, kind: input, shape index: {}]   ;;  %s6052_s7 = inlined_call_operand.vmem [shape: f32[2,8,8,128], index: 7, kind: output, shape index: {}]  }
   0x1   :  { %v1466_v0 = vld [vmem:[%s6045_s1 + $0x78] sm:$0xff]  ;;  %v1465_v2 = vld [vmem:[%s6045_s1 + $0x70] sm:$0xff]  ;;  %878 = vst [vmem:[#allocation2 + $0xa0] sm:$0xff] %v3522_v3  ;;  %v1464_v5 = vld [vmem:[%s6045_s1 + $0x68] sm:$0xff]  ;;  %vm1160_vm3 = vcmask 1044484   ;;  %vm1162_vm4 = vcmask 1045509  }
   0x2   :  { %v1482_v1 = vld [vmem:[%s6045_s1 + $0xf8] sm:$0xff]  ;;  %3483 = vmatpush.msra.mxu2 %v1466_v0  ;;  %v1481_v4 = vld [vmem:[%s6045_s1 + $0xf0] sm:$0xff]  ;;  %858 = vst [vmem:[#allocation2] sm:$0xff] %v3522_v3  ;;  %v1480_v6 = vld [vmem:[%s6045_s1 + $0xe8] sm:$0xff]  ;;  %1595 = vmatpush.msra.mxu0 %v1466_v0  ;;  %vm1164_vm5 = vcmask 1046534   ;;  %vm1166_vm6 = vcmask 1047559  }
   0x3   :  { %3499 = vmatpush.msra.mxu3 %v1482_v1  ;;  %1660 = vmatpush.msra.mxu1 %v1482_v1  ;;  %859 = vst [vmem:[#allocation2 + $0x8] sm:$0x3] %v3522_v3  ;;  %v1463_v7 = vld [vmem:[%s6045_s1 + $0x60] sm:$0xff]  ;;  %v1462_v9 = vld [vmem:[%s6045_s1 + $0x58] sm:$0xff]  ;;  %v1461_v11 = vld [vmem:[%s6045_s1 + $0x50] sm:$0xff] }
   0x4   :  { %3484 = vmatpush.msra.mxu2 %v1465_v2  ;;  %860 = vst [vmem:[#allocation2 + $0x10] sm:$0xff] %v3522_v3  ;;  %v1479_v8 = vld [vmem:[%s6045_s1 + $0xe0] sm:$0xff]  ;;  %1596 = vmatpush.msra.mxu0 %v1465_v2  ;;  %v1478_v10 = vld [vmem:[%s6045_s1 + $0xd8] sm:$0xff]  ;;  %v1477_v12 = vld [vmem:[%s6045_s1 + $0xd0] sm:$0xff] }
   0x5   :  { %3500 = vmatpush.msra.mxu3 %v1481_v4  ;;  %1661 = vmatpush.msra.mxu1 %v1481_v4  ;;  %861 = vst [vmem:[#allocation2 + $0x18] sm:$0x3] %v3522_v3  ;;  %v1460_v13 = vld [vmem:[%s6045_s1 + $0x48] sm:$0xff]  ;;  %v1459_v15 = vld [vmem:[%s6045_s1 + $0x40] sm:$0xff]  ;;  %v60_v19 = vld [vmem:[%s6046_s0 + $0x110] sm:$0xff] }
   0x6   :  { %3485 = vmatpush.msra.mxu2 %v1464_v5  ;;  %862 = vst [vmem:[#allocation2 + $0x20] sm:$0xff] %v3522_v3  ;;  %1597 = vmatpush.msra.mxu0 %v1464_v5  ;;  %v1476_v14 = vld [vmem:[%s6045_s1 + $0xc8] sm:$0xff]  ;;  %v1475_v16 = vld [vmem:[%s6045_s1 + $0xc0] sm:$0xff]  ;;  %v61_v20 = vld [vmem:[%s6046_s0 + $0x118] sm:$0xff] }
   0x7   :  { %3501 = vmatpush.msra.mxu3 %v1480_v6  ;;  %1662 = vmatpush.msra.mxu1 %v1480_v6  ;;  %863 = vst [vmem:[#allocation2 + $0x28] sm:$0x3] %v3522_v3  ;;  %v58_v17 = vld [vmem:[%s6046_s0 + $0x100] sm:$0xff]  ;;  %v59_v18 = vld [vmem:[%s6046_s0 + $0x108] sm:$0xff]  ;;  %v1458_v22 = vld [vmem:[%s6045_s1 + $0x38] sm:$0xff] }
   0x8   :  { %3486 = vmatpush.msra.mxu2 %v1463_v7  ;;  %864 = vst [vmem:[#allocation2 + $0x30] sm:$0xff] %v3522_v3  ;;  %1598 = vmatpush.msra.mxu0 %v1463_v7  ;;  %v106_v21 = vmax.f32 %v58_v17, %v60_v19  ;;  %v1474_v23 = vld [vmem:[%s6045_s1 + $0xb8] sm:$0xff]  ;;  %v1457_v24 = vld [vmem:[%s6045_s1 + $0x30] sm:$0xff]  ;;  %v107_v25 = vmax.f32 %v59_v18, %v61_v20  ;;  %v1456_v35 = vld [vmem:[%s6045_s1 + $0x28] sm:$0xff] }
   0x9   :  { %3502 = vmatpush.msra.mxu3 %v1479_v8  ;;  %1663 = vmatpush.msra.mxu1 %v1479_v8  ;;  %865 = vst [vmem:[#allocation2 + $0x38] sm:$0x3] %v3522_v3  ;;  %v1473_v26 = vld [vmem:[%s6045_s1 + $0xb0] sm:$0xff]  ;;  %v1472_v36 = vld [vmem:[%s6045_s1 + $0xa8] sm:$0xff]  ;;  %v1455_v41 = vld [vmem:[%s6045_s1 + $0x20] sm:$0xff] }
   0xa   :  { %3487 = vmatpush.msra.mxu2 %v1462_v9  ;;  %866 = vst [vmem:[#allocation2 + $0x40] sm:$0xff] %v3522_v3  ;;  %1599 = vmatpush.msra.mxu0 %v1462_v9  ;;  %v202_v27 = vrot.slane %v106_v21, 2  ;;  %v203_v28 = vrot.slane %v106_v21, 4  ;;  %v204_v29 = vrot.slane %v106_v21, 6  ;;  %v3419_v30 = vrot.slane %v106_v21, 9  ;;  %v1471_v42 = vld [vmem:[%s6045_s1 + $0xa0] sm:$0xff] }
   0xb   :  { %3503 = vmatpush.msra.mxu3 %v1478_v10  ;;  %1664 = vmatpush.msra.mxu1 %v1478_v10  ;;  %867 = vst [vmem:[#allocation2 + $0x48] sm:$0x3] %v3522_v3  ;;  %v205_v31 = vrot.slane %v107_v25, 2  ;;  %v206_v32 = vrot.slane %v107_v25, 4  ;;  %v207_v33 = vrot.slane %v107_v25, 6  ;;  %v3423_v34 = vrot.slane %v107_v25, 9 }
   0xc   :  { %3488 = vmatpush.msra.mxu2 %v1461_v11  ;;  %868 = vst [vmem:[#allocation2 + $0x50] sm:$0xff] %v3522_v3  ;;  %1600 = vmatpush.msra.mxu0 %v1461_v11  ;;  %v3420_v37 = vrot.slane %v202_v27, 9  ;;  %v3421_v38 = vrot.slane %v203_v28, 9  ;;  %v3422_v39 = vrot.slane %v204_v29, 9  ;;  %v794_v40 = vmax.f32 %v106_v21, %v3419_v30  ;;  %v62_v47 = vld [vmem:[%s6046_s0 + $0x120] sm:$0xff]  ;;  %v63_v48 = vld [vmem:[%s6046_s0 + $0x128] sm:$0xff] }
   0xd   :  { %3504 = vmatpush.msra.mxu3 %v1477_v12  ;;  %1665 = vmatpush.msra.mxu1 %v1477_v12  ;;  %869 = vst [vmem:[#allocation2 + $0x58] sm:$0x3] %v3522_v3  ;;  %v3424_v43 = vrot.slane %v205_v31, 9  ;;  %v3425_v44 = vrot.slane %v206_v32, 9  ;;  %v3426_v45 = vrot.slane %v207_v33, 9  ;;  %v3666_v46 = vmax.f32 %v107_v25, %v3423_v34  ;;  %v64_v52 = vld [vmem:[%s6046_s0 + $0x130] sm:$0xff] }
   0xe   :  { %3489 = vmatpush.msra.mxu2 %v1460_v13  ;;  %870 = vst [vmem:[#allocation2 + $0x60] sm:$0xff] %v3522_v3  ;;  %1601 = vmatpush.msra.mxu0 %v1460_v13  ;;  %v795_v49 = vmax.f32 %v202_v27, %v3420_v37  ;;  %v796_v50 = vmax.f32 %v203_v28, %v3421_v38  ;;  %v65_v53 = vld [vmem:[%s6046_s0 + $0x138] sm:$0xff]  ;;  %v26_v54 = vld [vmem:[%s6046_s0] sm:$0xff]  ;;  %v27_v59 = vld [vmem:[%s6046_s0 + $0x8] sm:$0xff]  ;;  %v1090_v62 = vperm.slane %v794_v40, 0 }
   0xf   :  { %3505 = vmatpush.msra.mxu3 %v1476_v14  ;;  %1666 = vmatpush.msra.mxu1 %v1476_v14  ;;  %871 = vst [vmem:[#allocation2 + $0x68] sm:$0x3] %v3522_v3  ;;  %v797_v51 = vmax.f32 %v204_v29, %v3422_v39  ;;  %v1454_v55 = vld [vmem:[%s6045_s1 + $0x18] sm:$0xff]  ;;  %v799_v56 = vmax.f32 %v205_v31, %v3424_v43  ;;  %v28_v60 = vld [vmem:[%s6046_s0 + $0x10] sm:$0xff]  ;;  %v1094_v4 = vperm.slane %v3666_v46, 0  ;;  %v1452_v20 = vld [vmem:[%s6045_s1 + $0x8] sm:$0xff] }
  0x10   :  { %3490 = vmatpush.msra.mxu2 %v1459_v15  ;;  %872 = vst [vmem:[#allocation2 + $0x70] sm:$0xff] %v3522_v3  ;;  %1602 = vmatpush.msra.mxu0 %v1459_v15  ;;  %v3688_v57 = vmax.f32 %v206_v32, %v3425_v44  ;;  %v3690_v58 = vmax.f32 %v207_v33, %v3426_v45  ;;  %v29_v61 = vld [vmem:[%s6046_s0 + $0x18] sm:$0xff]  ;;  %v1091_v63 = vperm.slane %v795_v49, 0  ;;  %v1092_v0 = vperm.slane %v796_v50, 0  ;;  %v1453_v11 = vld [vmem:[%s6045_s1 + $0x10] sm:$0xff]  ;;  %v1468_v21 = vld [vmem:[%s6045_s1 + $0x88] sm:$0xff] }
  0x11   :  { %3506 = vmatpush.msra.mxu3 %v1475_v16  ;;  %1667 = vmatpush.msra.mxu1 %v1475_v16  ;;  %873 = vst [vmem:[#allocation2 + $0x78] sm:$0x3] %v3522_v3  ;;  %v1093_v1 = vperm.slane %v797_v51, 0  ;;  %v1470_v2 = vld [vmem:[%s6045_s1 + $0x98] sm:$0xff]  ;;  %v1095_v5 = vperm.slane %v799_v56, 0  ;;  %v108_v9 = vmax.f32 %v62_v47, %v64_v52  ;;  %v3711_v10 = vmax.f32 %v63_v48, %v65_v53  ;;  %v1469_v12 = vld [vmem:[%s6045_s1 + $0x90] sm:$0xff] }
  0x12   :  { %3491 = vmatpush.msra.mxu2 %v1458_v22  ;;  %874 = vst [vmem:[#allocation2 + $0x80] sm:$0xff] %v3522_v3  ;;  %1603 = vmatpush.msra.mxu0 %v1458_v22  ;;  %v1096_v6 = vperm.slane %v3688_v57, 0  ;;  %v1097_v7 = vperm.slane %v3690_v58, 0  ;;  %v1217_v8 = vsel %vm1154_vm0, %v1091_v63, %v1090_v62  ;;  %v3721_v14 = vmax.f32 %v26_v54, %v28_v60  ;;  %v1451_v30 = vld [vmem:[%s6045_s1] sm:$0xff]  ;;  %v1497_v46 = vld [vmem:[%s6045_s1 + $0x170] sm:$0xff]  ;;  %v1496_v60 = vld [vmem:[%s6045_s1 + $0x168] sm:$0xff] }
  0x13   :  { %3507 = vmatpush.msra.mxu3 %v1474_v23  ;;  %1668 = vmatpush.msra.mxu1 %v1474_v23  ;;  %875 = vst [vmem:[#allocation2 + $0x88] sm:$0x3] %v3522_v3  ;;  %v1218_v13 = vsel %vm1156_vm1, %v1092_v0, %v1217_v8  ;;  %v3723_v15 = vmax.f32 %v27_v59, %v29_v61  ;;  %v208_v17 = vrot.slane %v108_v9, 2  ;;  %v209_v18 = vrot.slane %v108_v9, 4  ;;  %v1467_v31 = vld [vmem:[%s6045_s1 + $0x80] sm:$0xff]  ;;  %v1513_v50 = vld [vmem:[%s6045_s1 + $0x1f0] sm:$0xff] }
  0x14   :  { %3492 = vmatpush.msra.mxu2 %v1457_v24  ;;  %876 = vst [vmem:[#allocation2 + $0x90] sm:$0xff] %v3522_v3  ;;  %1604 = vmatpush.msra.mxu0 %v1457_v24  ;;  %v1219_v16 = vsel %vm1158_vm2, %v1093_v1, %v1218_v13  ;;  %v210_v19 = vrot.slane %v108_v9, 6  ;;  %v211_v23 = vrot.slane %v3711_v10, 2  ;;  %v212_v24 = vrot.slane %v3711_v10, 4  ;;  %v1322_v51 = vld [vmem:[#allocation2 + $0x1] sm:$0xff] }
  0x15   :  { %3508 = vmatpush.msra.mxu3 %v1473_v26  ;;  %1669 = vmatpush.msra.mxu1 %v1473_v26  ;;  %877 = vst [vmem:[#allocation2 + $0x98] sm:$0x3] %v3522_v3  ;;  %v1220_v22 = vsel %vm1160_vm3, %v1094_v4, %v1219_v16  ;;  %v213_v25 = vrot.slane %v3711_v10, 6  ;;  %v3427_v27 = vrot.slane %v108_v9, 9  ;;  %v3428_v28 = vrot.slane %v208_v17, 9  ;;  %v1512_v61 = vld [vmem:[%s6045_s1 + $0x1e8] sm:$0xff] }
  0x16   :  { %3493 = vmatpush.msra.mxu2 %v1456_v35  ;;  %879 = vst [vmem:[#allocation2 + $0xa8] sm:$0x3] %v3522_v3  ;;  %1605 = vmatpush.msra.mxu0 %v1456_v35  ;;  %v1221_v26 = vsel %vm1162_vm4, %v1095_v5, %v1220_v22  ;;  %v3429_v29 = vrot.slane %v209_v18, 9  ;;  %v3430_v33 = vrot.slane %v210_v19, 9  ;;  %v3431_v34 = vrot.slane %v3711_v10, 9  ;;  %v1495_v8 = vld [vmem:[%s6045_s1 + $0x160] sm:$0xff] }
  0x17   :  { %3509 = vmatpush.msra.mxu3 %v1472_v36  ;;  %1670 = vmatpush.msra.mxu1 %v1472_v36  ;;  %880 = vst [vmem:[#allocation2 + $0xb0] sm:$0xff] %v3522_v3  ;;  %v1222_v32 = vsel %vm1164_vm5, %v1096_v6, %v1221_v26  ;;  %v3432_v35 = vrot.slane %v211_v23, 9  ;;  %v3433_v38 = vrot.slane %v212_v24, 9  ;;  %v3434_v39 = vrot.slane %v213_v25, 9  ;;  %v1529_v16 = vld [vmem:[%s6045_s1 + $0x270] sm:$0xff]  ;;  %v1494_v22 = vld [vmem:[%s6045_s1 + $0x158] sm:$0xff] }
  0x18   :  { %3494 = vmatpush.msra.mxu2 %v1455_v41  ;;  %881 = vst [vmem:[#allocation2 + $0xb8] sm:$0x3] %v3522_v3  ;;  %1606 = vmatpush.msra.mxu0 %v1455_v41  ;;  %v3751_v37 = vsel %vm1166_vm6, %v1097_v7, %v1222_v32  ;;  %v802_v40 = vmax.f32 %v108_v9, %v3427_v27  ;;  %v1498_v41 = vld [vmem:[%s6045_s1 + $0x178] sm:$0xff]  ;;  %v154_v0 = vrot.slane %v3721_v14, 2  ;;  %v155_v1 = vrot.slane %v3721_v14, 4  ;;  %v1511_v9 = vld [vmem:[%s6045_s1 + $0x1e0] sm:$0xff] }
  0x19   :  { %3510 = vmatpush.msra.mxu3 %v1471_v42  ;;  %882 = vst [vmem:[#allocation2 + $0xc0] sm:$0xff] %v3522_v3  ;;  %1671 = vmatpush.msra.mxu1 %v1471_v42  ;;  %v1514_v42 = vld [vmem:[%s6045_s1 + $0x1f8] sm:$0xff]  ;;  %v803_v43 = vmax.f32 %v208_v17, %v3428_v28  ;;  %v804_v44 = vmax.f32 %v209_v18, %v3429_v29  ;;  %v156_v5 = vrot.slane %v3721_v14, 6  ;;  %v157_v6 = vrot.slane %v3723_v15, 2  ;;  %v66_v26 = vld [vmem:[%s6046_s0 + $0x140] sm:$0xff]  ;;  %v67_v32 = vld [vmem:[%s6046_s0 + $0x148] sm:$0xff] }
  0x1a   :  { %3495 = vmatpush.msra.mxu2 %v1454_v55  ;;  %883 = vst [vmem:[#allocation2 + $0xc8] sm:$0x3] %v3522_v3  ;;  %1607 = vmatpush.msra.mxu0 %v1454_v55  ;;  %v805_v45 = vmax.f32 %v210_v19, %v3430_v33  ;;  %v806_v47 = vmax.f32 %v3711_v10, %v3431_v34  ;;  %v1098_v53 = vperm.slane %v802_v40, 0  ;;  %v158_v7 = vrot.slane %v3723_v15, 4 }
  0x1b   :  { %3511 = vmatpush.msra.mxu3 %v1470_v2  ;;  %884 = vst [vmem:[#allocation2 + $0xd0] sm:$0xff] %v3522_v3  ;;  %1672 = vmatpush.msra.mxu1 %v1470_v2  ;;  %v807_v48 = vmax.f32 %v211_v23, %v3432_v35  ;;  %v3765_v49 = vmax.f32 %v212_v24, %v3433_v38  ;;  %v1099_v54 = vperm.slane %v803_v43, 0  ;;  %v1100_v55 = vperm.slane %v804_v44, 0  ;;  %v1530_v2 = vld [vmem:[%s6045_s1 + $0x278] sm:$0xff]  ;;  %v1493_v35 = vld [vmem:[%s6045_s1 + $0x150] sm:$0xff]  ;;  %v30_v38 = vld [vmem:[%s6046_s0 + $0x20] sm:$0xff] }
  0x1c   :  { %3496 = vmatpush.msra.mxu2 %v1453_v11  ;;  %885 = vst [vmem:[#allocation2 + $0xd8] sm:$0x3] %v3522_v3  ;;  %1608 = vmatpush.msra.mxu0 %v1453_v11  ;;  %v3772_v52 = vmax.f32 %v213_v25, %v3434_v39  ;;  %v1101_v56 = vperm.slane %v805_v45, 0  ;;  %v1102_v57 = vperm.slane %v806_v47, 0  ;;  %v159_v11 = vrot.slane %v3723_v15, 6  ;;  %v1527_v43 = vld [vmem:[%s6045_s1 + $0x260] sm:$0xff] }
  0x1d   :  { %3512 = vmatpush.msra.mxu3 %v1469_v12  ;;  %886 = vst [vmem:[#allocation2 + $0xe0] sm:$0xff] %v3522_v3  ;;  %1673 = vmatpush.msra.mxu1 %v1469_v12  ;;  %v1330_v36 = vld [vmem:[#allocation2 + $0xa1] sm:$0xff]  ;;  %v1103_v58 = vperm.slane %v807_v48, 0  ;;  %v1104_v59 = vperm.slane %v3765_v49, 0  ;;  %v1224_v63 = vsel %vm1154_vm0, %v1099_v54, %v1098_v53  ;;  %v3355_v12 = vrot.slane %v3721_v14, 9  ;;  %v32_v44 = vld [vmem:[%s6046_s0 + $0x30] sm:$0xff] }
  0x1e   :  { %3497 = vmatpush.msra.mxu2 %v1452_v20  ;;  %887 = vst [vmem:[#allocation2 + $0xe8] sm:$0x3] %v3522_v3  ;;  %1609 = vmatpush.msra.mxu0 %v1452_v20  ;;  %v1105_v62 = vperm.slane %v3772_v52, 0  ;;  %v1225_v4 = vsel %vm1156_vm1, %v1100_v55, %v1224_v63  ;;  %v3356_v13 = vrot.slane %v154_v0, 9  ;;  %v3357_v18 = vrot.slane %v155_v1, 9 }
  0x1f   :  { %3513 = vmatpush.msra.mxu3 %v1468_v21  ;;  %888 = vst [vmem:[#allocation2 + $0xf0] sm:$0xff] %v3522_v3  ;;  %1674 = vmatpush.msra.mxu1 %v1468_v21  ;;  %v1226_v10 = vsel %vm1158_vm2, %v1101_v56, %v1225_v4  ;;  %v3358_v19 = vrot.slane %v156_v5, 9  ;;  %v3359_v20 = vrot.slane %v3723_v15, 9  ;;  %v3360_v23 = vrot.slane %v157_v6, 9  ;;  %v1491_v4 = vld [vmem:[%s6045_s1 + $0x140] sm:$0xff] }
  0x20   :  { %3498 = vmatpush.msra.mxu2 %v1451_v30  ;;  %889 = vst [vmem:[#allocation2 + $0xf8] sm:$0x3] %v3522_v3  ;;  %1610 = vmatpush.msra.mxu0 %v1451_v30  ;;  %v1227_v17 = vsel %vm1160_vm3, %v1102_v57, %v1226_v10  ;;  %v3361_v24 = vrot.slane %v158_v7, 9  ;;  %v3362_v25 = vrot.slane %v159_v11, 9  ;;  %v730_v28 = vmax.f32 %v3721_v14, %v3355_v12  ;;  %v1510_v30 = vld [vmem:[%s6045_s1 + $0x1d8] sm:$0xff]  ;;  %v1507_v10 = vld [vmem:[%s6045_s1 + $0x1c0] sm:$0xff] }
  0x21   :  { %3514 = vmatpush.msra.mxu3 %v1467_v31  ;;  %1635 = vmatmul.f32.vlgmr.msra.gmra.mxu2 %v3522_v3  ;;  %890 = vst [vmem:[#allocation2 + $0x100] sm:$0xff] %v3522_v3  ;;  %v1228_v21 = vsel %vm1162_vm4, %v1103_v58, %v1227_v17  ;;  %v731_v29 = vmax.f32 %v154_v0, %v3356_v13 }
  0x22   :  { %1700 = vmatmul.f32.vlgmr.msra.gmra.mxu3 %v1330_v36  ;;  %891 = vst [vmem:[#allocation2 + $0x108] sm:$0x3] %v3522_v3  ;;  %1725 = vmatpush.msrb.mxu2 %v1498_v41  ;;  %v1229_v27 = vsel %vm1164_vm5, %v1104_v59, %v1228_v21  ;;  %v732_v33 = vmax.f32 %v155_v1, %v3357_v18  ;;  %v69_v36 = vld [vmem:[%s6046_s0 + $0x158] sm:$0xff]  ;;  %v1026_v41 = vperm.slane %v730_v28, 0  ;;  %v1508_v1 = vld [vmem:[%s6045_s1 + $0x1c8] sm:$0xff] }
  0x23   :  { %1790 = vmatpush.msrb.mxu3 %v1514_v42  ;;  %892 = vst [vmem:[#allocation2 + $0x110] sm:$0xff] %v3522_v3  ;;  %1675 = vmatpush.msra.mxu1 %v1467_v31  ;;  %v1528_v31 = vld [vmem:[%s6045_s1 + $0x268] sm:$0xff]  ;;  %v1230_v14 = vsel %vm1166_vm6, %v1105_v62, %v1229_v27  ;;  %v733_v34 = vmax.f32 %v156_v5, %v3358_v19  ;;  %v1509_v42 = vld [vmem:[%s6045_s1 + $0x1d0] sm:$0xff]  ;;  %v33_v27 = vld [vmem:[%s6046_s0 + $0x38] sm:$0xff] }
  0x24   :  { %893 = vst [vmem:[#allocation2 + $0x118] sm:$0x3] %v3522_v3  ;;  %1726 = vmatpush.msrb.mxu2 %v1497_v46  ;;  %1611 = vmatmul.f32.vlgmr.msra.gmra.mxu0 %v3522_v3  ;;  %v735_v39 = vmax.f32 %v157_v6, %v3360_v23  ;;  %v736_v40 = vmax.f32 %v158_v7, %v3361_v24  ;;  %v1027_v46 = vperm.slane %v731_v29, 0  ;;  %v1028_v47 = vperm.slane %v732_v33, 0 }
  0x25   :  { %1791 = vmatpush.msrb.mxu3 %v1513_v50  ;;  %894 = vst [vmem:[#allocation2 + $0x120] sm:$0xff] %v3522_v3  ;;  %1676 = vmatmul.f32.vlgmr.msra.gmra.mxu1 %v1322_v51  ;;  %v737_v45 = vmax.f32 %v159_v11, %v3362_v25  ;;  %v1029_v48 = vperm.slane %v733_v34, 0  ;;  %v111_v55 = vmax.f32 %v67_v32, %v69_v36  ;;  %v1525_v11 = vld [vmem:[%s6045_s1 + $0x250] sm:$0xff] }
  0x26   :  { %895 = vst [vmem:[#allocation2 + $0x128] sm:$0x3] %v3522_v3  ;;  %1727 = vmatpush.msrb.mxu2 %v1496_v60  ;;  %1855 = vmatpush.msrb.mxu0 %v1530_v2  ;;  %v1031_v50 = vperm.slane %v735_v39, 0  ;;  %v1032_v51 = vperm.slane %v736_v40, 0  ;;  %v1155_v54 = vsel %vm1154_vm0, %v1027_v46, %v1026_v41  ;;  %v3861_v56 = vmax.f32 %v30_v38, %v32_v44  ;;  %v1526_v2 = vld [vmem:[%s6045_s1 + $0x258] sm:$0xff] }
  0x27   :  { %1792 = vmatpush.msrb.mxu3 %v1512_v61  ;;  %896 = vst [vmem:[#allocation2 + $0x130] sm:$0xff] %v3522_v3  ;;  %v1033_v53 = vperm.slane %v737_v45, 0  ;;  %v1157_v57 = vsel %vm1156_vm1, %v1028_v47, %v1155_v54  ;;  %v217_v62 = vrot.slane %v111_v55, 2  ;;  %v218_v63 = vrot.slane %v111_v55, 4  ;;  %v1490_v54 = vld [vmem:[%s6045_s1 + $0x138] sm:$0xff] }
  0x28   :  { %897 = vst [vmem:[#allocation2 + $0x138] sm:$0x3] %v3522_v3  ;;  %1728 = vmatpush.msrb.mxu2 %v1495_v8  ;;  %v68_v3 = vld [vmem:[%s6046_s0 + $0x150] sm:$0xff]  ;;  %1856 = vmatpush.msrb.mxu0 %v1529_v16  ;;  %v1159_v61 = vsel %vm1158_vm2, %v1029_v48, %v1157_v57  ;;  %v219_v0 = vrot.slane %v111_v55, 6  ;;  %v3439_v16 = vrot.slane %v111_v55, 9  ;;  %v160_v41 = vrot.slane %v3861_v56, 2 }
  0x29   :  { %1793 = vmatpush.msrb.mxu3 %v1511_v9  ;;  %1298 = vst [vmem:[#allocation2 + $0xb1] sm:$0xff] %v3751_v37  ;;  %v110_v52 = vmax.f32 %v66_v26, %v68_v3  ;;  %v3440_v17 = vrot.slane %v217_v62, 9  ;;  %v3441_v19 = vrot.slane %v218_v63, 9  ;;  %v31_v26 = vld [vmem:[%s6046_s0 + $0x28] sm:$0xff]  ;;  %v162_v44 = vrot.slane %v3861_v56, 6 }
  0x2a   :  { %1703 = vmatmul.f32.gmra.mxu3 %v3751_v37  ;;  %1299 = vst [vmem:[#allocation2 + $0xc1] sm:$0xff] %v1230_v14  ;;  %1729 = vmatpush.msrb.mxu2 %v1494_v22  ;;  %v734_v37 = vmax.f32 %v3723_v15, %v3359_v20  ;;  %v1492_v15 = vld [vmem:[%s6045_s1 + $0x148] sm:$0xff]  ;;  %v3442_v20 = vrot.slane %v219_v0, 9  ;;  %v814_v28 = vmax.f32 %v111_v55, %v3439_v16 }
  0x2b   :  { %1794 = vmatpush.msrb.mxu3 %v1510_v30  ;;  %1857 = vmatpush.msrb.mxu0 %v1528_v31  ;;  %v214_v58 = vrot.slane %v110_v52, 2  ;;  %v215_v59 = vrot.slane %v110_v52, 4  ;;  %v216_v60 = vrot.slane %v110_v52, 6  ;;  %v3435_v7 = vrot.slane %v110_v52, 9  ;;  %v35_v16 = vld [vmem:[%s6046_s0 + $0x48] sm:$0xff] }
  0x2c   :  { %v1030_v49 = vperm.slane %v734_v37, 0  ;;  %1730 = vmatpush.msrb.mxu2 %v1493_v35  ;;  %v815_v29 = vmax.f32 %v217_v62, %v3440_v17  ;;  %v816_v30 = vmax.f32 %v218_v63, %v3441_v19  ;;  %v817_v32 = vmax.f32 %v219_v0, %v3442_v20  ;;  %v36_v17 = vld [vmem:[%s6046_s0 + $0x50] sm:$0xff] }
  0x2d   :  { %1795 = vmatpush.msrb.mxu3 %v1509_v42  ;;  %1858 = vmatpush.msrb.mxu0 %v1527_v43  ;;  %v3436_v8 = vrot.slane %v214_v58, 9  ;;  %v3437_v9 = vrot.slane %v215_v59, 9  ;;  %v3438_v13 = vrot.slane %v216_v60, 9  ;;  %v810_v21 = vmax.f32 %v110_v52, %v3435_v7 }
  0x2e   :  { %1731 = vmatpush.msrb.mxu2 %v1492_v15  ;;  %v1161_v6 = vsel %vm1160_vm3, %v1030_v49, %v1159_v61  ;;  %v1110_v35 = vperm.slane %v814_v28, 0  ;;  %v1111_v36 = vperm.slane %v815_v29, 0  ;;  %v1112_v38 = vperm.slane %v816_v30, 0 }
  0x2f   :  { %1796 = vmatpush.msrb.mxu3 %v1508_v1  ;;  %1859 = vmatpush.msrb.mxu0 %v1526_v2  ;;  %v1163_v12 = vsel %vm1162_vm4, %v1031_v50, %v1161_v6  ;;  %v811_v23 = vmax.f32 %v214_v58, %v3436_v8  ;;  %v812_v24 = vmax.f32 %v215_v59, %v3437_v9  ;;  %v1106_v31 = vperm.slane %v810_v21, 0  ;;  %v70_v1 = vld [vmem:[%s6046_s0 + $0x160] sm:$0xff]  ;;  %v71_v2 = vld [vmem:[%s6046_s0 + $0x168] sm:$0xff]  ;;  %v72_v8 = vld [vmem:[%s6046_s0 + $0x170] sm:$0xff] }
  0x30   :  { %v1315_v5 = vld [vmem:[#allocation2 + $0xb0] sm:$0xff]  ;;  %v1165_v18 = vsel %vm1164_vm5, %v1032_v51, %v1163_v12  ;;  %1732 = vmatpush.msrb.mxu2 %v1491_v4  ;;  %v813_v25 = vmax.f32 %v216_v60, %v3438_v13  ;;  %v93_v37 = vmax.f32 %v31_v26, %v33_v27  ;;  %v1113_v39 = vperm.slane %v817_v32, 0  ;;  %v34_v9 = vld [vmem:[%s6046_s0 + $0x40] sm:$0xff] }
  0x31   :  { %1638 = vmatmul.f32.gmra.mxu2 %v1315_v5  ;;  %1797 = vmatpush.msrb.mxu3 %v1507_v10  ;;  %v1167_v22 = vsel %vm1166_vm6, %v1033_v53, %v1165_v18  ;;  %v1107_v3 = vperm.slane %v811_v23, 0  ;;  %v1316_v34 = vld [vmem:[#allocation2 + $0xc0] sm:$0xff]  ;;  %v161_v42 = vrot.slane %v3861_v56, 4  ;;  %v3363_v15 = vrot.slane %v3861_v56, 9  ;;  %v37_v18 = vld [vmem:[%s6046_s0 + $0x58] sm:$0xff] }
  0x32   :  { %1706 = vmatmul.f32.gmra.mxu3 %v1230_v14  ;;  %1860 = vmatpush.msrb.mxu0 %v1525_v11  ;;  %1290 = vst [vmem:[#allocation2 + $0x11] sm:$0xff] %v1167_v22  ;;  %v1108_v14 = vperm.slane %v812_v24, 0  ;;  %v1109_v33 = vperm.slane %v813_v25, 0  ;;  %v163_v45 = vrot.slane %v93_v37, 2  ;;  %v164_v46 = vrot.slane %v93_v37, 4 }
  0x33   :  { %1679 = vmatmul.f32.gmra.mxu1 %v1167_v22  ;;  %v1231_v40 = vsel %vm1154_vm0, %v1107_v3, %v1106_v31  ;;  %v165_v48 = vrot.slane %v93_v37, 6  ;;  %v3364_v49 = vrot.slane %v160_v41, 9  ;;  %v3365_v51 = vrot.slane %v161_v42, 9  ;;  %1733 = vmatpush.msrb.mxu2 %v1490_v54 }
  0x34   :  { %v1232_v43 = vsel %vm1156_vm1, %v1108_v14, %v1231_v40  ;;  %v3366_v52 = vrot.slane %v162_v44, 9  ;;  %v3367_v53 = vrot.slane %v93_v37, 9  ;;  %v3368_v58 = vrot.slane %v163_v45, 9 }
  0x35   :  { %v1233_v47 = vsel %vm1158_vm2, %v1109_v33, %v1232_v43  ;;  %v3369_v59 = vrot.slane %v164_v46, 9  ;;  %v3370_v60 = vrot.slane %v165_v48, 9  ;;  %v738_v62 = vmax.f32 %v3861_v56, %v3363_v15  ;;  %v73_v56 = vld [vmem:[%s6046_s0 + $0x178] sm:$0xff] }
  0x36   :  { %v1234_v50 = vsel %vm1160_vm3, %v1110_v35, %v1233_v47  ;;  %v739_v63 = vmax.f32 %v160_v41, %v3364_v49  ;;  %v740_v0 = vmax.f32 %v161_v42, %v3365_v51  ;;  %v741_v5 = vmax.f32 %v162_v44, %v3366_v52  ;;  %v1505_v44 = vld [vmem:[%s6045_s1 + $0x1b0] sm:$0xff]  ;;  %v1523_v49 = vld [vmem:[%s6045_s1 + $0x240] sm:$0xff] }
  0x37   :  { %v1235_v57 = vsel %vm1162_vm4, %v1111_v36, %v1234_v50  ;;  %v742_v6 = vmax.f32 %v93_v37, %v3367_v53  ;;  %v743_v7 = vmax.f32 %v163_v45, %v3368_v58  ;;  %v744_v10 = vmax.f32 %v164_v46, %v3369_v59  ;;  %v1524_v37 = vld [vmem:[%s6045_s1 + $0x248] sm:$0xff] }
  0x38   :  { %v1236_v61 = vsel %vm1164_vm5, %v1112_v38, %v1235_v57  ;;  %v745_v11 = vmax.f32 %v165_v48, %v3370_v60  ;;  %v1034_v12 = vperm.slane %v738_v62, 0  ;;  %v1035_v13 = vperm.slane %v739_v63, 0  ;;  %v1506_v38 = vld [vmem:[%s6045_s1 + $0x1b8] sm:$0xff]  ;;  %1861 = vmatpush.msrb.mxu0 %v1524_v37 }
  0x39   :  { %1641 = vmatmul.f32.gmra.mxu2 %v1316_v34  ;;  %v1307_v55 = vld [vmem:[#allocation2 + $0x10] sm:$0xff]  ;;  %v1237_v4 = vsel %vm1166_vm6, %v1113_v39, %v1236_v61  ;;  %v1036_v19 = vperm.slane %v740_v0, 0  ;;  %v1037_v20 = vperm.slane %v741_v5, 0  ;;  %v1038_v21 = vperm.slane %v742_v6, 0  ;;  %1798 = vmatpush.msrb.mxu3 %v1506_v38 }
  0x3a   :  { %1614 = vmatmul.f32.gmra.mxu0 %v1307_v55  ;;  %1300 = vst [vmem:[#allocation2 + $0xd1] sm:$0xff] %v1237_v4  ;;  %1709 = vmatmul.f32.gmra.mxu3 %v1237_v4  ;;  %v1039_v22 = vperm.slane %v743_v7, 0  ;;  %v1040_v23 = vperm.slane %v744_v10, 0  ;;  %v1041_v24 = vperm.slane %v745_v11, 0  ;;  %v1168_v25 = vsel %vm1154_vm0, %v1035_v13, %v1034_v12  ;;  %v1489_v39 = vld [vmem:[%s6045_s1 + $0x130] sm:$0xff] }
  0x3b   :  { %v112_v26 = vmax.f32 %v70_v1, %v72_v8  ;;  %v1169_v27 = vsel %vm1156_vm1, %v1036_v19, %v1168_v25  ;;  %v113_v28 = vmax.f32 %v71_v2, %v73_v56  ;;  %v3931_v29 = vmax.f32 %v34_v9, %v36_v17  ;;  %1734 = vmatpush.msrb.mxu2 %v1489_v39  ;;  %v39_v39 = vld [vmem:[%s6046_s0 + $0x68] sm:$0xff] }
  0x3c   :  { %v3933_v30 = vmax.f32 %v35_v16, %v37_v18  ;;  %v1170_v31 = vsel %vm1158_vm2, %v1037_v20, %v1169_v27  ;;  %1799 = vmatpush.msrb.mxu3 %v1505_v44  ;;  %1862 = vmatpush.msrb.mxu0 %v1523_v49 }
  0x3d   :  { %v220_v32 = vrot.slane %v112_v26, 2  ;;  %v221_v3 = vrot.slane %v112_v26, 4  ;;  %v222_v14 = vrot.slane %v112_v26, 6  ;;  %v1171_v33 = vsel %vm1160_vm3, %v1038_v21, %v1170_v31 }
  0x3e   :  { %v223_v34 = vrot.slane %v113_v28, 2  ;;  %v224_v35 = vrot.slane %v113_v28, 4  ;;  %v225_v36 = vrot.slane %v113_v28, 6  ;;  %v1172_v40 = vsel %vm1162_vm4, %v1039_v22, %v1171_v33  ;;  %v76_v33 = vld [vmem:[%s6046_s0 + $0x190] sm:$0xff] }
  0x3f   :  { %v3443_v41 = vrot.slane %v112_v26, 9  ;;  %v3444_v42 = vrot.slane %v220_v32, 9  ;;  %v3445_v43 = vrot.slane %v221_v3, 9  ;;  %v1173_v46 = vsel %vm1164_vm5, %v1040_v23, %v1172_v40  ;;  %v40_v40 = vld [vmem:[%s6046_s0 + $0x70] sm:$0xff] }
  0x40   :  { %v3446_v47 = vrot.slane %v222_v14, 9  ;;  %v3447_v48 = vrot.slane %v113_v28, 9  ;;  %v3448_v15 = vrot.slane %v223_v34, 9  ;;  %v1174_v50 = vsel %vm1166_vm6, %v1041_v24, %v1173_v46  ;;  %v79_v46 = vld [vmem:[%s6046_s0 + $0x1a8] sm:$0xff] }
  0x41   :  { %v1317_v45 = vld [vmem:[#allocation2 + $0xd0] sm:$0xff]  ;;  %v3449_v51 = vrot.slane %v224_v35, 9  ;;  %v3450_v52 = vrot.slane %v225_v36, 9  ;;  %v818_v53 = vmax.f32 %v112_v26, %v3443_v41  ;;  %1291 = vst [vmem:[#allocation2 + $0x21] sm:$0xff] %v1174_v50  ;;  %1682 = vmatmul.f32.gmra.mxu1 %v1174_v50  ;;  %v819_v54 = vmax.f32 %v220_v32, %v3444_v42  ;;  %v1488_v26 = vld [vmem:[%s6045_s1 + $0x128] sm:$0xff]  ;;  %v41_v41 = vld [vmem:[%s6046_s0 + $0x78] sm:$0xff] }
  0x42   :  { %1644 = vmatmul.f32.gmra.mxu2 %v1317_v45  ;;  %v820_v55 = vmax.f32 %v221_v3, %v3445_v43  ;;  %v821_v57 = vmax.f32 %v222_v14, %v3446_v47  ;;  %v166_v58 = vrot.slane %v3931_v29, 2  ;;  %v822_v59 = vmax.f32 %v113_v28, %v3447_v48  ;;  %v74_v3 = vld [vmem:[%s6046_s0 + $0x180] sm:$0xff]  ;;  %v75_v14 = vld [vmem:[%s6046_s0 + $0x188] sm:$0xff]  ;;  %v80_v47 = vld [vmem:[%s6046_s0 + $0x1b0] sm:$0xff] }
  0x43   :  { %v823_v60 = vmax.f32 %v223_v34, %v3448_v15  ;;  %v824_v61 = vmax.f32 %v224_v35, %v3449_v51  ;;  %v825_v62 = vmax.f32 %v225_v36, %v3450_v52  ;;  %v1114_v63 = vperm.slane %v818_v53, 0  ;;  %v77_v34 = vld [vmem:[%s6046_s0 + $0x198] sm:$0xff]  ;;  %1735 = vmatpush.msrb.mxu2 %v1488_v26 }
  0x44   :  { %v1115_v0 = vperm.slane %v819_v54, 0  ;;  %v1116_v1 = vperm.slane %v820_v55, 0  ;;  %v1117_v2 = vperm.slane %v821_v57, 0  ;;  %v1118_v4 = vperm.slane %v822_v59, 0  ;;  %v81_v51 = vld [vmem:[%s6046_s0 + $0x1b8] sm:$0xff] }
  0x45   :  { %v1119_v5 = vperm.slane %v823_v60, 0  ;;  %v1120_v6 = vperm.slane %v824_v61, 0  ;;  %v1121_v7 = vperm.slane %v825_v62, 0  ;;  %v167_v56 = vrot.slane %v3931_v29, 4 }
  0x46   :  { %v1238_v8 = vsel %vm1154_vm0, %v1115_v0, %v1114_v63  ;;  %v168_v9 = vrot.slane %v3931_v29, 6  ;;  %v169_v10 = vrot.slane %v3933_v30, 2  ;;  %v170_v12 = vrot.slane %v3933_v30, 4 }
  0x47   :  { %v1239_v11 = vsel %vm1156_vm1, %v1116_v1, %v1238_v8  ;;  %v171_v13 = vrot.slane %v3933_v30, 6  ;;  %v3371_v16 = vrot.slane %v3931_v29, 9  ;;  %v3372_v18 = vrot.slane %v166_v58, 9 }
  0x48   :  { %v1240_v17 = vsel %vm1158_vm2, %v1117_v2, %v1239_v11  ;;  %v3373_v19 = vrot.slane %v167_v56, 9  ;;  %v3374_v20 = vrot.slane %v168_v9, 9  ;;  %v1308_v21 = vld [vmem:[#allocation2 + $0x20] sm:$0xff]  ;;  %v3375_v23 = vrot.slane %v3933_v30, 9 }
  0x49   :  { %v1241_v22 = vsel %vm1160_vm3, %v1118_v4, %v1240_v17  ;;  %v3376_v24 = vrot.slane %v169_v10, 9  ;;  %v3377_v25 = vrot.slane %v170_v12, 9  ;;  %1617 = vmatmul.f32.gmra.mxu0 %v1308_v21  ;;  %v3378_v28 = vrot.slane %v171_v13, 9  ;;  %v1487_v11 = vld [vmem:[%s6045_s1 + $0x120] sm:$0xff] }
  0x4a   :  { %v1242_v27 = vsel %vm1162_vm4, %v1119_v5, %v1241_v22  ;;  %v746_v31 = vmax.f32 %v3931_v29, %v3371_v16  ;;  %v747_v32 = vmax.f32 %v166_v58, %v3372_v18  ;;  %v38_v29 = vld [vmem:[%s6046_s0 + $0x60] sm:$0xff]  ;;  %v748_v36 = vmax.f32 %v167_v56, %v3373_v19  ;;  %v1546_v18 = vld [vmem:[%s6045_s1 + $0x2f8] sm:$0xff]  ;;  %1736 = vmatpush.msrb.mxu2 %v1487_v11 }
  0x4b   :  { %v1243_v35 = vsel %vm1164_vm5, %v1120_v6, %v1242_v27  ;;  %v749_v38 = vmax.f32 %v168_v9, %v3374_v20  ;;  %v750_v37 = vmax.f32 %v3933_v30, %v3375_v23  ;;  %v751_v43 = vmax.f32 %v169_v10, %v3376_v24  ;;  %v78_v30 = vld [vmem:[%s6046_s0 + $0x1a0] sm:$0xff]  ;;  %v1504_v9 = vld [vmem:[%s6045_s1 + $0x1a8] sm:$0xff]  ;;  %v1522_v10 = vld [vmem:[%s6045_s1 + $0x238] sm:$0xff]  ;;  %1920 = vmatpush.msrb.mxu1 %v1546_v18 }
  0x4c   :  { %v1244_v42 = vsel %vm1166_vm6, %v1121_v7, %v1243_v35  ;;  %v752_v44 = vmax.f32 %v170_v12, %v3377_v25  ;;  %v753_v45 = vmax.f32 %v171_v13, %v3378_v28  ;;  %v1042_v48 = vperm.slane %v746_v31, 0  ;;  %1800 = vmatpush.msrb.mxu3 %v1504_v9  ;;  %1863 = vmatpush.msrb.mxu0 %v1522_v10  ;;  %v1503_v19 = vld [vmem:[%s6045_s1 + $0x1a0] sm:$0xff]  ;;  %v1521_v25 = vld [vmem:[%s6045_s1 + $0x230] sm:$0xff] }
  0x4d   :  { %1301 = vst [vmem:[#allocation2 + $0xe1] sm:$0xff] %v1244_v42  ;;  %1712 = vmatmul.f32.gmra.mxu3 %v1244_v42  ;;  %v1043_v15 = vperm.slane %v747_v32, 0  ;;  %v1044_v49 = vperm.slane %v748_v36, 0  ;;  %v1045_v50 = vperm.slane %v749_v38, 0  ;;  %v1046_v52 = vperm.slane %v750_v37, 0  ;;  %v1545_v32 = vld [vmem:[%s6045_s1 + $0x2f0] sm:$0xff] }
  0x4e   :  { %v1047_v53 = vperm.slane %v751_v43, 0  ;;  %v1048_v54 = vperm.slane %v752_v44, 0  ;;  %v1049_v55 = vperm.slane %v753_v45, 0  ;;  %v114_v58 = vmax.f32 %v74_v3, %v76_v33  ;;  %1801 = vmatpush.msrb.mxu3 %v1503_v19  ;;  %1864 = vmatpush.msrb.mxu0 %v1521_v25 }
  0x4f   :  { %v1175_v57 = vsel %vm1154_vm0, %v1043_v15, %v1042_v48  ;;  %v115_v59 = vmax.f32 %v75_v14, %v77_v34  ;;  %v4012_v60 = vmax.f32 %v38_v29, %v40_v40  ;;  %v4015_v62 = vmax.f32 %v39_v39, %v41_v41  ;;  %1921 = vmatpush.msrb.mxu1 %v1545_v32 }
  0x50   :  { %v1176_v61 = vsel %vm1156_vm1, %v1044_v49, %v1175_v57  ;;  %v4017_v63 = vmax.f32 %v78_v30, %v80_v47  ;;  %v4019_v0 = vmax.f32 %v79_v46, %v81_v51  ;;  %v226_v2 = vrot.slane %v114_v58, 2 }
  0x51   :  { %v1177_v1 = vsel %vm1158_vm2, %v1045_v50, %v1176_v61  ;;  %v227_v4 = vrot.slane %v114_v58, 4  ;;  %v228_v5 = vrot.slane %v114_v58, 6  ;;  %v229_v7 = vrot.slane %v115_v59, 2 }
  0x52   :  { %v1178_v6 = vsel %vm1160_vm3, %v1046_v52, %v1177_v1  ;;  %v230_v8 = vrot.slane %v115_v59, 4  ;;  %v231_v56 = vrot.slane %v115_v59, 6  ;;  %v3451_v13 = vrot.slane %v114_v58, 9  ;;  %v1486_v52 = vld [vmem:[%s6045_s1 + $0x118] sm:$0xff] }
  0x53   :  { %v1179_v12 = vsel %vm1162_vm4, %v1047_v53, %v1178_v6  ;;  %v3452_v16 = vrot.slane %v226_v2, 9  ;;  %v3453_v17 = vrot.slane %v227_v4, 9  ;;  %v3454_v22 = vrot.slane %v228_v5, 9  ;;  %v1544_v53 = vld [vmem:[%s6045_s1 + $0x2e8] sm:$0xff]  ;;  %1737 = vmatpush.msrb.mxu2 %v1486_v52 }
  0x54   :  { %v1318_v20 = vld [vmem:[#allocation2 + $0xe0] sm:$0xff]  ;;  %v1180_v21 = vsel %vm1164_vm5, %v1048_v54, %v1179_v12  ;;  %v3455_v23 = vrot.slane %v115_v59, 9  ;;  %v3456_v24 = vrot.slane %v229_v7, 9  ;;  %v3457_v27 = vrot.slane %v230_v8, 9  ;;  %1922 = vmatpush.msrb.mxu1 %v1544_v53 }
  0x55   :  { %1647 = vmatmul.f32.gmra.mxu2 %v1318_v20  ;;  %v4044_v26 = vsel %vm1166_vm6, %v1049_v55, %v1180_v21  ;;  %v3458_v28 = vrot.slane %v231_v56, 9  ;;  %v826_v31 = vmax.f32 %v114_v58, %v3451_v13  ;;  %v827_v3 = vmax.f32 %v226_v2, %v3452_v16 }
  0x56   :  { %1292 = vst [vmem:[#allocation2 + $0x31] sm:$0xff] %v4044_v26  ;;  %1685 = vmatmul.f32.gmra.mxu1 %v4044_v26  ;;  %v828_v14 = vmax.f32 %v227_v4, %v3453_v17  ;;  %v829_v33 = vmax.f32 %v228_v5, %v3454_v22  ;;  %v172_v34 = vrot.slane %v4012_v60, 2  ;;  %v830_v29 = vmax.f32 %v115_v59, %v3455_v23 }
  0x57   :  { %v831_v35 = vmax.f32 %v229_v7, %v3456_v24  ;;  %v832_v36 = vmax.f32 %v230_v8, %v3457_v27  ;;  %v833_v38 = vmax.f32 %v231_v56, %v3458_v28  ;;  %v1122_v37 = vperm.slane %v826_v31, 0 }
  0x58   :  { %v1123_v39 = vperm.slane %v827_v3, 0  ;;  %v1124_v40 = vperm.slane %v828_v14, 0  ;;  %v1125_v41 = vperm.slane %v829_v33, 0  ;;  %v1126_v42 = vperm.slane %v830_v29, 0 }
  0x59   :  { %v1127_v43 = vperm.slane %v831_v35, 0  ;;  %v1128_v44 = vperm.slane %v832_v36, 0  ;;  %v1129_v45 = vperm.slane %v833_v38, 0  ;;  %v173_v46 = vrot.slane %v4012_v60, 4 }
  0x5a   :  { %v1245_v30 = vsel %vm1154_vm0, %v1123_v39, %v1122_v37  ;;  %v174_v47 = vrot.slane %v4012_v60, 6  ;;  %v175_v48 = vrot.slane %v4015_v62, 2  ;;  %v176_v49 = vrot.slane %v4015_v62, 4 }
  0x5b   :  { %v1246_v15 = vsel %vm1156_vm1, %v1124_v40, %v1245_v30  ;;  %v177_v50 = vrot.slane %v4015_v62, 6  ;;  %v3379_v51 = vrot.slane %v4012_v60, 9  ;;  %v3380_v55 = vrot.slane %v172_v34, 9  ;;  %v1502_v40 = vld [vmem:[%s6045_s1 + $0x198] sm:$0xff] }
  0x5c   :  { %v1247_v54 = vsel %vm1158_vm2, %v1125_v41, %v1246_v15  ;;  %v3381_v57 = vrot.slane %v173_v46, 9  ;;  %v3382_v58 = vrot.slane %v174_v47, 9  ;;  %v3383_v1 = vrot.slane %v4015_v62, 9  ;;  %v1520_v41 = vld [vmem:[%s6045_s1 + $0x228] sm:$0xff]  ;;  %v45_v15 = vld [vmem:[%s6046_s0 + $0x98] sm:$0xff]  ;;  %1802 = vmatpush.msrb.mxu3 %v1502_v40 }
  0x5d   :  { %v4067_v59 = vld [vmem:[#allocation2 + $0x30] sm:$0xff]  ;;  %v1248_v61 = vsel %vm1160_vm3, %v1126_v42, %v1247_v54  ;;  %v3384_v2 = vrot.slane %v175_v48, 9  ;;  %v3385_v4 = vrot.slane %v176_v49, 9  ;;  %v3386_v6 = vrot.slane %v177_v50, 9  ;;  %v1543_v42 = vld [vmem:[%s6045_s1 + $0x2e0] sm:$0xff]  ;;  %1865 = vmatpush.msrb.mxu0 %v1520_v41  ;;  %v1542_v54 = vld [vmem:[%s6045_s1 + $0x2d8] sm:$0xff] }
  0x5e   :  { %1620 = vmatmul.f32.gmra.mxu0 %v4067_v59  ;;  %v1249_v5 = vsel %vm1162_vm4, %v1127_v43, %v1248_v61  ;;  %v754_v7 = vmax.f32 %v4012_v60, %v3379_v51  ;;  %v755_v8 = vmax.f32 %v172_v34, %v3380_v55  ;;  %v756_v9 = vmax.f32 %v173_v46, %v3381_v57  ;;  %v42_v46 = vld [vmem:[%s6046_s0 + $0x80] sm:$0xff]  ;;  %v1501_v55 = vld [vmem:[%s6045_s1 + $0x190] sm:$0xff] }
  0x5f   :  { %v1250_v56 = vsel %vm1164_vm5, %v1128_v44, %v1249_v5  ;;  %v757_v10 = vmax.f32 %v174_v47, %v3382_v58  ;;  %v758_v11 = vmax.f32 %v4015_v62, %v3383_v1  ;;  %v759_v13 = vmax.f32 %v175_v48, %v3384_v2  ;;  %v43_v47 = vld [vmem:[%s6046_s0 + $0x88] sm:$0xff]  ;;  %v44_v48 = vld [vmem:[%s6046_s0 + $0x90] sm:$0xff]  ;;  %1923 = vmatpush.msrb.mxu1 %v1543_v42  ;;  %v82_v57 = vld [vmem:[%s6046_s0 + $0x1c0] sm:$0xff] }
  0x60   :  { %v1251_v12 = vsel %vm1166_vm6, %v1129_v45, %v1250_v56  ;;  %v760_v16 = vmax.f32 %v176_v49, %v3385_v4  ;;  %v761_v17 = vmax.f32 %v177_v50, %v3386_v6  ;;  %v1050_v18 = vperm.slane %v754_v7, 0  ;;  %v83_v58 = vld [vmem:[%s6046_s0 + $0x1c8] sm:$0xff]  ;;  %v84_v61 = vld [vmem:[%s6046_s0 + $0x1d0] sm:$0xff]  ;;  %v1519_v6 = vld [vmem:[%s6045_s1 + $0x220] sm:$0xff]  ;;  %1803 = vmatpush.msrb.mxu3 %v1501_v55 }
  0x61   :  { %1302 = vst [vmem:[#allocation2 + $0xf1] sm:$0xff] %v1251_v12  ;;  %1715 = vmatmul.f32.gmra.mxu3 %v1251_v12  ;;  %v1051_v19 = vperm.slane %v755_v8, 0  ;;  %v1052_v20 = vperm.slane %v756_v9, 0  ;;  %v1053_v21 = vperm.slane %v757_v10, 0  ;;  %v1054_v22 = vperm.slane %v758_v11, 0  ;;  %v85_v7 = vld [vmem:[%s6046_s0 + $0x1d8] sm:$0xff]  ;;  %1924 = vmatpush.msrb.mxu1 %v1542_v54 }
  0x62   :  { %v1055_v60 = vperm.slane %v759_v13, 0  ;;  %v1056_v23 = vperm.slane %v760_v16, 0  ;;  %v1057_v24 = vperm.slane %v761_v17, 0  ;;  %v232_v27 = vrot.slane %v4017_v63, 2  ;;  %v46_v8 = vld [vmem:[%s6046_s0 + $0xa0] sm:$0xff]  ;;  %v1541_v11 = vld [vmem:[%s6045_s1 + $0x2d0] sm:$0xff]  ;;  %1866 = vmatpush.msrb.mxu0 %v1519_v6 }
  0x63   :  { %v1182_v25 = vsel %vm1154_vm0, %v1051_v19, %v1050_v18  ;;  %v233_v62 = vrot.slane %v4017_v63, 4  ;;  %v234_v28 = vrot.slane %v4017_v63, 6  ;;  %v235_v32 = vrot.slane %v4019_v0, 2  ;;  %v48_v12 = vld [vmem:[%s6046_s0 + $0xb0] sm:$0xff]  ;;  %1925 = vmatpush.msrb.mxu1 %v1541_v11 }
  0x64   :  { %v1183_v31 = vsel %vm1156_vm1, %v1052_v20, %v1182_v25  ;;  %v236_v3 = vrot.slane %v4019_v0, 4  ;;  %v237_v14 = vrot.slane %v4019_v0, 6  ;;  %v3459_v34 = vrot.slane %v4017_v63, 9 }
  0x65   :  { %v1184_v33 = vsel %vm1158_vm2, %v1053_v21, %v1183_v31  ;;  %v3460_v29 = vrot.slane %v232_v27, 9  ;;  %v3461_v35 = vrot.slane %v233_v62, 9  ;;  %v3462_v38 = vrot.slane %v234_v28, 9 }
  0x66   :  { %v1185_v36 = vsel %vm1160_vm3, %v1054_v22, %v1184_v33  ;;  %v3463_v37 = vrot.slane %v4019_v0, 9  ;;  %v3464_v39 = vrot.slane %v235_v32, 9  ;;  %v3465_v44 = vrot.slane %v236_v3, 9 }
  0x67   :  { %v1186_v43 = vsel %vm1162_vm4, %v1055_v60, %v1185_v36  ;;  %v3466_v45 = vrot.slane %v237_v14, 9  ;;  %v834_v30 = vmax.f32 %v4017_v63, %v3459_v34  ;;  %v1485_v63 = vld [vmem:[%s6045_s1 + $0x110] sm:$0xff]  ;;  %v835_v51 = vmax.f32 %v232_v27, %v3460_v29  ;;  %v1484_v34 = vld [vmem:[%s6045_s1 + $0x108] sm:$0xff] }
  0x68   :  { %v1319_v49 = vld [vmem:[#allocation2 + $0xf0] sm:$0xff]  ;;  %v1187_v50 = vsel %vm1164_vm5, %v1056_v23, %v1186_v43  ;;  %v836_v52 = vmax.f32 %v233_v62, %v3461_v35  ;;  %v837_v53 = vmax.f32 %v234_v28, %v3462_v38  ;;  %v838_v2 = vmax.f32 %v4019_v0, %v3463_v37  ;;  %1738 = vmatpush.msrb.mxu2 %v1485_v63  ;;  %v1540_v29 = vld [vmem:[%s6045_s1 + $0x2c8] sm:$0xff] }
  0x69   :  { %1650 = vmatmul.f32.gmra.mxu2 %v1319_v49  ;;  %v4132_v1 = vsel %vm1166_vm6, %v1057_v24, %v1187_v50  ;;  %v839_v4 = vmax.f32 %v235_v32, %v3464_v39  ;;  %v840_v5 = vmax.f32 %v236_v3, %v3465_v44  ;;  %v841_v56 = vmax.f32 %v237_v14, %v3466_v45 }
  0x6a   :  { %1293 = vst [vmem:[#allocation2 + $0x41] sm:$0xff] %v4132_v1  ;;  %1688 = vmatmul.f32.gmra.mxu1 %v4132_v1  ;;  %v1130_v0 = vperm.slane %v834_v30, 0  ;;  %v1131_v9 = vperm.slane %v835_v51, 0  ;;  %v1132_v10 = vperm.slane %v836_v52, 0  ;;  %v1133_v13 = vperm.slane %v837_v53, 0  ;;  %1739 = vmatpush.msrb.mxu2 %v1484_v34  ;;  %v1499_v34 = vld [vmem:[%s6045_s1 + $0x180] sm:$0xff] }
  0x6b   :  { %v1134_v16 = vperm.slane %v838_v2, 0  ;;  %v1135_v17 = vperm.slane %v839_v4, 0  ;;  %v1136_v18 = vperm.slane %v840_v5, 0  ;;  %v1137_v19 = vperm.slane %v841_v56, 0  ;;  %1926 = vmatpush.msrb.mxu1 %v1540_v29 }
  0x6c   :  { %v1252_v20 = vsel %vm1154_vm0, %v1131_v9, %v1130_v0  ;;  %v98_v21 = vmax.f32 %v42_v46, %v44_v48  ;;  %v99_v22 = vmax.f32 %v43_v47, %v45_v15  ;;  %v4154_v23 = vmax.f32 %v82_v57, %v84_v61 }
  0x6d   :  { %v1253_v60 = vsel %vm1156_vm1, %v1132_v10, %v1252_v20  ;;  %v4156_v24 = vmax.f32 %v83_v58, %v85_v7  ;;  %v4158_v25 = vmax.f32 %v46_v8, %v48_v12 }
  0x6e   :  { %v1254_v27 = vsel %vm1158_vm2, %v1133_v13, %v1253_v60  ;;  %v178_v62 = vrot.slane %v98_v21, 2  ;;  %v179_v28 = vrot.slane %v98_v21, 4  ;;  %v180_v31 = vrot.slane %v98_v21, 6 }
  0x6f   :  { %v1255_v32 = vsel %vm1160_vm3, %v1134_v16, %v1254_v27  ;;  %v181_v3 = vrot.slane %v99_v22, 2  ;;  %v182_v14 = vrot.slane %v99_v22, 4  ;;  %v183_v33 = vrot.slane %v99_v22, 6 }
  0x70   :  { %v1256_v35 = vsel %vm1162_vm4, %v1135_v17, %v1255_v32  ;;  %v3387_v36 = vrot.slane %v98_v21, 9  ;;  %v3388_v38 = vrot.slane %v178_v62, 9  ;;  %v3389_v37 = vrot.slane %v179_v28, 9  ;;  %v1500_v17 = vld [vmem:[%s6045_s1 + $0x188] sm:$0xff] }
  0x71   :  { %v4169_v39 = vld [vmem:[#allocation2 + $0x40] sm:$0xff]  ;;  %v1257_v40 = vsel %vm1164_vm5, %v1136_v18, %v1256_v35  ;;  %v3390_v41 = vrot.slane %v180_v31, 9  ;;  %v3391_v42 = vrot.slane %v99_v22, 9  ;;  %v3392_v43 = vrot.slane %v181_v3, 9  ;;  %v1518_v18 = vld [vmem:[%s6045_s1 + $0x218] sm:$0xff]  ;;  %1804 = vmatpush.msrb.mxu3 %v1500_v17 }
  0x72   :  { %1623 = vmatmul.f32.gmra.mxu0 %v4169_v39  ;;  %v1258_v44 = vsel %vm1166_vm6, %v1137_v19, %v1257_v40  ;;  %v3393_v45 = vrot.slane %v182_v14, 9  ;;  %v3394_v30 = vrot.slane %v183_v33, 9  ;;  %v762_v46 = vmax.f32 %v98_v21, %v3387_v36  ;;  %v1539_v19 = vld [vmem:[%s6045_s1 + $0x2c0] sm:$0xff]  ;;  %v1537_v40 = vld [vmem:[%s6045_s1 + $0x2b0] sm:$0xff] }
  0x73   :  { %1303 = vst [vmem:[#allocation2 + $0x101] sm:$0xff] %v1258_v44  ;;  %1718 = vmatmul.f32.gmra.mxu3 %v1258_v44  ;;  %v763_v47 = vmax.f32 %v178_v62, %v3388_v38  ;;  %v764_v48 = vmax.f32 %v179_v28, %v3389_v37  ;;  %v765_v15 = vmax.f32 %v180_v31, %v3390_v41  ;;  %v238_v63 = vrot.slane %v4154_v23, 2  ;;  %v1483_v62 = vld [vmem:[%s6045_s1 + $0x100] sm:$0xff]  ;;  %v1538_v28 = vld [vmem:[%s6045_s1 + $0x2b8] sm:$0xff]  ;;  %v1517_v37 = vld [vmem:[%s6045_s1 + $0x210] sm:$0xff] }
  0x74   :  { %v766_v49 = vmax.f32 %v99_v22, %v3391_v42  ;;  %v767_v50 = vmax.f32 %v181_v3, %v3392_v43  ;;  %v768_v51 = vmax.f32 %v182_v14, %v3393_v45  ;;  %v769_v52 = vmax.f32 %v183_v33, %v3394_v30  ;;  %1867 = vmatpush.msrb.mxu0 %v1518_v18  ;;  %v47_v33 = vld [vmem:[%s6046_s0 + $0xa8] sm:$0xff]  ;;  %v50_v45 = vld [vmem:[%s6046_s0 + $0xc0] sm:$0xff]  ;;  %v52_v30 = vld [vmem:[%s6046_s0 + $0xd0] sm:$0xff] }
  0x75   :  { %v1058_v53 = vperm.slane %v762_v46, 0  ;;  %v1059_v54 = vperm.slane %v763_v47, 0  ;;  %v1060_v55 = vperm.slane %v764_v48, 0  ;;  %v1061_v57 = vperm.slane %v765_v15, 0  ;;  %1927 = vmatpush.msrb.mxu1 %v1539_v19  ;;  %1740 = vmatpush.msrb.mxu2 %v1483_v62 }
  0x76   :  { %v1062_v58 = vperm.slane %v766_v49, 0  ;;  %v1063_v61 = vperm.slane %v767_v50, 0  ;;  %v1064_v2 = vperm.slane %v768_v51, 0  ;;  %v1065_v4 = vperm.slane %v769_v52, 0  ;;  %1805 = vmatpush.msrb.mxu3 %v1499_v34  ;;  %1868 = vmatpush.msrb.mxu0 %v1517_v37  ;;  %v1533_v37 = vld [vmem:[%s6045_s1 + $0x290] sm:$0xff] }
  0x77   :  { %v1189_v5 = vsel %vm1154_vm0, %v1059_v54, %v1058_v53  ;;  %v239_v6 = vrot.slane %v4154_v23, 4  ;;  %v240_v7 = vrot.slane %v4154_v23, 6  ;;  %v241_v8 = vrot.slane %v4156_v24, 2  ;;  %1928 = vmatpush.msrb.mxu1 %v1538_v28 }
  0x78   :  { %v1190_v56 = vsel %vm1156_vm1, %v1060_v55, %v1189_v5  ;;  %v242_v0 = vrot.slane %v4156_v24, 4  ;;  %v243_v9 = vrot.slane %v4156_v24, 6  ;;  %v3467_v10 = vrot.slane %v4154_v23, 9 }
  0x79   :  { %v1191_v11 = vsel %vm1158_vm2, %v1061_v57, %v1190_v56  ;;  %v3468_v12 = vrot.slane %v238_v63, 9  ;;  %v3469_v13 = vrot.slane %v239_v6, 9  ;;  %v3470_v16 = vrot.slane %v240_v7, 9  ;;  %1929 = vmatpush.msrb.mxu1 %v1537_v40  ;;  %v1516_v56 = vld [vmem:[%s6045_s1 + $0x208] sm:$0xff] }
  0x7a   :  { %v4193_v20 = vld [vmem:[#allocation2 + $0x100] sm:$0xff]  ;;  %v1192_v21 = vsel %vm1160_vm3, %v1062_v58, %v1191_v11  ;;  %v3471_v22 = vrot.slane %v4156_v24, 9  ;;  %v3472_v60 = vrot.slane %v241_v8, 9  ;;  %v3473_v27 = vrot.slane %v242_v0, 9  ;;  %1869 = vmatpush.msrb.mxu0 %v1516_v56 }
  0x7b   :  { %1653 = vmatmul.f32.gmra.mxu2 %v4193_v20  ;;  %v1193_v31 = vsel %vm1162_vm4, %v1063_v61, %v1192_v21  ;;  %v3474_v32 = vrot.slane %v243_v9, 9  ;;  %v842_v3 = vmax.f32 %v4154_v23, %v3467_v10  ;;  %v843_v14 = vmax.f32 %v238_v63, %v3468_v12  ;;  %v49_v23 = vld [vmem:[%s6046_s0 + $0xb8] sm:$0xff]  ;;  %v1536_v63 = vld [vmem:[%s6045_s1 + $0x2a8] sm:$0xff] }
  0x7c   :  { %v1194_v29 = vsel %vm1164_vm5, %v1064_v2, %v1193_v31  ;;  %v844_v35 = vmax.f32 %v239_v6, %v3469_v13  ;;  %v845_v36 = vmax.f32 %v240_v7, %v3470_v16  ;;  %v846_v38 = vmax.f32 %v4156_v24, %v3471_v22  ;;  %v1562_v24 = vld [vmem:[%s6045_s1 + $0x378] sm:$0xff]  ;;  %1930 = vmatpush.msrb.mxu1 %v1536_v63  ;;  %v1515_v16 = vld [vmem:[%s6045_s1 + $0x200] sm:$0xff]  ;;  %v1561_v22 = vld [vmem:[%s6045_s1 + $0x370] sm:$0xff] }
  0x7d   :  { %v4224_v41 = vsel %vm1166_vm6, %v1065_v4, %v1194_v29  ;;  %v847_v42 = vmax.f32 %v241_v8, %v3472_v60  ;;  %v848_v43 = vmax.f32 %v242_v0, %v3473_v27  ;;  %v849_v44 = vmax.f32 %v243_v9, %v3474_v32  ;;  %1985 = vmatpush.msra.mxu2 %v1562_v24  ;;  %v1578_v0 = vld [vmem:[%s6045_s1 + $0x3f8] sm:$0xff]  ;;  %v1535_v9 = vld [vmem:[%s6045_s1 + $0x2a0] sm:$0xff]  ;;  %v51_v29 = vld [vmem:[%s6046_s0 + $0xc8] sm:$0xff] }
  0x7e   :  { %1294 = vst [vmem:[#allocation2 + $0x51] sm:$0xff] %v4224_v41  ;;  %1691 = vmatmul.f32.gmra.mxu1 %v4224_v41  ;;  %v1138_v46 = vperm.slane %v842_v3, 0  ;;  %v1139_v47 = vperm.slane %v843_v14, 0  ;;  %v1140_v48 = vperm.slane %v844_v35, 0  ;;  %v1141_v15 = vperm.slane %v845_v36, 0  ;;  %2050 = vmatpush.msra.mxu3 %v1578_v0  ;;  %v1534_v32 = vld [vmem:[%s6045_s1 + $0x298] sm:$0xff] }
  0x7f   :  { %v1142_v49 = vperm.slane %v846_v38, 0  ;;  %v1143_v50 = vperm.slane %v847_v42, 0  ;;  %v1144_v51 = vperm.slane %v848_v43, 0  ;;  %v1145_v52 = vperm.slane %v849_v44, 0  ;;  %1931 = vmatpush.msrb.mxu1 %v1535_v9  ;;  %1870 = vmatpush.msrb.mxu0 %v1515_v16  ;;  %v1354_v9 = vld [vmem:[#allocation2 + $0x10] sm:$0xff] }
  0x80   :  { %v1259_v53 = vsel %vm1154_vm0, %v1139_v47, %v1138_v46  ;;  %v101_v54 = vmax.f32 %v47_v33, %v49_v23  ;;  %v184_v55 = vrot.slane %v4158_v25, 2  ;;  %v185_v57 = vrot.slane %v4158_v25, 4  ;;  %1986 = vmatpush.msra.mxu2 %v1561_v22  ;;  %v1532_v47 = vld [vmem:[%s6045_s1 + $0x288] sm:$0xff] }
  0x81   :  { %v1260_v58 = vsel %vm1156_vm1, %v1140_v48, %v1259_v53  ;;  %v186_v61 = vrot.slane %v4158_v25, 6  ;;  %v3395_v2 = vrot.slane %v4158_v25, 9  ;;  %v4246_v4 = vmax.f32 %v50_v45, %v52_v30  ;;  %1932 = vmatpush.msrb.mxu1 %v1534_v32 }
  0x82   :  { %v1261_v5 = vsel %vm1158_vm2, %v1141_v15, %v1260_v58  ;;  %v187_v6 = vrot.slane %v101_v54, 2  ;;  %v188_v7 = vrot.slane %v101_v54, 4  ;;  %v189_v8 = vrot.slane %v101_v54, 6  ;;  %v1560_v58 = vld [vmem:[%s6045_s1 + $0x368] sm:$0xff] }
  0x83   :  { %v1262_v10 = vsel %vm1160_vm3, %v1142_v49, %v1261_v5  ;;  %v3396_v11 = vrot.slane %v184_v55, 9  ;;  %v3397_v12 = vrot.slane %v185_v57, 9  ;;  %v3398_v13 = vrot.slane %v186_v61, 9  ;;  %1933 = vmatpush.msrb.mxu1 %v1533_v37  ;;  %1987 = vmatpush.msra.mxu2 %v1560_v58  ;;  %v4376_v58 = vld [vmem:[#allocation2 + $0x22] sm:$0xff] }
  0x84   :  { %v1263_v17 = vsel %vm1162_vm4, %v1143_v50, %v1262_v10  ;;  %v3399_v18 = vrot.slane %v101_v54, 9  ;;  %v3400_v19 = vrot.slane %v187_v6, 9  ;;  %v3401_v21 = vrot.slane %v188_v7, 9  ;;  %v1577_v50 = vld [vmem:[%s6045_s1 + $0x3f0] sm:$0xff] }
  0x85   :  { %v4266_v60 = vld [vmem:[#allocation2 + $0x50] sm:$0xff]  ;;  %v1264_v27 = vsel %vm1164_vm5, %v1144_v51, %v1263_v17  ;;  %v3402_v62 = vrot.slane %v189_v8, 9  ;;  %v770_v28 = vmax.f32 %v4158_v25, %v3395_v2  ;;  %v771_v31 = vmax.f32 %v184_v55, %v3396_v11  ;;  %v53_v25 = vld [vmem:[%s6046_s0 + $0xd8] sm:$0xff]  ;;  %2051 = vmatpush.msra.mxu3 %v1577_v50  ;;  %1934 = vmatpush.msrb.mxu1 %v1532_v47  ;;  %v54_v50 = vld [vmem:[%s6046_s0 + $0xe0] sm:$0xff] }
  0x86   :  { %1626 = vmatmul.f32.gmra.mxu0 %v4266_v60  ;;  %v4275_v3 = vsel %vm1166_vm6, %v1145_v52, %v1264_v27  ;;  %v772_v14 = vmax.f32 %v185_v57, %v3397_v12  ;;  %v773_v33 = vmax.f32 %v186_v61, %v3398_v13  ;;  %v774_v34 = vmax.f32 %v101_v54, %v3399_v18  ;;  %v1594_v51 = vld [vmem:[%s6045_s1 + $0x478] sm:$0xff]  ;;  %v1531_v57 = vld [vmem:[%s6045_s1 + $0x280] sm:$0xff] }
  0x87   :  { %1304 = vst [vmem:[#allocation2 + $0x111] sm:$0xff] %v4275_v3  ;;  %1721 = vmatmul.f32.gmra.mxu3 %v4275_v3  ;;  %v775_v35 = vmax.f32 %v187_v6, %v3400_v19  ;;  %v776_v36 = vmax.f32 %v188_v7, %v3401_v21  ;;  %v777_v38 = vmax.f32 %v189_v8, %v3402_v62  ;;  %v1066_v23 = vperm.slane %v770_v28, 0 }
  0x88   :  { %v1067_v40 = vperm.slane %v771_v31, 0  ;;  %v1068_v42 = vperm.slane %v772_v14, 0  ;;  %v1069_v43 = vperm.slane %v773_v33, 0  ;;  %v1070_v44 = vperm.slane %v774_v34, 0  ;;  %2115 = vmatpush.msra.mxu0 %v1594_v51  ;;  %1935 = vmatpush.msrb.mxu1 %v1531_v57  ;;  %v56_v51 = vld [vmem:[%s6046_s0 + $0xf0] sm:$0xff] }
  0x89   :  { %v1071_v24 = vperm.slane %v775_v35, 0  ;;  %v1072_v45 = vperm.slane %v776_v36, 0  ;;  %v1073_v30 = vperm.slane %v777_v38, 0  ;;  %v103_v46 = vmax.f32 %v51_v29, %v53_v25  ;;  %v1576_v29 = vld [vmem:[%s6045_s1 + $0x3e8] sm:$0xff]  ;;  %v1593_v25 = vld [vmem:[%s6045_s1 + $0x470] sm:$0xff]  ;;  %v1559_v38 = vld [vmem:[%s6045_s1 + $0x360] sm:$0xff] }
  0x8a   :  { %v1196_v48 = vsel %vm1154_vm0, %v1067_v40, %v1066_v23  ;;  %v190_v15 = vrot.slane %v4246_v4, 2  ;;  %v191_v63 = vrot.slane %v4246_v4, 4  ;;  %v192_v49 = vrot.slane %v4246_v4, 6  ;;  %2052 = vmatpush.msra.mxu3 %v1576_v29  ;;  %2116 = vmatpush.msra.mxu0 %v1593_v25  ;;  %v1338_v23 = vld [vmem:[#allocation2 + $0x2] sm:$0xff] }
  0x8b   :  { %v1197_v52 = vsel %vm1156_vm1, %v1068_v42, %v1196_v48  ;;  %v193_v53 = vrot.slane %v103_v46, 2  ;;  %v194_v54 = vrot.slane %v103_v46, 4  ;;  %v195_v55 = vrot.slane %v103_v46, 6  ;;  %1988 = vmatpush.msra.mxu2 %v1559_v38  ;;  %v1575_v48 = vld [vmem:[%s6045_s1 + $0x3e0] sm:$0xff] }
  0x8c   :  { %v1198_v61 = vsel %vm1158_vm2, %v1069_v43, %v1197_v52  ;;  %v3403_v2 = vrot.slane %v4246_v4, 9  ;;  %v3404_v5 = vrot.slane %v190_v15, 9  ;;  %v3405_v6 = vrot.slane %v191_v63, 9  ;;  %2053 = vmatpush.msra.mxu3 %v1575_v48 }
  0x8d   :  { %v1199_v7 = vsel %vm1160_vm3, %v1070_v44, %v1198_v61  ;;  %v3406_v8 = vrot.slane %v192_v49, 9  ;;  %v3407_v56 = vrot.slane %v103_v46, 9  ;;  %v3408_v0 = vrot.slane %v193_v53, 9  ;;  %v4334_v44 = vld [vmem:[#allocation2 + $0x20] sm:$0xff]  ;;  %v55_v61 = vld [vmem:[%s6046_s0 + $0xe8] sm:$0xff] }
  0x8e   :  { %v4311_v10 = vld [vmem:[#allocation2 + $0x110] sm:$0xff]  ;;  %v1200_v11 = vsel %vm1162_vm4, %v1071_v24, %v1199_v7  ;;  %v3409_v12 = vrot.slane %v194_v54, 9  ;;  %v3410_v13 = vrot.slane %v195_v55, 9  ;;  %v778_v16 = vmax.f32 %v4246_v4, %v3403_v2  ;;  %v57_v2 = vld [vmem:[%s6046_s0 + $0xf8] sm:$0xff] }
  0x8f   :  { %1656 = vmatmul.f32.gmra.mxu2 %v4311_v10  ;;  %v1201_v17 = vsel %vm1164_vm5, %v1072_v45, %v1200_v11  ;;  %v779_v18 = vmax.f32 %v190_v15, %v3404_v5  ;;  %v780_v19 = vmax.f32 %v191_v63, %v3405_v6  ;;  %v781_v21 = vmax.f32 %v192_v49, %v3406_v8  ;;  %v1592_v15 = vld [vmem:[%s6045_s1 + $0x468] sm:$0xff]  ;;  %v1558_v63 = vld [vmem:[%s6045_s1 + $0x358] sm:$0xff] }
  0x90   :  { %v4318_v22 = vsel %vm1166_vm6, %v1073_v30, %v1201_v17  ;;  %v782_v27 = vmax.f32 %v103_v46, %v3407_v56  ;;  %v783_v62 = vmax.f32 %v193_v53, %v3408_v0  ;;  %v784_v28 = vmax.f32 %v194_v54, %v3409_v12  ;;  %1806 = vmatmul.f32.vlgmr.msrb.gmra.mxu3 %v1354_v9  ;;  %v1339_v49 = vld [vmem:[#allocation2 + $0x12] sm:$0xff] }
  0x91   :  { %1295 = vst [vmem:[#allocation2 + $0x61] sm:$0xff] %v4318_v22  ;;  %1694 = vmatmul.f32.gmra.mxu1 %v4318_v22  ;;  %v785_v4 = vmax.f32 %v195_v55, %v3410_v13  ;;  %v1074_v31 = vperm.slane %v778_v16, 0  ;;  %v1075_v32 = vperm.slane %v779_v18, 0  ;;  %v1076_v14 = vperm.slane %v780_v19, 0  ;;  %2117 = vmatpush.msra.mxu0 %v1592_v15  ;;  %v1574_v54 = vld [vmem:[%s6045_s1 + $0x3d8] sm:$0xff]  ;;  %v1557_v55 = vld [vmem:[%s6045_s1 + $0x350] sm:$0xff] }
  0x92   :  { %v1077_v33 = vperm.slane %v781_v21, 0  ;;  %v1078_v34 = vperm.slane %v782_v27, 0  ;;  %v1079_v35 = vperm.slane %v783_v62, 0  ;;  %v1080_v37 = vperm.slane %v784_v28, 0  ;;  %1989 = vmatpush.msra.mxu2 %v1558_v63  ;;  %2054 = vmatpush.msra.mxu3 %v1574_v54  ;;  %v1370_v9 = vld [vmem:[#allocation2 + $0x11] sm:$0xff]  ;;  %v4423_v54 = vld [vmem:[#allocation2 + $0x42] sm:$0xff] }
  0x93   :  { %v1203_v36 = vsel %vm1154_vm0, %v1075_v32, %v1074_v31  ;;  %v1081_v42 = vperm.slane %v785_v4, 0  ;;  %v104_v53 = vmax.f32 %v54_v50, %v56_v51  ;;  %v105_v6 = vmax.f32 %v55_v61, %v57_v2  ;;  %v1573_v4 = vld [vmem:[%s6045_s1 + $0x3d0] sm:$0xff]  ;;  %v1590_v31 = vld [vmem:[%s6045_s1 + $0x458] sm:$0xff]  ;;  %v1572_v50 = vld [vmem:[%s6045_s1 + $0x3c8] sm:$0xff] }
  0x94   :  { %v1204_v40 = vsel %vm1156_vm1, %v1076_v14, %v1203_v36  ;;  %1990 = vmatpush.msra.mxu2 %v1557_v55  ;;  %2055 = vmatpush.msra.mxu3 %v1573_v4  ;;  %v4396_v36 = vld [vmem:[#allocation2 + $0x32] sm:$0xff]  ;;  %v1588_v55 = vld [vmem:[%s6045_s1 + $0x448] sm:$0xff]  ;;  %v1587_v2 = vld [vmem:[%s6045_s1 + $0x440] sm:$0xff] }
  0x95   :  { %v1205_v43 = vsel %vm1158_vm2, %v1077_v33, %v1204_v40  ;;  %v196_v57 = vrot.slane %v104_v53, 2  ;;  %v197_v5 = vrot.slane %v104_v53, 4  ;;  %v198_v7 = vrot.slane %v104_v53, 6  ;;  %v1589_v51 = vld [vmem:[%s6045_s1 + $0x450] sm:$0xff]  ;;  %v1567_v4 = vld [vmem:[%s6045_s1 + $0x3a0] sm:$0xff] }
  0x96   :  { %v1206_v24 = vsel %vm1160_vm3, %v1078_v34, %v1205_v43  ;;  %v3411_v8 = vrot.slane %v104_v53, 9  ;;  %v199_v11 = vrot.slane %v105_v6, 2  ;;  %v200_v17 = vrot.slane %v105_v6, 4  ;;  %v1556_v34 = vld [vmem:[%s6045_s1 + $0x348] sm:$0xff]  ;;  %2056 = vmatpush.msra.mxu3 %v1572_v50  ;;  %v4438_v61 = vld [vmem:[#allocation2 + $0x52] sm:$0xff] }
  0x97   :  { %1741 = vmatmul.f32.vlgmr.msrb.gmra.mxu2 %v1338_v23  ;;  %v1207_v45 = vsel %vm1162_vm4, %v1079_v35, %v1206_v24  ;;  %v3412_v56 = vrot.slane %v196_v57, 9  ;;  %v3413_v0 = vrot.slane %v197_v5, 9  ;;  %v3414_v12 = vrot.slane %v198_v7, 9 }
  0x98   :  { %v4338_v30 = vld [vmem:[#allocation2 + $0x60] sm:$0xff]  ;;  %v1208_v46 = vsel %vm1164_vm5, %v1080_v37, %v1207_v45  ;;  %1809 = vmatmul.f32.gmra.mxu3 %v4334_v44  ;;  %v786_v13 = vmax.f32 %v104_v53, %v3411_v8  ;;  %v3415_v18 = vrot.slane %v105_v6, 9  ;;  %v201_v21 = vrot.slane %v105_v6, 6  ;;  %1991 = vmatpush.msra.mxu2 %v1556_v34  ;;  %v1569_v8 = vld [vmem:[%s6045_s1 + $0x3b0] sm:$0xff] }
  0x99   :  { %1629 = vmatmul.f32.gmra.mxu0 %v4338_v30  ;;  %v4344_v47 = vsel %vm1166_vm6, %v1081_v42, %v1208_v46  ;;  %v787_v16 = vmax.f32 %v196_v57, %v3412_v56  ;;  %v788_v19 = vmax.f32 %v197_v5, %v3413_v0  ;;  %v3416_v27 = vrot.slane %v199_v11, 9  ;;  %v4401_v46 = vld [vmem:[#allocation2 + $0x21] sm:$0xff]  ;;  %v1554_v57 = vld [vmem:[%s6045_s1 + $0x338] sm:$0xff]  ;;  %v1553_v5 = vld [vmem:[%s6045_s1 + $0x330] sm:$0xff] }
  0x9a   :  { %1296 = vst [vmem:[#allocation2 + $0x71] sm:$0xff] %v4344_v47  ;;  %1697 = vmatmul.f32.gmra.mxu1 %v4344_v47  ;;  %v789_v62 = vmax.f32 %v198_v7, %v3414_v12  ;;  %v1082_v28 = vperm.slane %v786_v13, 0  ;;  %v3417_v32 = vrot.slane %v200_v17, 9  ;;  %v3418_v29 = vrot.slane %v201_v21, 9  ;;  %v1586_v56 = vld [vmem:[%s6045_s1 + $0x438] sm:$0xff]  ;;  %v1552_v0 = vld [vmem:[%s6045_s1 + $0x328] sm:$0xff] }
  0x9b   :  { %v1083_v14 = vperm.slane %v787_v16, 0  ;;  %v1084_v33 = vperm.slane %v788_v19, 0  ;;  %v791_v25 = vmax.f32 %v199_v11, %v3416_v27  ;;  %v1568_v13 = vld [vmem:[%s6045_s1 + $0x3a8] sm:$0xff]  ;;  %v1585_v16 = vld [vmem:[%s6045_s1 + $0x430] sm:$0xff]  ;;  %v4490_v19 = vld [vmem:[#allocation2 + $0xc0] sm:$0xff] }
  0x9c   :  { %v1085_v35 = vperm.slane %v789_v62, 0  ;;  %v792_v38 = vmax.f32 %v200_v17, %v3417_v32  ;;  %v793_v40 = vmax.f32 %v201_v21, %v3418_v29  ;;  %v1551_v17 = vld [vmem:[%s6045_s1 + $0x320] sm:$0xff]  ;;  %v1550_v32 = vld [vmem:[%s6045_s1 + $0x318] sm:$0xff]  ;;  %v88_v29 = vld [vmem:[%s6046_s0 + $0x1f0] sm:$0xff] }
  0x9d   :  { %v1210_v37 = vsel %vm1154_vm0, %v1083_v14, %v1082_v28  ;;  %v1087_v42 = vperm.slane %v791_v25, 0  ;;  %v4512_v14 = vld [vmem:[#allocation2 + $0xd0] sm:$0xff]  ;;  %v86_v34 = vld [vmem:[%s6046_s0 + $0x1e0] sm:$0xff] }
  0x9e   :  { %v1211_v43 = vsel %vm1156_vm1, %v1084_v33, %v1210_v37  ;;  %v1088_v24 = vperm.slane %v792_v38, 0  ;;  %v1089_v48 = vperm.slane %v793_v40, 0  ;;  %v120_v25 = vmax.f32 %v86_v34, %v88_v29  ;;  %v1583_v38 = vld [vmem:[%s6045_s1 + $0x420] sm:$0xff]  ;;  %v1549_v37 = vld [vmem:[%s6045_s1 + $0x310] sm:$0xff]  ;;  %v1548_v29 = vld [vmem:[%s6045_s1 + $0x308] sm:$0xff] }
  0x9f   :  { %1744 = vmatmul.f32.gmra.mxu2 %v1339_v49  ;;  %v1212_v45 = vsel %vm1158_vm2, %v1085_v35, %v1211_v43  ;;  %v1566_v35 = vld [vmem:[%s6045_s1 + $0x398] sm:$0xff]  ;;  %v4537_v43 = vld [vmem:[#allocation2 + $0xc2] sm:$0xff] }
  0xa0   :  { %1812 = vmatmul.f32.gmra.mxu3 %v4067_v59  ;;  %v1591_v59 = vld [vmem:[%s6045_s1 + $0x460] sm:$0xff]  ;;  %v244_v40 = vrot.slane %v120_v25, 2  ;;  %v3475_v50 = vrot.slane %v120_v25, 9 }
  0xa1   :  { %v4364_v52 = vld [vmem:[#allocation2 + $0x70] sm:$0xff]  ;;  %2118 = vmatpush.msra.mxu0 %v1591_v59  ;;  %v1571_v59 = vld [vmem:[%s6045_s1 + $0x3c0] sm:$0xff]  ;;  %v4501_v28 = vpop.f32.mrf.mxu0 }
  0xa2   :  { %1632 = vmatmul.f32.gmra.mxu0 %v4364_v52  ;;  %1936 = vmatmul.f32.vlgmr.msrb.gmra.mxu1 %v1339_v49 }
  0xa3   :  { %2119 = vmatpush.msra.mxu0 %v1590_v31  ;;  %2057 = vmatpush.msra.mxu3 %v1571_v59  ;;  %v1584_v31 = vld [vmem:[%s6045_s1 + $0x428] sm:$0xff]  ;;  %v1378_v59 = vld [vmem:[#allocation2 + $0xb1] sm:$0xff] }
  0xa4   :  { %v4474_v11 = vpop.f32.mrf.mxu2 }
  0xa5   :  { %2120 = vmatpush.msra.mxu0 %v1589_v51  ;;  %v4457_v7 = vpop.f32.mrf.mxu3  ;;  %v3476_v51 = vrot.slane %v244_v40, 9 }
  0xa7   :  { %1747 = vmatmul.f32.gmra.mxu2 %v4376_v58  ;;  %2121 = vmatpush.msra.mxu0 %v1588_v55 }
  0xa8   :  { %1815 = vmatmul.f32.gmra.mxu3 %v4169_v39  ;;  %v790_v39 = vmax.f32 %v105_v6, %v3415_v18  ;;  %v4453_v6 = vld [vmem:[#allocation2 + $0x62] sm:$0xff] }
  0xa9   :  { %2122 = vmatpush.msra.mxu0 %v1587_v2  ;;  %v1346_v18 = vld [vmem:[#allocation2 + $0xa2] sm:$0xff]  ;;  %v851_v2 = vmax.f32 %v244_v40, %v3476_v51 }
  0xaa   :  { %1871 = vmatmul.f32.vlgmr.msrb.gmra.mxu0 %v1370_v9  ;;  %1939 = vmatmul.f32.gmra.mxu1 %v4376_v58  ;;  %v1086_v23 = vperm.slane %v790_v39, 0  ;;  %v4472_v9 = vld [vmem:[#allocation2 + $0x72] sm:$0xff] }
  0xab   :  { %2123 = vmatpush.msra.mxu0 %v1586_v56  ;;  %v1347_v39 = vld [vmem:[#allocation2 + $0xb2] sm:$0xff] }
  0xac   :  { %v1213_v15 = vsel %vm1160_vm3, %v1086_v23, %v1212_v45  ;;  %v89_v45 = vld [vmem:[%s6046_s0 + $0x1f8] sm:$0xff] }
  0xad   :  { %v1214_v63 = vsel %vm1162_vm4, %v1087_v42, %v1213_v15  ;;  %v4477_v12 = vpop.f32.mrf.mxu3  ;;  %2124 = vmatpush.msra.mxu0 %v1585_v16  ;;  %v4545_v15 = vld [vmem:[#allocation2 + $0xe0] sm:$0xff] }
  0xae   :  { %v1215_v49 = vsel %vm1164_vm5, %v1088_v24, %v1214_v63  ;;  %v87_v24 = vld [vmem:[%s6046_s0 + $0x1e8] sm:$0xff] }
  0xaf   :  { %1750 = vmatmul.f32.gmra.mxu2 %v4396_v36  ;;  %v4417_v53 = vsel %vm1166_vm6, %v1089_v48, %v1215_v49  ;;  %2125 = vmatpush.msra.mxu0 %v1584_v31  ;;  %v245_v48 = vrot.slane %v120_v25, 4  ;;  %v121_v63 = vmax.f32 %v87_v24, %v89_v45  ;;  %v246_v49 = vrot.slane %v120_v25, 6 }
  0xb0   :  { %1818 = vmatmul.f32.gmra.mxu3 %v4266_v60  ;;  %v1555_v60 = vld [vmem:[%s6045_s1 + $0x340] sm:$0xff]  ;;  %1297 = vst [vmem:[#allocation2 + $0x81] sm:$0xff] %v4417_v53 }
  0xb1   :  { %1992 = vmatpush.msra.mxu2 %v1555_v60  ;;  %2126 = vmatpush.msra.mxu0 %v1583_v38  ;;  %v3477_v60 = vrot.slane %v245_v48, 9  ;;  %v247_v55 = vrot.slane %v121_v63, 2 }
  0xb2   :  { %1874 = vmatmul.f32.gmra.mxu0 %v4401_v46  ;;  %1942 = vmatmul.f32.gmra.mxu1 %v4396_v36 }
  0xb3   :  { %1993 = vmatpush.msra.mxu2 %v1554_v57  ;;  %v3478_v57 = vrot.slane %v246_v49, 9  ;;  %v852_v56 = vmax.f32 %v245_v48, %v3477_v60  ;;  %v4564_v48 = vld [vmem:[#allocation2 + $0xf0] sm:$0xff] }
  0xb4   :  { %v4492_v21 = vpop.f32.mrf.mxu2 }
  0xb5   :  { %1994 = vmatpush.msra.mxu2 %v1553_v5  ;;  %v4497_v62 = vpop.f32.mrf.mxu3  ;;  %v248_v5 = vrot.slane %v121_v63, 4  ;;  %v1148_v34 = vperm.slane %v852_v56, 0  ;;  %v1564_v56 = vld [vmem:[%s6045_s1 + $0x388] sm:$0xff] }
  0xb7   :  { %1753 = vmatmul.f32.gmra.mxu2 %v4423_v54  ;;  %v4494_v27 = vld [vmem:[#allocation2 + $0x82] sm:$0xff]  ;;  %v4535_v42 = vpop.f32.mrf.mxu0  ;;  %v3481_v31 = vrot.slane %v248_v5, 9 }
  0xb8   :  { %1821 = vmatmul.f32.gmra.mxu3 %v4338_v30  ;;  %1995 = vmatpush.msra.mxu2 %v1552_v0  ;;  %v249_v0 = vrot.slane %v121_v63, 6 }
  0xb9   :  { %v856_v40 = vmax.f32 %v248_v5, %v3481_v31  ;;  %v1547_v31 = vld [vmem:[%s6045_s1 + $0x300] sm:$0xff] }
  0xba   :  { %1877 = vmatmul.f32.gmra.mxu0 %v4044_v26  ;;  %1945 = vmatmul.f32.gmra.mxu1 %v4423_v54  ;;  %v1570_v26 = vld [vmem:[%s6045_s1 + $0x3b8] sm:$0xff] }
  0xbb   :  { %2058 = vmatpush.msra.mxu3 %v1570_v26  ;;  %1996 = vmatpush.msra.mxu2 %v1551_v17  ;;  %v850_v26 = vmax.f32 %v120_v25, %v3475_v50  ;;  %v3482_v25 = vrot.slane %v249_v0, 9 }
  0xbc   :  { %v4515_v33 = vpop.f32.mrf.mxu2 }
  0xbd   :  { %2059 = vmatpush.msra.mxu3 %v1569_v8  ;;  %1997 = vmatpush.msra.mxu2 %v1550_v32  ;;  %v4530_v23 = vpop.f32.mrf.mxu3  ;;  %v3479_v8 = vrot.slane %v121_v63, 9  ;;  %v1146_v16 = vperm.slane %v850_v26, 0 }
  0xbf   :  { %1756 = vmatmul.f32.gmra.mxu2 %v4438_v61  ;;  %2060 = vmatpush.msra.mxu3 %v1568_v13  ;;  %v853_v13 = vmax.f32 %v246_v49, %v3478_v57  ;;  %v854_v32 = vmax.f32 %v121_v63, %v3479_v8  ;;  %v857_v49 = vmax.f32 %v249_v0, %v3482_v25  ;;  %v4572_v57 = vld [vmem:[#allocation2 + $0xc1] sm:$0xff]  ;;  %v1581_v0 = vld [vmem:[%s6045_s1 + $0x410] sm:$0xff] }
  0xc0   :  { %1824 = vmatmul.f32.gmra.mxu3 %v4364_v52  ;;  %1998 = vmatpush.msra.mxu2 %v1549_v37  ;;  %v4561_v37 = vld [vmem:[#allocation2 + $0xd2] sm:$0xff] }
  0xc1   :  { %2061 = vmatpush.msra.mxu3 %v1567_v4  ;;  %v1582_v4 = vld [vmem:[%s6045_s1 + $0x418] sm:$0xff]  ;;  %v1149_v38 = vperm.slane %v853_v13, 0  ;;  %v1150_v24 = vperm.slane %v854_v32, 0  ;;  %v1153_v26 = vperm.slane %v857_v49, 0  ;;  %v4591_v13 = vld [vmem:[#allocation2 + $0xe2] sm:$0xff] }
  0xc2   :  { %1880 = vmatmul.f32.gmra.mxu0 %v4132_v1  ;;  %1948 = vmatmul.f32.gmra.mxu1 %v4438_v61  ;;  %v4455_v1 = vld [vmem:[#allocation2 + $0x80] sm:$0xff]  ;;  %v4635_v49 = vld [vmem:[#allocation2 + $0xf1] sm:$0xff] }
  0xc3   :  { %2062 = vmatpush.msra.mxu3 %v1566_v35  ;;  %2127 = vmatpush.msra.mxu0 %v1582_v4 }
  0xc4   :  { %1999 = vmatpush.msra.mxu2 %v1548_v29  ;;  %v4614_v29 = vld [vmem:[#allocation2 + $0xf2] sm:$0xff] }
  0xc5   :  { %v4550_v17 = vpop.f32.mrf.mxu2  ;;  %2128 = vmatpush.msra.mxu0 %v1581_v0  ;;  %v1420_v0 = vld [vmem:[#allocation2 + $0x31] sm:$0xff] }
  0xc6   :  { %v4569_v60 = vpop.f32.mrf.mxu0  ;;  %2000 = vmatpush.msra.mxu2 %v1547_v31 }
  0xc7   :  { %1759 = vmatmul.f32.gmra.mxu2 %v4453_v6 }
  0xc8   :  { %1827 = vmatmul.f32.gmra.mxu3 %v4455_v1 }
  0xca   :  { %1883 = vmatmul.f32.gmra.mxu0 %v4224_v41  ;;  %1951 = vmatmul.f32.gmra.mxu1 %v4453_v6  ;;  %v1362_v41 = vld [vmem:[#allocation2 + $0xb0] sm:$0xff] }
  0xcf   :  { %1762 = vmatmul.f32.gmra.mxu2 %v4472_v9 }
  0xd0   :  { %1830 = vmatmul.f32.gmra.mxu3 %v1362_v41  ;;  %v3480_v41 = vrot.slane %v247_v55, 9  ;;  %v4566_v63 = vpop.f32.mrf.mxu3 }
  0xd1   :  { %6054 = vst [vmem:[#allocation3_spill] sm:$0xff] %v4566_v63 }
  0xd2   :  { %1886 = vmatmul.f32.gmra.mxu0 %v4318_v22  ;;  %1954 = vmatmul.f32.gmra.mxu1 %v4472_v9  ;;  %v855_v35 = vmax.f32 %v247_v55, %v3480_v41 }
  0xd4   :  { %v1151_v50 = vperm.slane %v855_v35, 0 }
  0xd7   :  { %1765 = vmatmul.f32.gmra.mxu2 %v1346_v18  ;;  %v1565_v18 = vld [vmem:[%s6045_s1 + $0x390] sm:$0xff] }
  0xd8   :  { %1833 = vmatmul.f32.gmra.mxu3 %v4490_v19 }
  0xd9   :  { %2063 = vmatpush.msra.mxu3 %v1565_v18  ;;  %v4595_v18 = vld [vmem:[#allocation2 + $0xd1] sm:$0xff] }
  0xda   :  { %1889 = vmatmul.f32.gmra.mxu0 %v4344_v47  ;;  %1957 = vmatmul.f32.gmra.mxu1 %v4494_v27 }
  0xdb   :  { %2064 = vmatpush.msra.mxu3 %v1564_v56  ;;  %v4603_v32 = vpop.f32.mrf.mxu0 }
  0xdf   :  { %1768 = vmatmul.f32.gmra.mxu2 %v1347_v39 }
  0xe0   :  { %1836 = vmatmul.f32.gmra.mxu3 %v4512_v14 }
  0xe2   :  { %1892 = vmatmul.f32.gmra.mxu0 %v4417_v53  ;;  %1960 = vmatmul.f32.gmra.mxu1 %v1347_v39  ;;  %v1147_v39 = vperm.slane %v851_v2, 0 }
  0xe4   :  { %v1266_v45 = vsel %vm1154_vm0, %v1147_v39, %v1146_v16  ;;  %v4593_v16 = vpop.f32.mrf.mxu2  ;;  %v4598_v4 = vpop.f32.mrf.mxu3  ;;  %v1563_v39 = vld [vmem:[%s6045_s1 + $0x380] sm:$0xff] }
  0xe5   :  { %v1267_v51 = vsel %vm1156_vm1, %v1148_v34, %v1266_v45  ;;  %6055 = vst [vmem:[#allocation4_spill] sm:$0xff] %v4598_v4  ;;  %v1580_v34 = vld [vmem:[%s6045_s1 + $0x408] sm:$0xff]  ;;  %2065 = vmatpush.msra.mxu3 %v1563_v39 }
  0xe6   :  { %v1268_v55 = vsel %vm1158_vm2, %v1149_v38, %v1267_v51  ;;  %2129 = vmatpush.msra.mxu0 %v1580_v34 }
  0xe7   :  { %1771 = vmatmul.f32.gmra.mxu2 %v4537_v43  ;;  %v1269_v2 = vsel %vm1160_vm3, %v1150_v24, %v1268_v55  ;;  %v4631_v24 = vld [vmem:[#allocation2 + $0x102] sm:$0xff]  ;;  %v4645_v55 = vld [vmem:[#allocation2 + $0x112] sm:$0xff] }
  0xe8   :  { %1839 = vmatmul.f32.gmra.mxu3 %v4545_v15  ;;  %v1270_v5 = vsel %vm1162_vm4, %v1151_v50, %v1269_v2 }
  0xea   :  { %1895 = vmatmul.f32.gmra.mxu0 %v1378_v59  ;;  %1963 = vmatmul.f32.gmra.mxu1 %v4537_v43  ;;  %v1152_v59 = vperm.slane %v856_v40, 0  ;;  %v1579_v40 = vld [vmem:[%s6045_s1 + $0x400] sm:$0xff] }
  0xeb   :  { %2130 = vmatpush.msra.mxu0 %v1579_v40 }
  0xec   :  { %v1271_v8 = vsel %vm1164_vm5, %v1152_v59, %v1270_v5  ;;  %v4616_v25 = vpop.f32.mrf.mxu2 }
  0xed   :  { %v4588_v41 = vsel %vm1166_vm6, %v1153_v26, %v1271_v8  ;;  %6056 = vst [vmem:[#allocation5_spill] sm:$0xff] %v4616_v25  ;;  %v4647_v26 = vld [vmem:[#allocation2 + $0x101] sm:$0xff] }
  0xee   :  { %1305 = vst [vmem:[#allocation2 + $0x121] sm:$0xff] %v4588_v41 }
  0xef   :  { %1774 = vmatmul.f32.gmra.mxu2 %v4561_v37  ;;  %v4625_v38 = vpop.f32.mrf.mxu0 }
  0xf0   :  { %1842 = vmatmul.f32.gmra.mxu3 %v4564_v48 }
  0xf2   :  { %1898 = vmatmul.f32.gmra.mxu0 %v4572_v57  ;;  %1966 = vmatmul.f32.gmra.mxu1 %v4561_v37 }
  0xf5   :  { %v4633_v45 = vld [vmem:[#allocation2 + $0x120] sm:$0xff] }
  0xf6   :  { %v4622_v35 = vpop.f32.mrf.mxu3  ;;  %v4658_v39 = vld [vmem:[#allocation2 + $0x122] sm:$0xff] }
  0xf7   :  { %1777 = vmatmul.f32.gmra.mxu2 %v4591_v13  ;;  %6057 = vst [vmem:[#allocation6_spill] sm:$0xff] %v4622_v35 }
  0xf8   :  { %1845 = vmatmul.f32.gmra.mxu3 %v4193_v20  ;;  %v4618_v20 = vld [vmem:[#allocation2 + $0xe1] sm:$0xff] }
  0xfa   :  { %1901 = vmatmul.f32.gmra.mxu0 %v4595_v18  ;;  %1969 = vmatmul.f32.gmra.mxu1 %v4591_v13 }
  0xfe   :  { %v4638_v50 = vpop.f32.mrf.mxu2 }
  0xff   :  { %1780 = vmatmul.f32.gmra.mxu2 %v4614_v29  ;;  %6058 = vst [vmem:[#allocation7_spill] sm:$0xff] %v4638_v50  ;;  %v1421_v50 = vld [vmem:[#allocation2 + $0x41] sm:$0xff] }
 0x100   :  { %1848 = vmatmul.f32.gmra.mxu3 %v4311_v10  ;;  %v1677_v10 = vpop.f32.mrf.mxu1 }
 0x101   :  { %v1678_v34 = vadd.f32 %v1677_v10, %v4501_v28 }
 0x102   :  { %1904 = vmatmul.f32.gmra.mxu0 %v4618_v20  ;;  %1972 = vmatmul.f32.gmra.mxu1 %v4614_v29 }
 0x103   :  { %v4643_v59 = vpop.f32.mrf.mxu0 }
 0x107   :  { %1783 = vmatmul.f32.gmra.mxu2 %v4631_v24 }
 0x108   :  { %1851 = vmatmul.f32.gmra.mxu3 %v4633_v45  ;;  %v1680_v2 = vpop.f32.mrf.mxu1 }
 0x10a   :  { %1907 = vmatmul.f32.gmra.mxu0 %v4635_v49  ;;  %1975 = vmatmul.f32.gmra.mxu1 %v4631_v24  ;;  %v1722_v51 = vpop.f32.mrf.mxu3 }
 0x10f   :  { %1786 = vmatmul.f32.gmra.mxu2 %v4645_v55 }
 0x110   :  { %2066 = vmatmul.f32.vlgmr.msra.gmra.mxu3 %v4401_v46 }
 0x112   :  { %1910 = vmatmul.f32.gmra.mxu0 %v4647_v26  ;;  %v1657_v5 = vpop.f32.mrf.mxu2  ;;  %1978 = vmatmul.f32.gmra.mxu1 %v4645_v55 }
 0x113   :  { %v4653_v8 = vadd.f32 %v1722_v51, %v1657_v5  ;;  %v1807_v56 = vpop.f32.mrf.mxu3  ;;  %v1683_v51 = vpop.f32.mrf.mxu1  ;;  %v1404_v5 = vld [vmem:[#allocation2 + $0x30] sm:$0xff] }
 0x115   :  { %6059 = vst [vmem:[#allocation8_spill] sm:$0xff] %v4653_v8 }
 0x116   :  { %v4655_v31 = vpop.f32.mrf.mxu0 }
 0x117   :  { %2001 = vmatmul.f32.vlgmr.msra.gmra.mxu2 %v4334_v44  ;;  %v1681_v44 = vadd.f32 %v1680_v2, %v4535_v42 }
 0x118   :  { %2069 = vmatmul.f32.gmra.mxu3 %v1420_v0  ;;  %v1405_v0 = vld [vmem:[#allocation2 + $0x40] sm:$0xff] }
 0x11a   :  { %1913 = vmatmul.f32.gmra.mxu0 %v4275_v3  ;;  %v1742_v46 = vpop.f32.mrf.mxu2  ;;  %1981 = vmatmul.f32.gmra.mxu1 %v4658_v39 }
 0x11b   :  { %v1743_v40 = vadd.f32 %v1742_v46, %v1678_v34  ;;  %v1810_v35 = vpop.f32.mrf.mxu3  ;;  %v1422_v34 = vld [vmem:[#allocation2 + $0x51] sm:$0xff]  ;;  %v1686_v46 = vpop.f32.mrf.mxu1 }
 0x11d   :  { %v4663_v8 = vadd.f32 %v1807_v56, %v1743_v40  ;;  %v1684_v56 = vadd.f32 %v1683_v51, %v4569_v60  ;;  %v1406_v40 = vld [vmem:[#allocation2 + $0x50] sm:$0xff] }
 0x11f   :  { %v4665_v4 = vpop.f32.mrf.mxu0  ;;  %2004 = vmatmul.f32.gmra.mxu2 %v1404_v5 }
 0x120   :  { %2072 = vmatmul.f32.gmra.mxu3 %v1421_v50 }
 0x122   :  { %1916 = vmatmul.f32.gmra.mxu0 %v4588_v41  ;;  %v1745_v28 = vpop.f32.mrf.mxu2 }
 0x123   :  { %v1746_v3 = vadd.f32 %v1745_v28, %v1681_v44  ;;  %v1813_v10 = vpop.f32.mrf.mxu3  ;;  %v1687_v28 = vadd.f32 %v1686_v46, %v4603_v32 }
 0x125   :  { %v4669_v25 = vadd.f32 %v1810_v35, %v1746_v3  ;;  %v1689_v35 = vpop.f32.mrf.mxu1 }
 0x127   :  { %v4671_v63 = vpop.f32.mrf.mxu0  ;;  %2007 = vmatmul.f32.gmra.mxu2 %v1405_v0 }
 0x128   :  { %2075 = vmatmul.f32.gmra.mxu3 %v1422_v34 }
 0x12a   :  { %2131 = vmatmul.f32.vlgmr.msra.gmra.mxu0 %v4376_v58  ;;  %v1748_v50 = vpop.f32.mrf.mxu2 }
 0x12b   :  { %v1749_v42 = vadd.f32 %v1748_v50, %v1684_v56  ;;  %v1816_v2 = vpop.f32.mrf.mxu3 }
 0x12d   :  { %v4675_v5 = vadd.f32 %v1813_v10, %v1749_v42  ;;  %v1690_v10 = vadd.f32 %v1689_v35, %v4625_v38  ;;  %v1692_v34 = vpop.f32.mrf.mxu1 }
 0x12f   :  { %v4677_v44 = vpop.f32.mrf.mxu0  ;;  %2010 = vmatmul.f32.gmra.mxu2 %v1406_v40 }
 0x130   :  { %2078 = vmatmul.f32.gmra.mxu3 %v4318_v22 }
 0x132   :  { %2134 = vmatmul.f32.gmra.mxu0 %v4396_v36  ;;  %v1751_v3 = vpop.f32.mrf.mxu2 }
 0x133   :  { %v1752_v60 = vadd.f32 %v1751_v3, %v1687_v28  ;;  %v1819_v51 = vpop.f32.mrf.mxu3 }
 0x135   :  { %v4682_v58 = vadd.f32 %v1816_v2, %v1752_v60  ;;  %v1695_v42 = vpop.f32.mrf.mxu1  ;;  %v1426_v2 = vld [vmem:[#allocation2 + $0x91] sm:$0xff]  ;;  %v4709_v60 = vld [vmem:[#allocation2 + $0xa0] sm:$0xff] }
 0x136   :  { %6060 = vst [vmem:[#allocation9_spill] sm:$0xff] %v4709_v60 }
 0x137   :  { %v4684_v0 = vpop.f32.mrf.mxu0  ;;  %2013 = vmatmul.f32.gmra.mxu2 %v4338_v30  ;;  %v1693_v30 = vadd.f32 %v1692_v34, %v4643_v59 }
 0x138   :  { %2081 = vmatmul.f32.gmra.mxu3 %v4344_v47 }
 0x13a   :  { %2137 = vmatmul.f32.gmra.mxu0 %v4423_v54  ;;  %v1754_v22 = vpop.f32.mrf.mxu2 }
 0x13b   :  { %v1755_v32 = vadd.f32 %v1754_v22, %v1690_v10  ;;  %v1822_v46 = vpop.f32.mrf.mxu3 }
 0x13d   :  { %v4690_v36 = vadd.f32 %v1819_v51, %v1755_v32  ;;  %v1698_v28 = vpop.f32.mrf.mxu1 }
 0x13f   :  { %v4692_v56 = vpop.f32.mrf.mxu0  ;;  %2016 = vmatmul.f32.gmra.mxu2 %v4364_v52  ;;  %v1696_v52 = vadd.f32 %v1695_v42, %v4655_v31 }
 0x140   :  { %2084 = vmatmul.f32.gmra.mxu3 %v4417_v53 }
 0x142   :  { %2140 = vmatmul.f32.gmra.mxu0 %v4438_v61  ;;  %v1757_v47 = vpop.f32.mrf.mxu2 }
 0x143   :  { %v1758_v38 = vadd.f32 %v1757_v47, %v1693_v30  ;;  %v1825_v50 = vpop.f32.mrf.mxu3 }
 0x145   :  { %v4698_v54 = vadd.f32 %v1822_v46, %v1758_v38 }
 0x147   :  { %v4700_v40 = vpop.f32.mrf.mxu0  ;;  %2019 = vmatmul.f32.gmra.mxu2 %v4455_v1  ;;  %v1699_v1 = vadd.f32 %v1698_v28, %v4665_v4 }
 0x148   :  { %2087 = vmatmul.f32.gmra.mxu3 %v1426_v2  ;;  %v1434_v2 = vld [vmem:[#allocation2 + $0x131] sm:$0xff] }
 0x14a   :  { %2143 = vmatmul.f32.gmra.mxu0 %v4453_v6  ;;  %v1760_v53 = vpop.f32.mrf.mxu2 }
 0x14b   :  { %v1761_v59 = vadd.f32 %v1760_v53, %v1696_v52  ;;  %v1828_v35 = vpop.f32.mrf.mxu3 }
 0x14d   :  { %v4705_v61 = vadd.f32 %v1825_v50, %v1761_v59 }
 0x14f   :  { %v4707_v3 = vpop.f32.mrf.mxu0  ;;  %2022 = vmatmul.f32.gmra.mxu2 %v4709_v60 }
 0x150   :  { %2090 = vmatmul.f32.gmra.mxu3 %v4572_v57 }
 0x152   :  { %2146 = vmatmul.f32.gmra.mxu0 %v4472_v9  ;;  %v1763_v31 = vpop.f32.mrf.mxu2  ;;  %v1442_v9 = vld [vmem:[#allocation2 + $0x92] sm:$0xff] }
 0x153   :  { %v1764_v6 = vadd.f32 %v1763_v31, %v1699_v1  ;;  %v4715_v51 = vpop.f32.mrf.mxu3 }
 0x155   :  { %v4717_v10 = vadd.f32 %v1828_v35, %v1764_v6 }
 0x157   :  { %v4719_v34 = vpop.f32.mrf.mxu0  ;;  %2025 = vmatmul.f32.gmra.mxu2 %v4490_v19 }
 0x158   :  { %2093 = vmatmul.f32.gmra.mxu3 %v4595_v18 }
 0x15a   :  { %2149 = vmatmul.f32.gmra.mxu0 %v4494_v27  ;;  %v4724_v22 = vpop.f32.mrf.mxu2 }
 0x15b   :  { %v4726_v57 = vpop.f32.mrf.mxu3 }
 0x15f   :  { %v4728_v4 = vpop.f32.mrf.mxu0  ;;  %2028 = vmatmul.f32.gmra.mxu2 %v4512_v14 }
 0x160   :  { %2096 = vmatmul.f32.gmra.mxu3 %v4618_v20 }
 0x162   :  { %2152 = vmatmul.f32.gmra.mxu0 %v1442_v9  ;;  %v4732_v32 = vpop.f32.mrf.mxu2  ;;  %v1450_v9 = vld [vmem:[#allocation2 + $0x132] sm:$0xff] }
 0x163   :  { %v4734_v46 = vpop.f32.mrf.mxu3 }
 0x167   :  { %v4736_v19 = vpop.f32.mrf.mxu0  ;;  %2031 = vmatmul.f32.gmra.mxu2 %v4545_v15  ;;  %v1415_v15 = vld [vmem:[#allocation2 + $0x100] sm:$0xff] }
 0x168   :  { %2099 = vmatmul.f32.gmra.mxu3 %v4635_v49  ;;  %v1432_v49 = vld [vmem:[#allocation2 + $0x111] sm:$0xff] }
 0x16a   :  { %2155 = vmatmul.f32.gmra.mxu0 %v4537_v43  ;;  %v4741_v27 = vpop.f32.mrf.mxu2 }
 0x16b   :  { %v4743_v18 = vpop.f32.mrf.mxu3 }
 0x16c   :  { %6061 = vst [vmem:[#allocation10_spill] sm:$0xff] %v4743_v18 }
 0x16f   :  { %v4745_v14 = vpop.f32.mrf.mxu0  ;;  %2034 = vmatmul.f32.gmra.mxu2 %v4564_v48  ;;  %v4761_v48 = vpop.f32.mrf.mxu1 }
 0x170   :  { %2102 = vmatmul.f32.gmra.mxu3 %v4647_v26  ;;  %v1416_v26 = vld [vmem:[#allocation2 + $0x110] sm:$0xff] }
 0x172   :  { %2158 = vmatmul.f32.gmra.mxu0 %v4561_v37  ;;  %v4750_v20 = vpop.f32.mrf.mxu2 }
 0x173   :  { %v4752_v30 = vpop.f32.mrf.mxu3 }
 0x174   :  { %6062 = vst [vmem:[#allocation11_spill] sm:$0xff] %v4752_v30 }
 0x177   :  { %v4754_v47 = vpop.f32.mrf.mxu0  ;;  %2037 = vmatmul.f32.gmra.mxu2 %v1415_v15 }
 0x178   :  { %2105 = vmatmul.f32.gmra.mxu3 %v1432_v49 }
 0x17a   :  { %2161 = vmatmul.f32.gmra.mxu0 %v4591_v13  ;;  %v4757_v43 = vpop.f32.mrf.mxu2  ;;  %v4771_v13 = vpop.f32.mrf.mxu1 }
 0x17b   :  { %v4759_v38 = vpop.f32.mrf.mxu3 }
 0x17c   :  { %6063 = vst [vmem:[#allocation12_spill] sm:$0xff] %v4759_v38 }
 0x17f   :  { %v4763_v37 = vpop.f32.mrf.mxu0  ;;  %2040 = vmatmul.f32.gmra.mxu2 %v1416_v26 }
 0x180   :  { %6064 = vst [vmem:[#allocation13_spill] sm:$0xff] %v4763_v37  ;;  %2108 = vmatmul.f32.gmra.mxu3 %v4588_v41 }
 0x182   :  { %2164 = vmatmul.f32.gmra.mxu0 %v4614_v29  ;;  %v4767_v50 = vpop.f32.mrf.mxu2  ;;  %v4784_v29 = vpop.f32.mrf.mxu1 }
 0x183   :  { %6065 = vst [vmem:[#allocation14_spill] sm:$0xff] %v4767_v50  ;;  %v4769_v42 = vpop.f32.mrf.mxu3  ;;  %v2487_v50 = vld [vmem:[%s6047_s4 + $0x70] sm:$0xff] }
 0x184   :  { %6066 = vst [vmem:[#allocation15_spill] sm:$0xff] %v4769_v42 }
 0x187   :  { %v4773_v52 = vpop.f32.mrf.mxu0  ;;  %2043 = vmatmul.f32.gmra.mxu2 %v4633_v45 }
 0x188   :  { %6067 = vst [vmem:[#allocation16_spill] sm:$0xff] %v4773_v52  ;;  %2111 = vmatmul.f32.gmra.mxu3 %v1434_v2  ;;  %v2488_v52 = vld [vmem:[%s6047_s4 + $0x78] sm:$0xff] }
 0x189   :  { %2617 = vmatpush.msra.mxu1 %v2488_v52 }
 0x18a   :  { %2167 = vmatmul.f32.gmra.mxu0 %v4631_v24  ;;  %v4777_v53 = vpop.f32.mrf.mxu2  ;;  %v4793_v1 = vpop.f32.mrf.mxu1 }
 0x18b   :  { %6068 = vst [vmem:[#allocation17_spill] sm:$0xff] %v4777_v53  ;;  %v4779_v59 = vpop.f32.mrf.mxu3  ;;  %2618 = vmatpush.msra.mxu1 %v2487_v50  ;;  %v2485_v50 = vld [vmem:[%s6047_s4 + $0x60] sm:$0xff] }
 0x18c   :  { %6069 = vst [vmem:[#allocation18_spill] sm:$0xff] %v4779_v59 }
 0x18f   :  { %v4781_v41 = vpop.f32.mrf.mxu0  ;;  %2046 = vmatmul.f32.gmra.mxu2 %v4709_v60 }
 0x190   :  { %6070 = vst [vmem:[#allocation19_spill] sm:$0xff] %v4781_v41 }
 0x192   :  { %2170 = vmatmul.f32.gmra.mxu0 %v4645_v55  ;;  %v4787_v35 = vpop.f32.mrf.mxu2  ;;  %v4806_v49 = vpop.f32.mrf.mxu1 }
 0x193   :  { %6071 = vst [vmem:[#allocation20_spill] sm:$0xff] %v4787_v35  ;;  %v4789_v28 = vpop.f32.mrf.mxu3 }
 0x197   :  { %v4791_v45 = vpop.f32.mrf.mxu0 }
 0x198   :  { %6072 = vst [vmem:[#allocation21_spill] sm:$0xff] %v4791_v45 }
 0x19a   :  { %2173 = vmatmul.f32.gmra.mxu0 %v4658_v39  ;;  %v4796_v24 = vpop.f32.mrf.mxu2  ;;  %v4814_v39 = vpop.f32.mrf.mxu1 }
 0x19b   :  { %v4798_v31 = vpop.f32.mrf.mxu3 }
 0x19f   :  { %v4800_v6 = vpop.f32.mrf.mxu0 }
 0x1a0   :  { %6073 = vst [vmem:[#allocation22_spill] sm:$0xff] %v4800_v6 }
 0x1a2   :  { %2176 = vmatmul.f32.gmra.mxu0 %v1450_v9  ;;  %v4802_v15 = vpop.f32.mrf.mxu2  ;;  %v4824_v41 = vpop.f32.mrf.mxu1 }
 0x1a3   :  { %v4804_v55 = vpop.f32.mrf.mxu3 }
 0x1a7   :  { %v4808_v26 = vpop.f32.mrf.mxu0 }
 0x1a8   :  { %6074 = vst [vmem:[#allocation23_spill] sm:$0xff] %v4808_v26 }
 0x1aa   :  { %v4810_v2 = vpop.f32.mrf.mxu2  ;;  %v4835_v37 = vpop.f32.mrf.mxu1 }
 0x1ab   :  { %v4812_v60 = vpop.f32.mrf.mxu3  ;;  %6079 = vst [vmem:[#allocation28_spill] sm:$0xff] %v4835_v37 }
 0x1af   :  { %v4816_v59 = vpop.f32.mrf.mxu0 }
 0x1b2   :  { %v4818_v45 = vpop.f32.mrf.mxu2  ;;  %v4850_v52 = vpop.f32.mrf.mxu1 }
 0x1b3   :  { %v4820_v6 = vpop.f32.mrf.mxu3  ;;  %6084 = vst [vmem:[#allocation33_spill] sm:$0xff] %v4850_v52 }
 0x1b4   :  { %6075 = vst [vmem:[#allocation24_spill] sm:$0xff] %v4820_v6 }
 0x1b7   :  { %v4822_v9 = vpop.f32.mrf.mxu0 }
 0x1b8   :  { %6076 = vst [vmem:[#allocation25_spill] sm:$0xff] %v4822_v9 }
 0x1ba   :  { %v4826_v35 = vpop.f32.mrf.mxu2 }
 0x1bb   :  { %v4828_v42 = vpop.f32.mrf.mxu3 }
 0x1bc   :  { %6077 = vst [vmem:[#allocation26_spill] sm:$0xff] %v4828_v42 }
 0x1bf   :  { %v4833_v38 = vpop.f32.mrf.mxu0 }
 0x1c0   :  { %6078 = vst [vmem:[#allocation27_spill] sm:$0xff] %v4833_v38  ;;  %v2486_v38 = vld [vmem:[%s6047_s4 + $0x68] sm:$0xff] }
 0x1c1   :  { %2619 = vmatpush.msra.mxu1 %v2486_v38  ;;  %v2484_v38 = vld [vmem:[%s6047_s4 + $0x58] sm:$0xff] }
 0x1c2   :  { %v4837_v53 = vpop.f32.mrf.mxu2 }
 0x1c3   :  { %v4839_v30 = vpop.f32.mrf.mxu3  ;;  %2620 = vmatpush.msra.mxu1 %v2485_v50  ;;  %v2483_v50 = vld [vmem:[%s6047_s4 + $0x50] sm:$0xff] }
 0x1c4   :  { %6080 = vst [vmem:[#allocation29_spill] sm:$0xff] %v4839_v30 }
 0x1c5   :  { %2621 = vmatpush.msra.mxu1 %v2484_v38  ;;  %v2482_v38 = vld [vmem:[%s6047_s4 + $0x48] sm:$0xff] }
 0x1c7   :  { %v4844_v18 = vpop.f32.mrf.mxu0  ;;  %2622 = vmatpush.msra.mxu1 %v2483_v50  ;;  %v1873_v50 = vadd.f32 %v4671_v63, %v4663_v8  ;;  %v1882_v63 = vadd.f32 %v4692_v56, %v4682_v58  ;;  %v1708_v8 = vadd.f32 %v4497_v62, %v4515_v33  ;;  %v1888_v33 = vadd.f32 %v4707_v3, %v4698_v54  ;;  %v6098_v3 = vld [vmem:[#allocation3_spill] sm:$0xff] }
 0x1c8   :  { %6081 = vst [vmem:[#allocation30_spill] sm:$0xff] %v4844_v18  ;;  %v4864_v18 = vpop.f32.mrf.mxu1  ;;  %v1711_v54 = vadd.f32 %v4530_v23, %v4550_v17  ;;  %v6099_v17 = vld [vmem:[#allocation5_spill] sm:$0xff] }
 0x1c9   :  { %6088 = vst [vmem:[#allocation37_spill] sm:$0xff] %v4864_v18  ;;  %2623 = vmatpush.msra.mxu1 %v2482_v38  ;;  %v1773_v58 = vadd.f32 %v4741_v27, %v1708_v8  ;;  %v1947_v62 = vadd.f32 %v4793_v1, %v1882_v63 }
 0x1ca   :  { %v4846_v42 = vpop.f32.mrf.mxu2 }
 0x1cb   :  { %6082 = vst [vmem:[#allocation31_spill] sm:$0xff] %v4846_v42  ;;  %v4848_v6 = vpop.f32.mrf.mxu3 }
 0x1cc   :  { %6083 = vst [vmem:[#allocation32_spill] sm:$0xff] %v4848_v6 }
 0x1cf   :  { %v4855_v9 = vpop.f32.mrf.mxu0 }
 0x1d0   :  { %6085 = vst [vmem:[#allocation34_spill] sm:$0xff] %v4855_v9 }
 0x1d2   :  { %v4857_v30 = vpop.f32.mrf.mxu2 }
 0x1d3   :  { %6086 = vst [vmem:[#allocation35_spill] sm:$0xff] %v4857_v30  ;;  %v4859_v37 = vpop.f32.mrf.mxu3 }
 0x1d4   :  { %6087 = vst [vmem:[#allocation36_spill] sm:$0xff] %v4859_v37  ;;  %v4877_v37 = vpop.f32.mrf.mxu1 }
 0x1d7   :  { %v4866_v6 = vpop.f32.mrf.mxu0 }
 0x1d8   :  { %6089 = vst [vmem:[#allocation38_spill] sm:$0xff] %v4866_v6 }
 0x1da   :  { %v4868_v52 = vpop.f32.mrf.mxu2 }
 0x1db   :  { %6090 = vst [vmem:[#allocation39_spill] sm:$0xff] %v4868_v52  ;;  %v4873_v9 = vpop.f32.mrf.mxu3 }
 0x1dc   :  { %6091 = vst [vmem:[#allocation40_spill] sm:$0xff] %v4873_v9  ;;  %v4888_v18 = vpop.f32.mrf.mxu1 }
 0x1dd   :  { %6096 = vst [vmem:[#allocation45_spill] sm:$0xff] %v4888_v18 }
 0x1df   :  { %v4875_v30 = vpop.f32.mrf.mxu0 }
 0x1e0   :  { %6092 = vst [vmem:[#allocation41_spill] sm:$0xff] %v4875_v30  ;;  %v1876_v30 = vadd.f32 %v4677_v44, %v4669_v25  ;;  %v2481_v25 = vld [vmem:[%s6047_s4 + $0x40] sm:$0xff]  ;;  %v1705_v44 = vadd.f32 %v4477_v12, %v4492_v21 }
 0x1e1   :  { %2624 = vmatpush.msra.mxu1 %v2481_v25  ;;  %v6104_v25 = vld [vmem:[#allocation28_spill] sm:$0xff] }
 0x1e2   :  { %v4879_v42 = vpop.f32.mrf.mxu2  ;;  %v1941_v38 = vadd.f32 %v4771_v13, %v1876_v30  ;;  %v1885_v30 = vadd.f32 %v4700_v40, %v4690_v36  ;;  %v1770_v12 = vadd.f32 %v4732_v32, %v1705_v44  ;;  %v1891_v32 = vadd.f32 %v4719_v34, %v4705_v61  ;;  %v2480_v61 = vld [vmem:[%s6047_s4 + $0x38] sm:$0xff]  ;;  %v6105_v44 = vld [vmem:[#allocation25_spill] sm:$0xff] }
 0x1e3   :  { %6093 = vst [vmem:[#allocation42_spill] sm:$0xff] %v4879_v42  ;;  %v4886_v52 = vpop.f32.mrf.mxu3  ;;  %v1953_v34 = vadd.f32 %v4814_v39, %v1888_v33  ;;  %2625 = vmatpush.msra.mxu1 %v2480_v61  ;;  %v6102_v39 = vld [vmem:[#allocation6_spill] sm:$0xff] }
 0x1e4   :  { %6095 = vst [vmem:[#allocation44_spill] sm:$0xff] %v4886_v52  ;;  %v4910_v18 = vpop.f32.mrf.mxu1  ;;  %v1950_v40 = vadd.f32 %v4806_v49, %v1885_v30  ;;  %v1835_v27 = vadd.f32 %v4726_v57, %v1770_v12  ;;  %v1894_v57 = vadd.f32 %v4728_v4, %v4717_v10  ;;  %v6110_v30 = vld [vmem:[#allocation14_spill] sm:$0xff] }
 0x1e6   :  { %v2015_v23 = vadd.f32 %v4826_v35, %v1950_v40  ;;  %v1900_v10 = vadd.f32 %v4745_v14, %v1835_v27  ;;  %v2018_v35 = vadd.f32 %v4837_v53, %v1953_v34  ;;  %v6107_v53 = vld [vmem:[#allocation31_spill] sm:$0xff]  ;;  %v6118_v34 = vld [vmem:[#allocation29_spill] sm:$0xff] }
 0x1e7   :  { %v4884_v6 = vpop.f32.mrf.mxu0  ;;  %v6115_v27 = vld [vmem:[#allocation11_spill] sm:$0xff] }
 0x1e8   :  { %6094 = vst [vmem:[#allocation43_spill] sm:$0xff] %v4884_v6  ;;  %v1879_v6 = vadd.f32 %v4684_v0, %v4675_v5  ;;  %v2006_v5 = vadd.f32 %v4802_v15, %v1941_v38  ;;  %v6103_v38 = vld [vmem:[#allocation23_spill] sm:$0xff] }
 0x1ea   :  { %v4890_v26 = vpop.f32.mrf.mxu2  ;;  %v1944_v0 = vadd.f32 %v4784_v29, %v1879_v6  ;;  %v2071_v13 = vadd.f32 %v4798_v31, %v2006_v5  ;;  %v2012_v29 = vadd.f32 %v4818_v45, %v1947_v62  ;;  %v6109_v5 = vld [vmem:[#allocation10_spill] sm:$0xff]  ;;  %v6112_v62 = vld [vmem:[#allocation27_spill] sm:$0xff] }
 0x1eb   :  { %6097 = vst [vmem:[#allocation46_spill] sm:$0xff] %v4890_v26  ;;  %v4899_v42 = vpop.f32.mrf.mxu3  ;;  %v1702_v26 = vadd.f32 %v4457_v7, %v4474_v11  ;;  %v1938_v7 = vadd.f32 %v4761_v48, %v1873_v50 }
 0x1ec   :  { %v4965_v15 = vpop.f32.mrf.mxu1  ;;  %v4968_v49 = vadd.f32 %v4816_v59, %v2071_v13  ;;  %v2077_v4 = vadd.f32 %v4812_v60, %v2012_v29  ;;  %v6106_v60 = vld [vmem:[#allocation24_spill] sm:$0xff]  ;;  %v6114_v13 = vld [vmem:[#allocation35_spill] sm:$0xff] }
 0x1ed   :  { %v1767_v11 = vadd.f32 %v4724_v22, %v1702_v26  ;;  %v2003_v56 = vadd.f32 %v4796_v24, %v1938_v7  ;;  %v2009_v22 = vadd.f32 %v4810_v2, %v1944_v0  ;;  %v1838_v24 = vadd.f32 %v4734_v46, %v1773_v58  ;;  %v6101_v2 = vld [vmem:[#allocation7_spill] sm:$0xff]  ;;  %v6108_v7 = vld [vmem:[#allocation33_spill] sm:$0xff] }
 0x1ee   :  { %v1956_v26 = vadd.f32 %v4824_v41, %v1891_v32  ;;  %v1959_v41 = vadd.f32 %v6104_v25, %v1894_v57  ;;  %v2080_v63 = vadd.f32 %v6106_v60, %v2015_v23  ;;  %v6111_v58 = vld [vmem:[#allocation37_spill] sm:$0xff]  ;;  %v4996_v33 = vadd.f32 %v6112_v62, %v2077_v4  ;;  %v6122_v4 = vld [vmem:[#allocation34_spill] sm:$0xff]  ;;  %v6132_v62 = vld [vmem:[#allocation19_spill] sm:$0xff] }
 0x1ef   :  { %v4895_v9 = vpop.f32.mrf.mxu0  ;;  %v1832_v48 = vadd.f32 %v4715_v51, %v1767_v11  ;;  %v1714_v51 = vadd.f32 %v6098_v3, %v4593_v16  ;;  %v2068_v31 = vadd.f32 %v4789_v28, %v2003_v56  ;;  %v2074_v45 = vadd.f32 %v4804_v55, %v2009_v22  ;;  %v6100_v16 = vld [vmem:[#allocation4_spill] sm:$0xff]  ;;  %v6113_v22 = vld [vmem:[#allocation26_spill] sm:$0xff] }
 0x1f0   :  { %v1717_v6 = vadd.f32 %v6100_v16, %v6099_v17  ;;  %v1776_v28 = vadd.f32 %v4750_v20, %v1711_v54  ;;  %v1903_v20 = vadd.f32 %v4754_v47, %v1838_v24  ;;  %v2021_v8 = vadd.f32 %v6107_v53, %v1956_v26  ;;  %v6116_v54 = vld [vmem:[#allocation17_spill] sm:$0xff]  ;;  %v6128_v53 = vld [vmem:[#allocation20_spill] sm:$0xff] }
 0x1f1   :  { %v1897_v46 = vadd.f32 %v4736_v19, %v1832_v48  ;;  %v1720_v19 = vadd.f32 %v6102_v39, %v6101_v2  ;;  %v1779_v50 = vadd.f32 %v4757_v43, %v1714_v51  ;;  %v4981_v59 = vadd.f32 %v6103_v38, %v2068_v31  ;;  %v6117_v31 = vld [vmem:[#allocation30_spill] sm:$0xff]  ;;  %v6123_v2 = vld [vmem:[#allocation32_spill] sm:$0xff] }
 0x1f2   :  { %v4903_v52 = vpop.f32.mrf.mxu2  ;;  %v4985_v14 = vadd.f32 %v6105_v44, %v2074_v45  ;;  %v1841_v0 = vadd.f32 %v6109_v5, %v1776_v28  ;;  %v1782_v47 = vadd.f32 %v6110_v30, %v1717_v6  ;;  %v2203_v43 = vmul.f32 %v4968_v49, %v4968_v49  ;;  %v6119_v45 = vld [vmem:[#allocation39_spill] sm:$0xff]  ;;  %v6121_v6 = vld [vmem:[#allocation12_spill] sm:$0xff] }
 0x1f3   :  { %v4945_v1 = vpop.f32.mrf.mxu3  ;;  %v1962_v11 = vadd.f32 %v6108_v7, %v1897_v46  ;;  %v1965_v56 = vadd.f32 %v6111_v58, %v1900_v10  ;;  %v2083_v48 = vadd.f32 %v6113_v22, %v2018_v35  ;;  %v2024_v40 = vadd.f32 %v6114_v13, %v1959_v41  ;;  %v6125_v38 = vld [vmem:[#allocation16_spill] sm:$0xff]  ;;  %v6126_v41 = vld [vmem:[#allocation15_spill] sm:$0xff]  ;;  %v6131_v58 = vld [vmem:[#allocation45_spill] sm:$0xff] }
 0x1f4   :  { %v1968_v32 = vadd.f32 %v4877_v37, %v1903_v20  ;;  %v1844_v29 = vadd.f32 %v6115_v27, %v1779_v50  ;;  %v1785_v3 = vadd.f32 %v6116_v54, %v1720_v19  ;;  %v2202_v51 = vmul.f32 %v4981_v59, %v4981_v59  ;;  %v6120_v37 = vld [vmem:[#allocation13_spill] sm:$0xff]  ;;  %v6124_v19 = vld [vmem:[#allocation42_spill] sm:$0xff]  ;;  %v1979_v60 = vpop.f32.mrf.mxu1 }
 0x1f5   :  { %v2204_v24 = vmul.f32 %v4985_v14, %v4985_v14  ;;  %v5008_v61 = vadd.f32 %v6117_v31, %v2080_v63  ;;  %v2086_v57 = vadd.f32 %v6118_v34, %v2021_v8  ;;  %v2027_v23 = vadd.f32 %v6119_v45, %v1962_v11  ;;  %v6127_v63 = vld [vmem:[#allocation8_spill] sm:$0xff]  ;;  %v6133_v13 = vld [vmem:[#allocation46_spill] sm:$0xff]  ;;  %v6134_v54 = vld [vmem:[#allocation41_spill] sm:$0xff] }
 0x1f6   :  { %v1906_v16 = vadd.f32 %v6120_v37, %v1841_v0  ;;  %v1847_v46 = vadd.f32 %v6121_v6, %v1782_v47  ;;  %v2180_v28 = vadd.f32 %v4968_v49, %v4981_v59  ;;  %v2218_v26 = vadd.f32 %v2203_v43, %v2202_v51  ;;  %v6129_v0 = vld [vmem:[#allocation38_spill] sm:$0xff]  ;;  %v6130_v47 = vld [vmem:[#allocation36_spill] sm:$0xff] }
 0x1f7   :  { %v4928_v21 = vpop.f32.mrf.mxu0  ;;  %v2205_v10 = vmul.f32 %v4996_v33, %v4996_v33  ;;  %v5021_v35 = vadd.f32 %v6122_v4, %v2083_v48  ;;  %v2089_v39 = vadd.f32 %v6123_v2, %v2024_v40  ;;  %v2030_v20 = vadd.f32 %v6124_v19, %v1965_v56  ;;  %v6135_v51 = vld [vmem:[#allocation40_spill] sm:$0xff] }
 0x1f8   :  { %v1909_v25 = vadd.f32 %v6125_v38, %v1844_v29  ;;  %v1850_v44 = vadd.f32 %v6126_v41, %v1785_v3  ;;  %v1788_v8 = vadd.f32 %v6128_v53, %v6127_v63  ;;  %v2181_v7 = vadd.f32 %v2180_v28, %v4985_v14  ;;  %v6138_v28 = vld [vmem:[#allocation43_spill] sm:$0xff]  ;;  %v2504_v53 = vld [vmem:[%s6047_s4 + $0xf8] sm:$0xff] }
 0x1f9   :  { %v2219_v11 = vadd.f32 %v2218_v26, %v2204_v24  ;;  %v2206_v5 = vmul.f32 %v5008_v61, %v5008_v61  ;;  %v5035_v30 = vadd.f32 %v6129_v0, %v2086_v57  ;;  %v2092_v43 = vadd.f32 %v6130_v47, %v2027_v23  ;;  %v6136_v57 = vld [vmem:[#allocation21_spill] sm:$0xff]  ;;  %2682 = vmatpush.msrb.mxu2 %v2504_v53 }
 0x1fa   :  { %v4938_v36 = vpop.f32.mrf.mxu2  ;;  %v1971_v56 = vadd.f32 %v6131_v58, %v1906_v16  ;;  %v1912_v22 = vadd.f32 %v6132_v62, %v1847_v46  ;;  %v2182_v48 = vadd.f32 %v2181_v7, %v4996_v33  ;;  %v2033_v40 = vadd.f32 %v6133_v13, %v1968_v32  ;;  %v6137_v16 = vld [vmem:[#allocation18_spill] sm:$0xff]  ;;  %v2503_v0 = vld [vmem:[%s6047_s4 + $0xf0] sm:$0xff]  ;;  %v2502_v62 = vld [vmem:[%s6047_s4 + $0xe8] sm:$0xff] }
 0x1fb   :  { %v5012_v17 = vpop.f32.mrf.mxu3  ;;  %v2220_v27 = vadd.f32 %v2219_v11, %v2205_v10  ;;  %v2207_v29 = vmul.f32 %v5021_v35, %v5021_v35  ;;  %v5045_v3 = vadd.f32 %v6134_v54, %v2089_v39  ;;  %v2095_v24 = vadd.f32 %v6135_v51, %v2030_v20  ;;  %2683 = vmatpush.msrb.mxu2 %v2503_v0  ;;  %v2501_v54 = vld [vmem:[%s6047_s4 + $0xe0] sm:$0xff] }
 0x1fc   :  { %v1974_v34 = vadd.f32 %v4910_v18, %v1909_v25  ;;  %v1915_v45 = vadd.f32 %v6136_v57, %v1850_v44  ;;  %v2183_v23 = vadd.f32 %v2182_v48, %v5008_v61  ;;  %v2036_v37 = vadd.f32 %v4903_v52, %v1971_v56  ;;  %v6139_v18 = vld [vmem:[#allocation44_spill] sm:$0xff]  ;;  %v2513_v0 = vld [vmem:[%s6047_s4 + $0x140] sm:$0xff] }
 0x1fd   :  { %v1853_v32 = vadd.f32 %v6137_v16, %v1788_v8  ;;  %v2221_v6 = vadd.f32 %v2220_v27, %v2206_v5  ;;  %v2208_v46 = vmul.f32 %v5035_v30, %v5035_v30  ;;  %v5056_v26 = vadd.f32 %v6138_v28, %v2092_v43  ;;  %2684 = vmatpush.msrb.mxu2 %v2502_v62  ;;  %v2517_v28 = vld [vmem:[%s6047_s4 + $0x160] sm:$0xff]  ;;  %v2534_v62 = vld [vmem:[%s6047_s4 + $0x1e8] sm:$0xff] }
 0x1fe   :  { %v1977_v10 = vadd.f32 %v4965_v15, %v1912_v22  ;;  %v2184_v4 = vadd.f32 %v2183_v23, %v5021_v35  ;;  %v2098_v2 = vadd.f32 %v6139_v18, %v2033_v40  ;;  %v2039_v39 = vadd.f32 %v4938_v36, %v1974_v34  ;;  %v6140_v36 = vld [vmem:[#allocation22_spill] sm:$0xff] }
 0x1ff   :  { %v4974_v55 = vpop.f32.mrf.mxu0  ;;  %v2222_v19 = vadd.f32 %v2221_v6, %v2207_v29  ;;  %v2209_v52 = vmul.f32 %v5045_v3, %v5045_v3  ;;  %v5065_v20 = vadd.f32 %v4895_v9, %v2095_v24  ;;  %v1980_v41 = vadd.f32 %v1979_v60, %v1915_v45  ;;  %v1982_v9 = vpop.f32.mrf.mxu1  ;;  %v2519_v29 = vld [vmem:[%s6047_s4 + $0x170] sm:$0xff]  ;;  %2685 = vmatpush.msrb.mxu2 %v2501_v54  ;;  %v2518_v45 = vld [vmem:[%s6047_s4 + $0x168] sm:$0xff]  ;;  %v2500_v23 = vld [vmem:[%s6047_s4 + $0xd8] sm:$0xff] }
 0x200   :  { %v2185_v44 = vadd.f32 %v2184_v4, %v5035_v30  ;;  %v2101_v15 = vadd.f32 %v4899_v42, %v2036_v37  ;;  %v1918_v8 = vadd.f32 %v6140_v36, %v1853_v32  ;;  %v2210_v11 = vmul.f32 %v5056_v26, %v5056_v26 }
 0x201   :  { %v2223_v7 = vadd.f32 %v2222_v19, %v2208_v46  ;;  %v5077_v60 = vadd.f32 %v4928_v21, %v2098_v2  ;;  %v2104_v42 = vadd.f32 %v4945_v1, %v2039_v39  ;;  %v2211_v43 = vmul.f32 %v5065_v20, %v5065_v20  ;;  %v2520_v1 = vld [vmem:[%s6047_s4 + $0x178] sm:$0xff]  ;;  %2686 = vmatpush.msrb.mxu2 %v2500_v23  ;;  %v2509_v23 = vld [vmem:[%s6047_s4 + $0x120] sm:$0xff] }
 0x202   :  { %v2041_v12 = vpop.f32.mrf.mxu2  ;;  %v2186_v5 = vadd.f32 %v2185_v44, %v5045_v3  ;;  %v5087_v56 = vadd.f32 %v4974_v55, %v2101_v15  ;;  %v1983_v22 = vadd.f32 %v1982_v9, %v1918_v8  ;;  %2747 = vmatpush.msrb.mxu3 %v2520_v1  ;;  %v2516_v19 = vld [vmem:[%s6047_s4 + $0x158] sm:$0xff]  ;;  %v2515_v44 = vld [vmem:[%s6047_s4 + $0x150] sm:$0xff]  ;;  %v2497_v15 = vld [vmem:[%s6047_s4 + $0xc0] sm:$0xff] }
 0x203   :  { %v2109_v25 = vpop.f32.mrf.mxu3  ;;  %v2042_v63 = vadd.f32 %v2041_v12, %v1977_v10  ;;  %v2224_v47 = vadd.f32 %v2223_v7, %v2209_v52  ;;  %v2212_v55 = vmul.f32 %v5077_v60, %v5077_v60  ;;  %v2499_v10 = vld [vmem:[%s6047_s4 + $0xd0] sm:$0xff]  ;;  %v2498_v52 = vld [vmem:[%s6047_s4 + $0xc8] sm:$0xff]  ;;  %v2496_v9 = vld [vmem:[%s6047_s4 + $0xb8] sm:$0xff] }
 0x204   :  { %v2187_v58 = vadd.f32 %v2186_v5, %v5056_v26  ;;  %2748 = vmatpush.msrb.mxu3 %v2519_v29  ;;  %v2213_v34 = vmul.f32 %v5087_v56, %v5087_v56  ;;  %2687 = vmatpush.msrb.mxu2 %v2499_v10  ;;  %v2514_v7 = vld [vmem:[%s6047_s4 + $0x148] sm:$0xff]  ;;  %v2512_v1 = vld [vmem:[%s6047_s4 + $0x138] sm:$0xff] }
 0x205   :  { %v2107_v21 = vadd.f32 %v5012_v17, %v2042_v63  ;;  %v2225_v48 = vadd.f32 %v2224_v47, %v2210_v11  ;;  %v2536_v11 = vld [vmem:[%s6047_s4 + $0x1f8] sm:$0xff]  ;;  %v2535_v47 = vld [vmem:[%s6047_s4 + $0x1f0] sm:$0xff] }
 0x206   :  { %v2188_v40 = vadd.f32 %v2187_v58, %v5065_v20  ;;  %2749 = vmatpush.msrb.mxu3 %v2518_v45  ;;  %2688 = vmatpush.msrb.mxu2 %v2498_v52  ;;  %v2479_v45 = vld [vmem:[%s6047_s4 + $0x30] sm:$0xff]  ;;  %v2508_v10 = vld [vmem:[%s6047_s4 + $0x118] sm:$0xff] }
 0x207   :  { %v5025_v50 = vpop.f32.mrf.mxu0  ;;  %v2226_v51 = vadd.f32 %v2225_v48, %v2211_v43  ;;  %2812 = vmatpush.msrb.mxu0 %v2536_v11  ;;  %v2495_v43 = vld [vmem:[%s6047_s4 + $0xb0] sm:$0xff]  ;;  %2626 = vmatpush.msra.mxu1 %v2479_v45 }
 0x208   :  { %v5100_v17 = vadd.f32 %v5025_v50, %v2104_v42  ;;  %2750 = vmatpush.msrb.mxu3 %v2517_v28  ;;  %2689 = vmatpush.msrb.mxu2 %v2497_v15  ;;  %v2478_v28 = vld [vmem:[%s6047_s4 + $0x28] sm:$0xff]  ;;  %v2507_v52 = vld [vmem:[%s6047_s4 + $0x110] sm:$0xff] }
 0x209   :  { %v2227_v16 = vadd.f32 %v2226_v51, %v2212_v55  ;;  %2813 = vmatpush.msrb.mxu0 %v2535_v47  ;;  %v2533_v55 = vld [vmem:[%s6047_s4 + $0x1e0] sm:$0xff]  ;;  %v2510_v51 = vld [vmem:[%s6047_s4 + $0x128] sm:$0xff]  ;;  %2627 = vmatpush.msra.mxu1 %v2478_v28 }
 0x20a   :  { %v2044_v31 = vpop.f32.mrf.mxu2  ;;  %v2214_v6 = vmul.f32 %v5100_v17, %v5100_v17  ;;  %2751 = vmatpush.msrb.mxu3 %v2516_v19  ;;  %2690 = vmatpush.msrb.mxu2 %v2496_v9  ;;  %v2477_v19 = vld [vmem:[%s6047_s4 + $0x20] sm:$0xff]  ;;  %v2475_v9 = vld [vmem:[%s6047_s4 + $0x10] sm:$0xff]  ;;  %v2474_v47 = vld [vmem:[%s6047_s4 + $0x8] sm:$0xff] }
 0x20b   :  { %v2045_v12 = vadd.f32 %v2044_v31, %v1980_v41  ;;  %v2189_v31 = vadd.f32 %v2188_v40, %v5077_v60  ;;  %v2112_v37 = vpop.f32.mrf.mxu3  ;;  %v2228_v4 = vadd.f32 %v2227_v16, %v2213_v34  ;;  %2814 = vmatpush.msrb.mxu0 %v2534_v62  ;;  %v2511_v40 = vld [vmem:[%s6047_s4 + $0x130] sm:$0xff]  ;;  %2628 = vmatpush.msra.mxu1 %v2477_v19 }
 0x20c   :  { %2752 = vmatpush.msrb.mxu3 %v2515_v44  ;;  %2691 = vmatpush.msrb.mxu2 %v2495_v43  ;;  %v2491_v16 = vld [vmem:[%s6047_s4 + $0x90] sm:$0xff]  ;;  %v2526_v43 = vld [vmem:[%s6047_s4 + $0x1a8] sm:$0xff] }
 0x20d   :  { %v2110_v27 = vadd.f32 %v2109_v25, %v2045_v12  ;;  %v2190_v32 = vadd.f32 %v2189_v31, %v5087_v56  ;;  %2815 = vmatpush.msrb.mxu0 %v2533_v55  ;;  %v2492_v31 = vld [vmem:[%s6047_s4 + $0x98] sm:$0xff]  ;;  %v2522_v55 = vld [vmem:[%s6047_s4 + $0x188] sm:$0xff] }
 0x20e   :  { %2753 = vmatpush.msrb.mxu3 %v2514_v7 }
 0x20f   :  { %v2171_v38 = vpop.f32.mrf.mxu0  ;;  %v2191_v18 = vadd.f32 %v2190_v32, %v5100_v17 }
 0x210   :  { %v5111_v50 = vadd.f32 %v2171_v38, %v2107_v21  ;;  %v2229_v38 = vadd.f32 %v2228_v4, %v2214_v6  ;;  %2754 = vmatpush.msrb.mxu3 %v2513_v0  ;;  %v2530_v4 = vld [vmem:[%s6047_s4 + $0x1c8] sm:$0xff] }
 0x212   :  { %v2047_v13 = vpop.f32.mrf.mxu2  ;;  %v2215_v2 = vmul.f32 %v5111_v50, %v5111_v50  ;;  %v2192_v25 = vadd.f32 %v2191_v18, %v5111_v50  ;;  %2755 = vmatpush.msrb.mxu3 %v2512_v1  ;;  %v2490_v18 = vld [vmem:[%s6047_s4 + $0x88] sm:$0xff]  ;;  %v2525_v1 = vld [vmem:[%s6047_s4 + $0x1a0] sm:$0xff] }
 0x213   :  { %v2048_v57 = vadd.f32 %v2047_v13, %v1983_v22  ;;  %v2494_v22 = vld [vmem:[%s6047_s4 + $0xa8] sm:$0xff] }
 0x214   :  { %v2230_v53 = vadd.f32 %v2229_v38, %v2215_v2  ;;  %2692 = vmatpush.msrb.mxu2 %v2494_v22  ;;  %2756 = vmatpush.msrb.mxu3 %v2511_v40  ;;  %v2529_v38 = vld [vmem:[%s6047_s4 + $0x1c0] sm:$0xff]  ;;  %v6141_v22 = vld [vmem:[#allocation9_spill] sm:$0xff] }
 0x215   :  { %v2113_v39 = vadd.f32 %v2112_v37, %v2048_v57  ;;  %v2531_v37 = vld [vmem:[%s6047_s4 + $0x1d0] sm:$0xff] }
 0x216   :  { %2757 = vmatpush.msrb.mxu3 %v2510_v51  ;;  %v2523_v40 = vld [vmem:[%s6047_s4 + $0x190] sm:$0xff] }
 0x217   :  { %v2174_v24 = vpop.f32.mrf.mxu0  ;;  %v2551_v51 = vld [vmem:[%s6047_s4 + $0x270] sm:$0xff] }
 0x218   :  { %v5122_v46 = vadd.f32 %v2174_v24, %v2110_v27  ;;  %v2493_v27 = vld [vmem:[%s6047_s4 + $0xa0] sm:$0xff]  ;;  %v2532_v24 = vld [vmem:[%s6047_s4 + $0x1d8] sm:$0xff]  ;;  %2758 = vmatpush.msrb.mxu3 %v2509_v23  ;;  %v2550_v23 = vld [vmem:[%s6047_s4 + $0x268] sm:$0xff] }
 0x219   :  { %2693 = vmatpush.msrb.mxu2 %v2493_v27  ;;  %2816 = vmatpush.msrb.mxu0 %v2532_v24  ;;  %v2521_v27 = vld [vmem:[%s6047_s4 + $0x180] sm:$0xff] }
 0x21a   :  { %v2216_v41 = vmul.f32 %v5122_v46, %v5122_v46  ;;  %v2193_v36 = vadd.f32 %v2192_v25, %v5122_v46  ;;  %2759 = vmatpush.msrb.mxu3 %v2508_v10  ;;  %v2489_v25 = vld [vmem:[%s6047_s4 + $0x80] sm:$0xff] }
 0x21b   :  { %2694 = vmatpush.msrb.mxu2 %v2492_v31  ;;  %2817 = vmatpush.msrb.mxu0 %v2531_v37 }
 0x21c   :  { %v2231_v5 = vadd.f32 %v2230_v53, %v2216_v41  ;;  %2760 = vmatpush.msrb.mxu3 %v2507_v52  ;;  %v2345_v41 = vld [vmem:[#allocation2 + $0x1] sm:$0xff] }
 0x21d   :  { %2695 = vmatpush.msrb.mxu2 %v2491_v16  ;;  %2818 = vmatpush.msrb.mxu0 %v2530_v4  ;;  %v2506_v53 = vld [vmem:[%s6047_s4 + $0x108] sm:$0xff]  ;;  %v2549_v52 = vld [vmem:[%s6047_s4 + $0x260] sm:$0xff] }
 0x21e   :  { %2761 = vmatpush.msrb.mxu3 %v2506_v53 }
 0x21f   :  { %v2177_v63 = vpop.f32.mrf.mxu0  ;;  %2696 = vmatpush.msrb.mxu2 %v2490_v18  ;;  %2819 = vmatpush.msrb.mxu0 %v2529_v38 }
 0x220   :  { %v5149_v8 = vadd.f32 %v2177_v63, %v2113_v39  ;;  %v2476_v63 = vld [vmem:[%s6047_s4 + $0x18] sm:$0xff] }
 0x221   :  { %2697 = vmatpush.msrb.mxu2 %v2489_v25  ;;  %2629 = vmatpush.msra.mxu1 %v2476_v63 }
 0x222   :  { %v2194_v42 = vadd.f32 %v2193_v36, %v5149_v8  ;;  %v2217_v12 = vmul.f32 %v5149_v8, %v5149_v8  ;;  %v2528_v36 = vld [vmem:[%s6047_s4 + $0x1b8] sm:$0xff]  ;;  %2698 = vmatmul.f32.vlgmr.msrb.gmra.mxu2 %v2345_v41 }
 0x223   :  { %2820 = vmatpush.msrb.mxu0 %v2528_v36  ;;  %2630 = vmatpush.msra.mxu1 %v2475_v9 }
 0x224   :  { %v2195_v58 = vrot.slane %v2194_v42, 4  ;;  %v2232_v21 = vadd.f32 %v2231_v5, %v2217_v12  ;;  %v2505_v5 = vld [vmem:[%s6047_s4 + $0x100] sm:$0xff] }
 0x225   :  { %2762 = vmatpush.msrb.mxu3 %v2505_v5  ;;  %v2361_v12 = vld [vmem:[#allocation2 + $0x2] sm:$0xff]  ;;  %2631 = vmatpush.msra.mxu1 %v2474_v47 }
 0x226   :  { %v2196_v48 = vadd.f32 %v2195_v58, %v2194_v42  ;;  %v2233_v13 = vrot.slane %v2232_v21, 4  ;;  %v2527_v42 = vld [vmem:[%s6047_s4 + $0x1b0] sm:$0xff]  ;;  %2763 = vmatmul.f32.vlgmr.msrb.gmra.mxu3 %v2361_v12 }
 0x227   :  { %2821 = vmatpush.msrb.mxu0 %v2527_v42 }
 0x228   :  { %v2197_v29 = vrot.slane %v2196_v48, 2  ;;  %v2234_v54 = vadd.f32 %v2233_v13, %v2232_v21  ;;  %v2473_v21 = vld [vmem:[%s6047_s4] sm:$0xff]  ;;  %v2524_v13 = vld [vmem:[%s6047_s4 + $0x198] sm:$0xff] }
 0x229   :  { %2822 = vmatpush.msrb.mxu0 %v2526_v43  ;;  %2632 = vmatpush.msra.mxu1 %v2473_v21 }
 0x22a   :  { %v2198_v34 = vadd.f32 %v2197_v29, %v2196_v48  ;;  %v2235_v57 = vrot.slane %v2234_v54, 2  ;;  %2633 = vmatmul.f32.vlgmr.msra.gmra.mxu1 %v6141_v22  ;;  %v2552_v48 = vld [vmem:[%s6047_s4 + $0x278] sm:$0xff] }
 0x22b   :  { %2823 = vmatpush.msrb.mxu0 %v2525_v1  ;;  %2877 = vmatpush.msrb.mxu1 %v2552_v48 }
 0x22c   :  { %v2199_v32 = vrot.slane %v2198_v34, 1  ;;  %v2236_v6 = vadd.f32 %v2235_v57, %v2234_v54  ;;  %v2243_v57 = vld [vmem:[%s6048_s2] sm:$0x1] }
 0x22d   :  { %2824 = vmatpush.msrb.mxu0 %v2524_v13  ;;  %2878 = vmatpush.msrb.mxu1 %v2551_v51  ;;  %v2547_v51 = vld [vmem:[%s6047_s4 + $0x250] sm:$0xff] }
 0x22e   :  { %v2200_v2 = vadd.f32 %v2199_v32, %v2198_v34  ;;  %v2237_v39 = vrot.slane %v2236_v6, 1  ;;  %v2256_v32 = vld [vmem:[%s6049_s3] sm:$0x1] }
 0x22f   :  { %2825 = vmatpush.msrb.mxu0 %v2523_v40  ;;  %2879 = vmatpush.msrb.mxu1 %v2550_v23 }
 0x230   :  { %v5235_v44 = vmul.f32 0.0078125, %v2200_v2  ;;  %v2238_v15 = vadd.f32 %v2237_v39, %v2236_v6 }
 0x231   :  { %2826 = vmatpush.msrb.mxu0 %v2522_v55  ;;  %2880 = vmatpush.msrb.mxu1 %v2549_v52  ;;  %v2353_v52 = vld [vmem:[#allocation2 + $0xa1] sm:$0xff] }
 0x232   :  { %v2239_v7 = vmul.f32 0.0078125, %v2238_v15  ;;  %v2240_v11 = vmul.f32 %v5235_v44, %v5235_v44 }
 0x233   :  { %2827 = vmatpush.msrb.mxu0 %v2521_v27 }
 0x234   :  { %v2241_v0 = vsub.f32 %v2239_v7, %v2240_v11 }
 0x236   :  { %v2242_v58 = vmax.f32 %v2241_v0, 0.0 }
 0x238   :  { %v2244_v62 = vadd.f32 1e-05, %v2242_v58 }
 0x23a   :  { %3516 = vrsqrt.f32 %v2244_v62  ;;  %vm2251_vm8 = vweird.f32 %v2244_v62 }
 0x240   :  { %v3517_v29 = vpop.eup %3516 }
 0x241   :  { %v2246_v54 = vmul.f32 %v3517_v29, %v2244_v62  ;;  %vm2252_vm7 = vweird.f32 %v3517_v29 }
 0x242   :  { %vm2253_vm9 = vmor %vm2251_vm8, %vm2252_vm7 }
 0x243   :  { %v2247_v24 = vmul.f32 %v3517_v29, %v2246_v54 }
 0x245   :  { %v2248_v31 = vmul.f32 0.5, %v2247_v24 }
 0x247   :  { %v2249_v34 = vsub.f32 1.5, %v2248_v31 }
 0x249   :  { %v2250_v45 = vmul.f32 %v3517_v29, %v2249_v34 }
 0x24b   :  { %v2254_v37 = vsel %vm2253_vm9, %v3517_v29, %v2250_v45  ;;  %v2546_v45 = vld [vmem:[%s6047_s4 + $0x248] sm:$0xff] }
 0x24c   :  { %v2255_v16 = vmul.f32 %v2254_v37, %v2243_v57 }
 0x24e   :  { %v2257_v6 = vmul.f32 %v2255_v16, %v5235_v44  ;;  %v2260_v28 = vperm.slane %v2255_v16, 0  ;;  %v2545_v16 = vld [vmem:[%s6047_s4 + $0x240] sm:$0xff] }
 0x250   :  { %v2258_v10 = vsub.f32 %v2256_v32, %v2257_v6  ;;  %v2277_v4 = vmul.f32 %v2260_v28, %v5149_v8  ;;  %v2262_v2 = vmul.f32 %v2260_v28, %v4981_v59  ;;  %v2263_v39 = vmul.f32 %v2260_v28, %v4968_v49 }
 0x251   :  { %v2264_v19 = vmul.f32 %v2260_v28, %v4985_v14  ;;  %v2265_v38 = vmul.f32 %v2260_v28, %v4996_v33  ;;  %v2266_v25 = vmul.f32 %v2260_v28, %v5008_v61  ;;  %v2267_v41 = vmul.f32 %v2260_v28, %v5021_v35 }
 0x252   :  { %v2279_v18 = vperm.slane %v2258_v10, 0  ;;  %v2268_v49 = vmul.f32 %v2260_v28, %v5035_v30  ;;  %v2269_v14 = vmul.f32 %v2260_v28, %v5045_v3  ;;  %v2270_v35 = vmul.f32 %v2260_v28, %v5056_v26  ;;  %v2548_v26 = vld [vmem:[%s6047_s4 + $0x258] sm:$0xff] }
 0x253   :  { %v2271_v30 = vmul.f32 %v2260_v28, %v5065_v20  ;;  %v2272_v0 = vmul.f32 %v2260_v28, %v5077_v60  ;;  %v2273_v58 = vmul.f32 %v2260_v28, %v5087_v56  ;;  %v2276_v20 = vmul.f32 %v2260_v28, %v5122_v46  ;;  %2881 = vmatpush.msrb.mxu1 %v2548_v26  ;;  %v2580_v26 = vld [vmem:[%s6047_s4 + $0x358] sm:$0xff] }
 0x254   :  { %v2296_v44 = vadd.f32 %v2279_v18, %v2277_v4  ;;  %v2281_v8 = vadd.f32 %v2279_v18, %v2262_v2  ;;  %v2282_v15 = vadd.f32 %v2279_v18, %v2263_v39  ;;  %v2283_v63 = vadd.f32 %v2279_v18, %v2264_v19  ;;  %v2542_v19 = vld [vmem:[%s6047_s4 + $0x228] sm:$0xff] }
 0x255   :  { %v2284_v59 = vadd.f32 %v2279_v18, %v2265_v38  ;;  %v2285_v53 = vadd.f32 %v2279_v18, %v2266_v25  ;;  %v2286_v33 = vadd.f32 %v2279_v18, %v2267_v41  ;;  %v2287_v61 = vadd.f32 %v2279_v18, %v2268_v49  ;;  %2882 = vmatpush.msrb.mxu1 %v2547_v51  ;;  %v2541_v41 = vld [vmem:[%s6047_s4 + $0x220] sm:$0xff]  ;;  %v2567_v49 = vld [vmem:[%s6047_s4 + $0x2f0] sm:$0xff] }
 0x256   :  { %v2312_v36 = vmax.f32 %v2296_v44, 0.0  ;;  %v5310_v7 = vmax.f32 %v2281_v8, 0.0  ;;  %v5312_v11 = vmax.f32 %v2282_v15, 0.0  ;;  %v5314_v9 = vmax.f32 %v2283_v63, 0.0  ;;  %v2369_v44 = vld [vmem:[#allocation2 + $0xa2] sm:$0xff]  ;;  %v2540_v63 = vld [vmem:[%s6047_s4 + $0x218] sm:$0xff] }
 0x257   :  { %v5318_v5 = vmax.f32 %v2284_v59, 0.0  ;;  %v2288_v42 = vadd.f32 %v2279_v18, %v2269_v14  ;;  %v5322_v3 = vmax.f32 %v2285_v53, 0.0  ;;  %v2289_v12 = vadd.f32 %v2279_v18, %v2270_v35  ;;  %2883 = vmatpush.msrb.mxu1 %v2546_v45  ;;  %v5439_v8 = vld [vmem:[#allocation2 + $0xa0] sm:$0xff]  ;;  %v2568_v59 = vld [vmem:[%s6047_s4 + $0x2f8] sm:$0xff]  ;;  %v2583_v14 = vld [vmem:[%s6047_s4 + $0x370] sm:$0xff] }
 0x258   :  { %2328 = vst [vmem:[#allocation2 + $0x121] sm:$0xff] %v2312_v36  ;;  %2701 = vmatmul.f32.gmra.mxu2 %v5310_v7  ;;  %v5329_v47 = vmax.f32 %v2286_v33, 0.0  ;;  %v2290_v43 = vadd.f32 %v2279_v18, %v2271_v30  ;;  %v5334_v21 = vmax.f32 %v2287_v61, 0.0  ;;  %v2291_v1 = vadd.f32 %v2279_v18, %v2272_v0  ;;  %v2584_v53 = vld [vmem:[%s6047_s4 + $0x378] sm:$0xff]  ;;  %v2566_v36 = vld [vmem:[%s6047_s4 + $0x2e8] sm:$0xff]  ;;  %v2565_v61 = vld [vmem:[%s6047_s4 + $0x2e0] sm:$0xff] }
 0x259   :  { %2313 = vst [vmem:[#allocation2 + $0x11] sm:$0xff] %v5310_v7  ;;  %v2274_v60 = vmul.f32 %v2260_v28, %v5100_v17  ;;  %v5338_v62 = vmax.f32 %v2288_v42, 0.0  ;;  %v2292_v22 = vadd.f32 %v2279_v18, %v2273_v58  ;;  %v2275_v48 = vmul.f32 %v2260_v28, %v5111_v50  ;;  %2884 = vmatpush.msrb.mxu1 %v2545_v16  ;;  %v2544_v28 = vld [vmem:[%s6047_s4 + $0x238] sm:$0xff]  ;;  %v2582_v33 = vld [vmem:[%s6047_s4 + $0x368] sm:$0xff]  ;;  %v2581_v30 = vld [vmem:[%s6047_s4 + $0x360] sm:$0xff] }
 0x25a   :  { %2314 = vst [vmem:[#allocation2 + $0x21] sm:$0xff] %v5312_v11  ;;  %v2295_v13 = vadd.f32 %v2279_v18, %v2276_v20  ;;  %v5342_v56 = vmax.f32 %v2289_v12, 0.0  ;;  %v5345_v40 = vmax.f32 %v2290_v43, 0.0  ;;  %v5348_v17 = vmax.f32 %v2291_v1, 0.0  ;;  %2942 = vmatpush.msra.mxu2 %v2568_v59  ;;  %3007 = vmatpush.msra.mxu3 %v2584_v53  ;;  %v2539_v12 = vld [vmem:[%s6047_s4 + $0x210] sm:$0xff]  ;;  %v2564_v0 = vld [vmem:[%s6047_s4 + $0x2d8] sm:$0xff] }
 0x25b   :  { %2315 = vst [vmem:[#allocation2 + $0x31] sm:$0xff] %v5314_v9  ;;  %v2293_v46 = vadd.f32 %v2279_v18, %v2274_v60  ;;  %v2294_v55 = vadd.f32 %v2279_v18, %v2275_v48  ;;  %v5354_v50 = vmax.f32 %v2292_v22, 0.0  ;;  %2885 = vmatpush.msrb.mxu1 %v2544_v28  ;;  %v2543_v18 = vld [vmem:[%s6047_s4 + $0x230] sm:$0xff]  ;;  %v2600_v43 = vld [vmem:[%s6047_s4 + $0x3f8] sm:$0xff]  ;;  %v2598_v60 = vld [vmem:[%s6047_s4 + $0x3e8] sm:$0xff] }
 0x25c   :  { %2316 = vst [vmem:[#allocation2 + $0x41] sm:$0xff] %v5318_v5  ;;  %v5367_v31 = vmax.f32 %v2295_v13, 0.0  ;;  %2943 = vmatpush.msra.mxu2 %v2567_v49  ;;  %3008 = vmatpush.msra.mxu3 %v2583_v14  ;;  %v2563_v58 = vld [vmem:[%s6047_s4 + $0x2d0] sm:$0xff]  ;;  %v2562_v48 = vld [vmem:[%s6047_s4 + $0x2c8] sm:$0xff]  ;;  %v2577_v51 = vld [vmem:[%s6047_s4 + $0x340] sm:$0xff] }
 0x25d   :  { %2317 = vst [vmem:[#allocation2 + $0x51] sm:$0xff] %v5322_v3  ;;  %v5358_v54 = vmax.f32 %v2293_v46, 0.0  ;;  %v5364_v24 = vmax.f32 %v2294_v55, 0.0  ;;  %2886 = vmatpush.msrb.mxu1 %v2543_v18  ;;  %3072 = vmatpush.msra.mxu0 %v2600_v43  ;;  %v2579_v20 = vld [vmem:[%s6047_s4 + $0x350] sm:$0xff]  ;;  %v2578_v46 = vld [vmem:[%s6047_s4 + $0x348] sm:$0xff]  ;;  %v2597_v55 = vld [vmem:[%s6047_s4 + $0x3e0] sm:$0xff] }
 0x25e   :  { %2318 = vst [vmem:[#allocation2 + $0x61] sm:$0xff] %v5329_v47  ;;  %2944 = vmatpush.msra.mxu2 %v2566_v36  ;;  %3009 = vmatpush.msra.mxu3 %v2582_v33  ;;  %v2599_v1 = vld [vmem:[%s6047_s4 + $0x3f0] sm:$0xff]  ;;  %v2538_v45 = vld [vmem:[%s6047_s4 + $0x208] sm:$0xff]  ;;  %v2560_v16 = vld [vmem:[%s6047_s4 + $0x2b8] sm:$0xff] }
 0x25f   :  { %2319 = vst [vmem:[#allocation2 + $0x71] sm:$0xff] %v5334_v21  ;;  %2887 = vmatpush.msrb.mxu1 %v2542_v19  ;;  %3073 = vmatpush.msra.mxu0 %v2599_v1  ;;  %v2596_v28 = vld [vmem:[%s6047_s4 + $0x3d8] sm:$0xff]  ;;  %v2595_v19 = vld [vmem:[%s6047_s4 + $0x3d0] sm:$0xff]  ;;  %v2594_v59 = vld [vmem:[%s6047_s4 + $0x3c8] sm:$0xff] }
 0x260   :  { %v2330_v27 = vld [vmem:[#allocation2 + $0x10] sm:$0xff]  ;;  %2704 = vmatmul.f32.gmra.mxu2 %v5312_v11  ;;  %2320 = vst [vmem:[#allocation2 + $0x81] sm:$0xff] %v5338_v62  ;;  %3010 = vmatpush.msra.mxu3 %v2581_v30  ;;  %v2576_v18 = vld [vmem:[%s6047_s4 + $0x338] sm:$0xff]  ;;  %v2558_v53 = vld [vmem:[%s6047_s4 + $0x2a8] sm:$0xff] }
 0x261   :  { %v5350_v29 = vld [vmem:[#allocation2 + $0x12] sm:$0xff]  ;;  %2636 = vmatmul.f32.gmra.mxu1 %v2330_v27  ;;  %2321 = vst [vmem:[#allocation2 + $0xb1] sm:$0xff] %v5342_v56  ;;  %2828 = vmatmul.f32.vlgmr.msrb.gmra.mxu0 %v2330_v27  ;;  %v5373_v34 = vld [vmem:[#allocation2 + $0x20] sm:$0xff]  ;;  %v2574_v49 = vld [vmem:[%s6047_s4 + $0x328] sm:$0xff] }
 0x262   :  { %2766 = vmatmul.f32.gmra.mxu3 %v5350_v29  ;;  %2322 = vst [vmem:[#allocation2 + $0xc1] sm:$0xff] %v5345_v40  ;;  %v5375_v57 = vld [vmem:[#allocation2 + $0x22] sm:$0xff]  ;;  %v5384_v23 = vld [vmem:[#allocation2 + $0x30] sm:$0xff]  ;;  %2888 = vmatpush.msrb.mxu1 %v2541_v41 }
 0x263   :  { %2323 = vst [vmem:[#allocation2 + $0xd1] sm:$0xff] %v5348_v17  ;;  %v5386_v37 = vld [vmem:[#allocation2 + $0x32] sm:$0xff]  ;;  %v5395_v32 = vld [vmem:[#allocation2 + $0x40] sm:$0xff]  ;;  %2945 = vmatpush.msra.mxu2 %v2565_v61  ;;  %3011 = vmatpush.msra.mxu3 %v2580_v26  ;;  %v2590_v1 = vld [vmem:[%s6047_s4 + $0x3a8] sm:$0xff] }
 0x264   :  { %2324 = vst [vmem:[#allocation2 + $0xe1] sm:$0xff] %v5354_v50  ;;  %v5397_v6 = vld [vmem:[#allocation2 + $0x42] sm:$0xff]  ;;  %v5406_v10 = vld [vmem:[#allocation2 + $0x50] sm:$0xff]  ;;  %2889 = vmatpush.msrb.mxu1 %v2540_v63  ;;  %3074 = vmatpush.msra.mxu0 %v2598_v60  ;;  %v2572_v26 = vld [vmem:[%s6047_s4 + $0x318] sm:$0xff] }
 0x265   :  { %2325 = vst [vmem:[#allocation2 + $0xf1] sm:$0xff] %v5358_v54  ;;  %v5408_v4 = vld [vmem:[#allocation2 + $0x52] sm:$0xff]  ;;  %v5417_v2 = vld [vmem:[#allocation2 + $0x60] sm:$0xff]  ;;  %2946 = vmatpush.msra.mxu2 %v2564_v0  ;;  %3012 = vmatpush.msra.mxu3 %v2579_v20 }
 0x266   :  { %2326 = vst [vmem:[#allocation2 + $0x101] sm:$0xff] %v5364_v24  ;;  %v5419_v39 = vld [vmem:[#allocation2 + $0x62] sm:$0xff]  ;;  %v5428_v38 = vld [vmem:[#allocation2 + $0x70] sm:$0xff]  ;;  %2890 = vmatpush.msrb.mxu1 %v2539_v12  ;;  %3075 = vmatpush.msra.mxu0 %v2597_v55  ;;  %v2556_v12 = vld [vmem:[%s6047_s4 + $0x298] sm:$0xff] }
 0x267   :  { %2327 = vst [vmem:[#allocation2 + $0x111] sm:$0xff] %v5367_v31  ;;  %v5430_v25 = vld [vmem:[#allocation2 + $0x72] sm:$0xff]  ;;  %v5442_v15 = vld [vmem:[#allocation2 + $0x80] sm:$0xff]  ;;  %2947 = vmatpush.msra.mxu2 %v2563_v58  ;;  %3013 = vmatpush.msra.mxu3 %v2578_v46  ;;  %v2570_v46 = vld [vmem:[%s6047_s4 + $0x308] sm:$0xff] }
 0x268   :  { %2707 = vmatmul.f32.gmra.mxu2 %v5314_v9  ;;  %v2338_v35 = vld [vmem:[#allocation2 + $0xb0] sm:$0xff]  ;;  %v2561_v27 = vld [vmem:[%s6047_s4 + $0x2c0] sm:$0xff]  ;;  %2891 = vmatpush.msrb.mxu1 %v2538_v45  ;;  %v2616_v60 = vld [vmem:[%s6047_s4 + $0x478] sm:$0xff] }
 0x269   :  { %2639 = vmatmul.f32.gmra.mxu1 %v5373_v34  ;;  %2831 = vmatmul.f32.gmra.mxu0 %v5373_v34  ;;  %v5469_v42 = vld [vmem:[#allocation2 + $0xb2] sm:$0xff]  ;;  %v5500_v22 = vld [vmem:[#allocation2 + $0xc0] sm:$0xff] }
 0x26a   :  { %2769 = vmatmul.f32.gmra.mxu3 %v5375_v57  ;;  %v5505_v13 = vld [vmem:[#allocation2 + $0xc2] sm:$0xff]  ;;  %2948 = vmatpush.msra.mxu2 %v2562_v48  ;;  %v2559_v41 = vld [vmem:[%s6047_s4 + $0x2b0] sm:$0xff] }
 0x26b   :  { %3014 = vmatpush.msra.mxu3 %v2577_v51  ;;  %3076 = vmatpush.msra.mxu0 %v2596_v28  ;;  %v2575_v63 = vld [vmem:[%s6047_s4 + $0x330] sm:$0xff]  ;;  %v2593_v14 = vld [vmem:[%s6047_s4 + $0x3c0] sm:$0xff]  ;;  %v2554_v48 = vld [vmem:[%s6047_s4 + $0x288] sm:$0xff] }
 0x26c   :  { %2949 = vmatpush.msra.mxu2 %v2561_v27  ;;  %v2537_v36 = vld [vmem:[%s6047_s4 + $0x200] sm:$0xff]  ;;  %v2591_v43 = vld [vmem:[%s6047_s4 + $0x3b0] sm:$0xff]  ;;  %v2588_v28 = vld [vmem:[%s6047_s4 + $0x398] sm:$0xff] }
 0x26d   :  { %3015 = vmatpush.msra.mxu3 %v2576_v18  ;;  %3077 = vmatpush.msra.mxu0 %v2595_v19  ;;  %v2557_v33 = vld [vmem:[%s6047_s4 + $0x2a0] sm:$0xff]  ;;  %v2555_v58 = vld [vmem:[%s6047_s4 + $0x290] sm:$0xff] }
 0x26e   :  { %2950 = vmatpush.msra.mxu2 %v2560_v16  ;;  %v2573_v61 = vld [vmem:[%s6047_s4 + $0x320] sm:$0xff]  ;;  %2892 = vmatpush.msrb.mxu1 %v2537_v36  ;;  %v2571_v20 = vld [vmem:[%s6047_s4 + $0x310] sm:$0xff] }
 0x26f   :  { %3016 = vmatpush.msra.mxu3 %v2575_v63  ;;  %3078 = vmatpush.msra.mxu0 %v2594_v59  ;;  %v5576_v30 = vld [vmem:[#allocation2 + $0xe0] sm:$0xff]  ;;  %v5614_v27 = vld [vmem:[#allocation2 + $0xf0] sm:$0xff] }
 0x270   :  { %2710 = vmatmul.f32.gmra.mxu2 %v5318_v5  ;;  %v5581_v0 = vld [vmem:[#allocation2 + $0xe2] sm:$0xff]  ;;  %3137 = vmatpush.msra.mxu1 %v2616_v60  ;;  %v5619_v45 = vld [vmem:[#allocation2 + $0xf2] sm:$0xff] }
 0x271   :  { %2642 = vmatmul.f32.gmra.mxu1 %v5384_v23  ;;  %2834 = vmatmul.f32.gmra.mxu0 %v5384_v23  ;;  %v2589_v55 = vld [vmem:[%s6047_s4 + $0x3a0] sm:$0xff]  ;;  %v2587_v18 = vld [vmem:[%s6047_s4 + $0x390] sm:$0xff] }
 0x272   :  { %2772 = vmatmul.f32.gmra.mxu3 %v5386_v37  ;;  %2951 = vmatpush.msra.mxu2 %v2559_v41  ;;  %v2553_v51 = vld [vmem:[%s6047_s4 + $0x280] sm:$0xff]  ;;  %v2615_v19 = vld [vmem:[%s6047_s4 + $0x470] sm:$0xff]  ;;  %v2586_v41 = vld [vmem:[%s6047_s4 + $0x388] sm:$0xff] }
 0x273   :  { %3017 = vmatpush.msra.mxu3 %v2574_v49  ;;  %3079 = vmatpush.msra.mxu0 %v2593_v14  ;;  %v2569_v16 = vld [vmem:[%s6047_s4 + $0x300] sm:$0xff]  ;;  %v2614_v49 = vld [vmem:[%s6047_s4 + $0x468] sm:$0xff]  ;;  %v5654_v14 = vld [vmem:[#allocation2 + $0x110] sm:$0xff] }
 0x274   :  { %2952 = vmatpush.msra.mxu2 %v2558_v53  ;;  %3138 = vmatpush.msra.mxu1 %v2615_v19  ;;  %v5640_v63 = vld [vmem:[#allocation2 + $0x100] sm:$0xff]  ;;  %v5656_v36 = vld [vmem:[#allocation2 + $0x112] sm:$0xff] }
 0x275   :  { %3018 = vmatpush.msra.mxu3 %v2573_v61  ;;  %v5642_v59 = vld [vmem:[#allocation2 + $0x102] sm:$0xff] }
 0x276   :  { %2953 = vmatpush.msra.mxu2 %v2557_v33  ;;  %v2585_v53 = vld [vmem:[%s6047_s4 + $0x380] sm:$0xff]  ;;  %3139 = vmatpush.msra.mxu1 %v2614_v49 }
 0x277   :  { %3019 = vmatpush.msra.mxu3 %v2572_v26  ;;  %v2613_v61 = vld [vmem:[%s6047_s4 + $0x460] sm:$0xff] }
 0x278   :  { %2713 = vmatmul.f32.gmra.mxu2 %v5322_v3  ;;  %3140 = vmatpush.msra.mxu1 %v2613_v61 }
 0x279   :  { %2645 = vmatmul.f32.gmra.mxu1 %v5395_v32  ;;  %2837 = vmatmul.f32.gmra.mxu0 %v5395_v32 }
 0x27a   :  { %2775 = vmatmul.f32.gmra.mxu3 %v5397_v6  ;;  %2954 = vmatpush.msra.mxu2 %v2556_v12  ;;  %v5670_v12 = vld [vmem:[#allocation2 + $0x120] sm:$0xff] }
 0x27b   :  { %3020 = vmatpush.msra.mxu3 %v2571_v20 }
 0x27c   :  { %2955 = vmatpush.msra.mxu2 %v2555_v58 }
 0x27d   :  { %3021 = vmatpush.msra.mxu3 %v2570_v46 }
 0x27e   :  { %2956 = vmatpush.msra.mxu2 %v2554_v48 }
 0x27f   :  { %3022 = vmatpush.msra.mxu3 %v2569_v16 }
 0x280   :  { %2716 = vmatmul.f32.gmra.mxu2 %v5329_v47 }
 0x281   :  { %2648 = vmatmul.f32.gmra.mxu1 %v5406_v10  ;;  %2840 = vmatmul.f32.gmra.mxu0 %v5406_v10 }
 0x282   :  { %2778 = vmatmul.f32.gmra.mxu3 %v5408_v4  ;;  %2957 = vmatpush.msra.mxu2 %v2553_v51 }
 0x288   :  { %2719 = vmatmul.f32.gmra.mxu2 %v5334_v21 }
 0x289   :  { %2651 = vmatmul.f32.gmra.mxu1 %v5417_v2  ;;  %2843 = vmatmul.f32.gmra.mxu0 %v5417_v2 }
 0x28a   :  { %2781 = vmatmul.f32.gmra.mxu3 %v5419_v39 }
 0x290   :  { %2722 = vmatmul.f32.gmra.mxu2 %v2353_v52  ;;  %v5538_v52 = vld [vmem:[#allocation2 + $0xd0] sm:$0xff] }
 0x291   :  { %2654 = vmatmul.f32.gmra.mxu1 %v5428_v38  ;;  %2846 = vmatmul.f32.gmra.mxu0 %v5428_v38 }
 0x292   :  { %2784 = vmatmul.f32.gmra.mxu3 %v5430_v25 }
 0x298   :  { %2725 = vmatmul.f32.gmra.mxu2 %v5342_v56 }
 0x299   :  { %2657 = vmatmul.f32.gmra.mxu1 %v5439_v8  ;;  %2849 = vmatmul.f32.gmra.mxu0 %v5442_v15 }
 0x29a   :  { %2787 = vmatmul.f32.gmra.mxu3 %v2369_v44  ;;  %v5543_v44 = vld [vmem:[#allocation2 + $0xd2] sm:$0xff] }
 0x2a0   :  { %2728 = vmatmul.f32.gmra.mxu2 %v5345_v40 }
 0x2a1   :  { %2660 = vmatmul.f32.gmra.mxu1 %v2338_v35  ;;  %2852 = vmatmul.f32.gmra.mxu0 %v2338_v35  ;;  %v2592_v35 = vld [vmem:[%s6047_s4 + $0x3b8] sm:$0xff] }
 0x2a2   :  { %2790 = vmatmul.f32.gmra.mxu3 %v5469_v42  ;;  %3080 = vmatpush.msra.mxu0 %v2592_v35 }
 0x2a4   :  { %3081 = vmatpush.msra.mxu0 %v2591_v43 }
 0x2a5   :  { %v5661_v33 = vpop.f32.mrf.mxu2 }
 0x2a6   :  { %3082 = vmatpush.msra.mxu0 %v2590_v1 }
 0x2a7   :  { %v5667_v35 = vpop.f32.mrf.mxu1 }
 0x2a8   :  { %2731 = vmatmul.f32.gmra.mxu2 %v5348_v17  ;;  %3083 = vmatpush.msra.mxu0 %v2589_v55 }
 0x2a9   :  { %2663 = vmatmul.f32.gmra.mxu1 %v5500_v22  ;;  %2855 = vmatmul.f32.gmra.mxu0 %v5500_v22  ;;  %v5678_v43 = vpop.f32.mrf.mxu3 }
 0x2aa   :  { %2793 = vmatmul.f32.gmra.mxu3 %v5505_v13  ;;  %3084 = vmatpush.msra.mxu0 %v2588_v28 }
 0x2ac   :  { %3085 = vmatpush.msra.mxu0 %v2587_v18 }
 0x2ae   :  { %3086 = vmatpush.msra.mxu0 %v2586_v41 }
 0x2b0   :  { %2734 = vmatmul.f32.gmra.mxu2 %v5354_v50  ;;  %3087 = vmatpush.msra.mxu0 %v2585_v53 }
 0x2b1   :  { %2666 = vmatmul.f32.gmra.mxu1 %v5538_v52  ;;  %2858 = vmatmul.f32.gmra.mxu0 %v5538_v52 }
 0x2b2   :  { %2796 = vmatmul.f32.gmra.mxu3 %v5543_v44 }
 0x2b8   :  { %2737 = vmatmul.f32.gmra.mxu2 %v5358_v54 }
 0x2b9   :  { %2669 = vmatmul.f32.gmra.mxu1 %v5576_v30  ;;  %2861 = vmatmul.f32.gmra.mxu0 %v5576_v30 }
 0x2ba   :  { %2799 = vmatmul.f32.gmra.mxu3 %v5581_v0 }
 0x2c0   :  { %2740 = vmatmul.f32.gmra.mxu2 %v5364_v24 }
 0x2c1   :  { %2672 = vmatmul.f32.gmra.mxu1 %v5614_v27  ;;  %2864 = vmatmul.f32.gmra.mxu0 %v5614_v27 }
 0x2c2   :  { %2802 = vmatmul.f32.gmra.mxu3 %v5619_v45 }
 0x2c8   :  { %2743 = vmatmul.f32.gmra.mxu2 %v5367_v31 }
 0x2c9   :  { %2675 = vmatmul.f32.gmra.mxu1 %v5640_v63  ;;  %2867 = vmatmul.f32.gmra.mxu0 %v5640_v63 }
 0x2ca   :  { %2805 = vmatmul.f32.gmra.mxu3 %v5642_v59 }
 0x2d0   :  { %2958 = vmatmul.f32.vlgmr.msra.gmra.mxu2 %v5350_v29  ;;  %v2612_v29 = vld [vmem:[%s6047_s4 + $0x458] sm:$0xff] }
 0x2d1   :  { %2678 = vmatmul.f32.gmra.mxu1 %v5654_v14  ;;  %2870 = vmatmul.f32.gmra.mxu0 %v5654_v14 }
 0x2d2   :  { %2808 = vmatmul.f32.gmra.mxu3 %v5656_v36  ;;  %3141 = vmatpush.msra.mxu1 %v2612_v29 }
 0x2d8   :  { %2961 = vmatmul.f32.gmra.mxu2 %v5375_v57 }
 0x2d9   :  { %2893 = vmatmul.f32.vlgmr.msrb.gmra.mxu1 %v5310_v7  ;;  %2873 = vmatmul.f32.gmra.mxu0 %v5670_v12  ;;  %v2611_v7 = vld [vmem:[%s6047_s4 + $0x450] sm:$0xff] }
 0x2da   :  { %3023 = vmatmul.f32.vlgmr.msra.gmra.mxu3 %v5373_v34  ;;  %3142 = vmatpush.msra.mxu1 %v2611_v7 }
 0x2db   :  { %v2702_v26 = vpop.f32.mrf.mxu2 }
 0x2de   :  { %v2637_v58 = vpop.f32.mrf.mxu1  ;;  %v5680_v20 = vpop.f32.mrf.mxu0 }
 0x2df   :  { %v2703_v34 = vadd.f32 %v2702_v26, %v2637_v58 }
 0x2e0   :  { %2964 = vmatmul.f32.gmra.mxu2 %v5386_v37 }
 0x2e1   :  { %2896 = vmatmul.f32.gmra.mxu1 %v5312_v11  ;;  %3088 = vmatmul.f32.vlgmr.msra.gmra.mxu0 %v5312_v11  ;;  %v2610_v11 = vld [vmem:[%s6047_s4 + $0x448] sm:$0xff] }
 0x2e2   :  { %3026 = vmatmul.f32.gmra.mxu3 %v5384_v23  ;;  %3143 = vmatpush.msra.mxu1 %v2610_v11 }
 0x2e3   :  { %v2705_v57 = vpop.f32.mrf.mxu2 }
 0x2e5   :  { %v2767_v1 = vpop.f32.mrf.mxu3 }
 0x2e6   :  { %v5689_v60 = vadd.f32 %v2767_v1, %v2703_v34  ;;  %v2640_v48 = vpop.f32.mrf.mxu1  ;;  %v5691_v46 = vpop.f32.mrf.mxu0 }
 0x2e7   :  { %v2706_v23 = vadd.f32 %v2705_v57, %v2640_v48 }
 0x2e8   :  { %2967 = vmatmul.f32.gmra.mxu2 %v5397_v6 }
 0x2e9   :  { %2899 = vmatmul.f32.gmra.mxu1 %v5314_v9  ;;  %3091 = vmatmul.f32.gmra.mxu0 %v5314_v9  ;;  %v2609_v9 = vld [vmem:[%s6047_s4 + $0x440] sm:$0xff] }
 0x2ea   :  { %3029 = vmatmul.f32.gmra.mxu3 %v5395_v32  ;;  %3144 = vmatpush.msra.mxu1 %v2609_v9 }
 0x2eb   :  { %v2708_v37 = vpop.f32.mrf.mxu2 }
 0x2ed   :  { %v2770_v55 = vpop.f32.mrf.mxu3 }
 0x2ee   :  { %v5700_v51 = vadd.f32 %v2770_v55, %v2706_v23  ;;  %v2643_v16 = vpop.f32.mrf.mxu1  ;;  %v5702_v28 = vpop.f32.mrf.mxu0 }
 0x2ef   :  { %v2709_v32 = vadd.f32 %v2708_v37, %v2643_v16 }
 0x2f0   :  { %2970 = vmatmul.f32.gmra.mxu2 %v5408_v4 }
 0x2f1   :  { %2902 = vmatmul.f32.gmra.mxu1 %v5318_v5  ;;  %3094 = vmatmul.f32.gmra.mxu0 %v5318_v5  ;;  %v2608_v5 = vld [vmem:[%s6047_s4 + $0x438] sm:$0xff] }
 0x2f2   :  { %3032 = vmatmul.f32.gmra.mxu3 %v5406_v10  ;;  %3145 = vmatpush.msra.mxu1 %v2608_v5 }
 0x2f3   :  { %v2711_v6 = vpop.f32.mrf.mxu2 }
 0x2f5   :  { %v2773_v18 = vpop.f32.mrf.mxu3 }
 0x2f6   :  { %v5711_v19 = vadd.f32 %v2773_v18, %v2709_v32  ;;  %v2646_v41 = vpop.f32.mrf.mxu1  ;;  %v5713_v53 = vpop.f32.mrf.mxu0 }
 0x2f7   :  { %v2712_v10 = vadd.f32 %v2711_v6, %v2646_v41 }
 0x2f8   :  { %2973 = vmatmul.f32.gmra.mxu2 %v5419_v39 }
 0x2f9   :  { %2905 = vmatmul.f32.gmra.mxu1 %v5322_v3  ;;  %3097 = vmatmul.f32.gmra.mxu0 %v5322_v3  ;;  %v2607_v3 = vld [vmem:[%s6047_s4 + $0x430] sm:$0xff] }
 0x2fa   :  { %3035 = vmatmul.f32.gmra.mxu3 %v5417_v2  ;;  %3146 = vmatpush.msra.mxu1 %v2607_v3 }
 0x2fb   :  { %v2714_v4 = vpop.f32.mrf.mxu2 }
 0x2fd   :  { %v2776_v49 = vpop.f32.mrf.mxu3 }
 0x2fe   :  { %v5722_v61 = vadd.f32 %v2776_v49, %v2712_v10  ;;  %v2649_v29 = vpop.f32.mrf.mxu1  ;;  %v5724_v26 = vpop.f32.mrf.mxu0 }
 0x2ff   :  { %v2715_v2 = vadd.f32 %v2714_v4, %v2649_v29 }
 0x300   :  { %2976 = vmatmul.f32.gmra.mxu2 %v5430_v25  ;;  %v5737_v25 = vld [vmem:[#allocation2 + $0x82] sm:$0xff] }
 0x301   :  { %2908 = vmatmul.f32.gmra.mxu1 %v5329_v47  ;;  %3100 = vmatmul.f32.gmra.mxu0 %v5329_v47  ;;  %v2606_v47 = vld [vmem:[%s6047_s4 + $0x428] sm:$0xff] }
 0x302   :  { %3038 = vmatmul.f32.gmra.mxu3 %v5428_v38  ;;  %3147 = vmatpush.msra.mxu1 %v2606_v47 }
 0x303   :  { %v2717_v39 = vpop.f32.mrf.mxu2 }
 0x305   :  { %v2779_v58 = vpop.f32.mrf.mxu3 }
 0x306   :  { %v5733_v7 = vadd.f32 %v2779_v58, %v2715_v2  ;;  %v2652_v34 = vpop.f32.mrf.mxu1  ;;  %v5735_v57 = vpop.f32.mrf.mxu0 }
 0x307   :  { %v2718_v38 = vadd.f32 %v2717_v39, %v2652_v34 }
 0x308   :  { %2979 = vmatmul.f32.gmra.mxu2 %v5737_v25 }
 0x309   :  { %2911 = vmatmul.f32.gmra.mxu1 %v5334_v21  ;;  %3103 = vmatmul.f32.gmra.mxu0 %v5334_v21  ;;  %v2605_v21 = vld [vmem:[%s6047_s4 + $0x420] sm:$0xff] }
 0x30a   :  { %3041 = vmatmul.f32.gmra.mxu3 %v5442_v15  ;;  %3148 = vmatpush.msra.mxu1 %v2605_v21 }
 0x30b   :  { %v2720_v1 = vpop.f32.mrf.mxu2 }
 0x30d   :  { %v2782_v48 = vpop.f32.mrf.mxu3 }
 0x30e   :  { %v5746_v11 = vadd.f32 %v2782_v48, %v2718_v38  ;;  %v2655_v23 = vpop.f32.mrf.mxu1  ;;  %v5748_v37 = vpop.f32.mrf.mxu0 }
 0x30f   :  { %v2721_v15 = vadd.f32 %v2720_v1, %v2655_v23 }
 0x310   :  { %2982 = vmatmul.f32.gmra.mxu2 %v5469_v42  ;;  %v2448_v42 = vld [vmem:[#allocation2 + $0x91] sm:$0xff] }
 0x311   :  { %2914 = vmatmul.f32.gmra.mxu1 %v5338_v62  ;;  %3106 = vmatmul.f32.gmra.mxu0 %v5338_v62  ;;  %v2604_v62 = vld [vmem:[%s6047_s4 + $0x418] sm:$0xff] }
 0x312   :  { %3044 = vmatmul.f32.gmra.mxu3 %v5439_v8  ;;  %3149 = vmatpush.msra.mxu1 %v2604_v62 }
 0x313   :  { %v2723_v55 = vpop.f32.mrf.mxu2 }
 0x315   :  { %v2785_v16 = vpop.f32.mrf.mxu3 }
 0x316   :  { %v5757_v9 = vadd.f32 %v2785_v16, %v2721_v15  ;;  %v2658_v32 = vpop.f32.mrf.mxu1  ;;  %v5759_v6 = vpop.f32.mrf.mxu0 }
 0x317   :  { %v2724_v18 = vadd.f32 %v2723_v55, %v2658_v32 }
 0x318   :  { %2985 = vmatmul.f32.gmra.mxu2 %v5505_v13 }
 0x319   :  { %2917 = vmatmul.f32.gmra.mxu1 %v5342_v56  ;;  %3109 = vmatmul.f32.gmra.mxu0 %v2448_v42  ;;  %v2603_v56 = vld [vmem:[%s6047_s4 + $0x410] sm:$0xff] }
 0x31a   :  { %3047 = vmatmul.f32.gmra.mxu3 %v5500_v22  ;;  %3150 = vmatpush.msra.mxu1 %v2603_v56 }
 0x31b   :  { %v2726_v41 = vpop.f32.mrf.mxu2 }
 0x31d   :  { %v2788_v5 = vpop.f32.mrf.mxu3 }
 0x31e   :  { %v2789_v10 = vadd.f32 %v2788_v5, %v2724_v18  ;;  %v2661_v4 = vpop.f32.mrf.mxu1  ;;  %v2853_v49 = vpop.f32.mrf.mxu0 }
 0x31f   :  { %v2727_v22 = vadd.f32 %v2726_v41, %v2661_v4 }
 0x320   :  { %v5767_v29 = vadd.f32 %v2853_v49, %v2789_v10  ;;  %2988 = vmatmul.f32.gmra.mxu2 %v5543_v44 }
 0x321   :  { %2920 = vmatmul.f32.gmra.mxu1 %v5345_v40  ;;  %3112 = vmatmul.f32.gmra.mxu0 %v5345_v40  ;;  %v2602_v40 = vld [vmem:[%s6047_s4 + $0x408] sm:$0xff] }
 0x322   :  { %3050 = vmatmul.f32.gmra.mxu3 %v5538_v52  ;;  %3151 = vmatpush.msra.mxu1 %v2602_v40 }
 0x323   :  { %v2729_v13 = vpop.f32.mrf.mxu2 }
 0x325   :  { %v2791_v3 = vpop.f32.mrf.mxu3 }
 0x326   :  { %v2792_v2 = vadd.f32 %v2791_v3, %v2727_v22  ;;  %v2664_v39 = vpop.f32.mrf.mxu1  ;;  %v2856_v58 = vpop.f32.mrf.mxu0  ;;  %v5806_v22 = vld [vmem:[#allocation2 + $0x122] sm:$0xff] }
 0x327   :  { %v2730_v52 = vadd.f32 %v2729_v13, %v2664_v39 }
 0x328   :  { %v5776_v34 = vadd.f32 %v2856_v58, %v2792_v2  ;;  %2991 = vmatmul.f32.gmra.mxu2 %v5581_v0  ;;  %v2700_v58 = vadd.f32 %v5661_v33, %v5667_v35  ;;  %v2456_v33 = vld [vmem:[#allocation2 + $0x131] sm:$0xff] }
 0x329   :  { %2923 = vmatmul.f32.gmra.mxu1 %v5348_v17  ;;  %3115 = vmatmul.f32.gmra.mxu0 %v5348_v17  ;;  %v2601_v17 = vld [vmem:[%s6047_s4 + $0x400] sm:$0xff] }
 0x32a   :  { %3053 = vmatmul.f32.gmra.mxu3 %v5576_v30  ;;  %3152 = vmatpush.msra.mxu1 %v2601_v17 }
 0x32b   :  { %v2732_v44 = vpop.f32.mrf.mxu2 }
 0x32d   :  { %v2794_v47 = vpop.f32.mrf.mxu3 }
 0x32e   :  { %v2795_v38 = vadd.f32 %v2794_v47, %v2730_v52  ;;  %v2667_v1 = vpop.f32.mrf.mxu1  ;;  %v2859_v48 = vpop.f32.mrf.mxu0 }
 0x32f   :  { %v2733_v30 = vadd.f32 %v2732_v44, %v2667_v1  ;;  %v2408_v44 = vld [vmem:[#allocation2 + $0x121] sm:$0xff] }
 0x330   :  { %v5785_v23 = vadd.f32 %v2859_v48, %v2795_v38  ;;  %2994 = vmatmul.f32.gmra.mxu2 %v5619_v45 }
 0x331   :  { %2926 = vmatmul.f32.gmra.mxu1 %v5354_v50  ;;  %3118 = vmatmul.f32.gmra.mxu0 %v5354_v50 }
 0x332   :  { %3056 = vmatmul.f32.gmra.mxu3 %v5614_v27 }
 0x333   :  { %v2735_v0 = vpop.f32.mrf.mxu2 }
 0x335   :  { %v2797_v21 = vpop.f32.mrf.mxu3 }
 0x336   :  { %v2798_v15 = vadd.f32 %v2797_v21, %v2733_v30  ;;  %v2670_v55 = vpop.f32.mrf.mxu1  ;;  %v2862_v16 = vpop.f32.mrf.mxu0  ;;  %v2457_v21 = vld [vmem:[#allocation2 + $0x22] sm:$0xff] }
 0x337   :  { %v2736_v50 = vadd.f32 %v2735_v0, %v2670_v55 }
 0x338   :  { %v5794_v32 = vadd.f32 %v2862_v16, %v2798_v15  ;;  %2997 = vmatmul.f32.gmra.mxu2 %v5642_v59 }
 0x339   :  { %2929 = vmatmul.f32.gmra.mxu1 %v5358_v54  ;;  %3121 = vmatmul.f32.gmra.mxu0 %v5358_v54 }
 0x33a   :  { %3059 = vmatmul.f32.gmra.mxu3 %v5640_v63 }
 0x33b   :  { %v2738_v27 = vpop.f32.mrf.mxu2 }
 0x33d   :  { %v2800_v42 = vpop.f32.mrf.mxu3 }
 0x33e   :  { %v2801_v62 = vadd.f32 %v2800_v42, %v2736_v50  ;;  %v2673_v18 = vpop.f32.mrf.mxu1  ;;  %v2865_v41 = vpop.f32.mrf.mxu0 }
 0x33f   :  { %v2739_v10 = vadd.f32 %v2738_v27, %v2673_v18 }
 0x340   :  { %v5800_v5 = vadd.f32 %v2865_v41, %v2801_v62  ;;  %3000 = vmatmul.f32.gmra.mxu2 %v5656_v36  ;;  %v2458_v62 = vld [vmem:[#allocation2 + $0x32] sm:$0xff] }
 0x341   :  { %2932 = vmatmul.f32.gmra.mxu1 %v5364_v24  ;;  %3124 = vmatmul.f32.gmra.mxu0 %v5364_v24 }
 0x342   :  { %3062 = vmatmul.f32.gmra.mxu3 %v5654_v14 }
 0x343   :  { %v2741_v63 = vpop.f32.mrf.mxu2 }
 0x345   :  { %v2803_v4 = vpop.f32.mrf.mxu3 }
 0x346   :  { %v2804_v54 = vadd.f32 %v2803_v4, %v2739_v10  ;;  %v2676_v49 = vpop.f32.mrf.mxu1  ;;  %v2868_v56 = vpop.f32.mrf.mxu0 }
 0x347   :  { %v2742_v14 = vadd.f32 %v2741_v63, %v2676_v49  ;;  %v2836_v63 = vadd.f32 %v5702_v28, %v5700_v51  ;;  %v2460_v51 = vld [vmem:[#allocation2 + $0x52] sm:$0xff] }
 0x348   :  { %v5808_v13 = vadd.f32 %v2868_v56, %v2804_v54  ;;  %3003 = vmatmul.f32.gmra.mxu2 %v5806_v22 }
 0x349   :  { %2935 = vmatmul.f32.gmra.mxu1 %v5367_v31  ;;  %3127 = vmatmul.f32.gmra.mxu0 %v5367_v31 }
 0x34a   :  { %3065 = vmatmul.f32.gmra.mxu3 %v5670_v12  ;;  %v2765_v12 = vadd.f32 %v5678_v43, %v2700_v58  ;;  %v2833_v43 = vadd.f32 %v5691_v46, %v5689_v60  ;;  %v2459_v60 = vld [vmem:[#allocation2 + $0x42] sm:$0xff] }
 0x34b   :  { %v2744_v24 = vpop.f32.mrf.mxu2 }
 0x34c   :  { %v2830_v1 = vadd.f32 %v5680_v20, %v2765_v12 }
 0x34d   :  { %v2806_v3 = vpop.f32.mrf.mxu3 }
 0x34e   :  { %v2807_v2 = vadd.f32 %v2806_v3, %v2742_v14  ;;  %v2679_v39 = vpop.f32.mrf.mxu1  ;;  %v2871_v40 = vpop.f32.mrf.mxu0  ;;  %v2839_v3 = vadd.f32 %v5713_v53, %v5711_v19  ;;  %v2461_v19 = vld [vmem:[#allocation2 + $0x62] sm:$0xff] }
 0x34f   :  { %v2745_v47 = vadd.f32 %v2744_v24, %v2679_v39 }
 0x350   :  { %v5816_v52 = vadd.f32 %v2871_v40, %v2807_v2 }
 0x351   :  { %2938 = vmatmul.f32.gmra.mxu1 %v2408_v44  ;;  %3130 = vmatmul.f32.gmra.mxu0 %v2408_v44 }
 0x352   :  { %3068 = vmatmul.f32.gmra.mxu3 %v5439_v8 }
 0x353   :  { %v2959_v31 = vpop.f32.mrf.mxu2 }
 0x355   :  { %v2809_v38 = vpop.f32.mrf.mxu3 }
 0x356   :  { %v2810_v48 = vadd.f32 %v2809_v38, %v2745_v47  ;;  %v2894_v17 = vpop.f32.mrf.mxu1  ;;  %v2874_v30 = vpop.f32.mrf.mxu0 }
 0x357   :  { %v2895_v0 = vadd.f32 %v2894_v17, %v2830_v1 }
 0x358   :  { %v5821_v35 = vadd.f32 %v2874_v30, %v2810_v48 }
 0x359   :  { %3153 = vmatmul.f32.vlgmr.msra.gmra.mxu1 %v2457_v21  ;;  %3133 = vmatmul.f32.gmra.mxu0 %v2456_v33  ;;  %v2960_v15 = vadd.f32 %v2959_v31, %v2895_v0  ;;  %v2842_v31 = vadd.f32 %v5724_v26, %v5722_v61  ;;  %v2464_v26 = vld [vmem:[#allocation2 + $0x92] sm:$0xff] }
 0x35b   :  { %v2962_v8 = vpop.f32.mrf.mxu2 }
 0x35d   :  { %v3024_v55 = vpop.f32.mrf.mxu3 }
 0x35e   :  { %v3025_v16 = vadd.f32 %v3024_v55, %v2960_v15  ;;  %v2897_v50 = vpop.f32.mrf.mxu1  ;;  %v3089_v20 = vpop.f32.mrf.mxu0 }
 0x35f   :  { %v2898_v27 = vadd.f32 %v2897_v50, %v2833_v43  ;;  %v2462_v43 = vld [vmem:[#allocation2 + $0x72] sm:$0xff] }
 0x360   :  { %v5825_v42 = vadd.f32 %v3089_v20, %v3025_v16  ;;  %v2465_v20 = vld [vmem:[#allocation2 + $0xc2] sm:$0xff] }
 0x361   :  { %3156 = vmatmul.f32.gmra.mxu1 %v2458_v62  ;;  %v2963_v18 = vadd.f32 %v2962_v8, %v2898_v27 }
 0x363   :  { %v2965_v10 = vpop.f32.mrf.mxu2 }
 0x365   :  { %v3027_v41 = vpop.f32.mrf.mxu3 }
 0x366   :  { %v3028_v4 = vadd.f32 %v3027_v41, %v2963_v18  ;;  %v2900_v54 = vpop.f32.mrf.mxu1  ;;  %v3092_v56 = vpop.f32.mrf.mxu0  ;;  %v2466_v41 = vld [vmem:[#allocation2 + $0xd2] sm:$0xff] }
 0x367   :  { %v2901_v49 = vadd.f32 %v2900_v54, %v2836_v63 }
 0x368   :  { %v5829_v14 = vadd.f32 %v3092_v56, %v3028_v4 }
 0x369   :  { %3159 = vmatmul.f32.gmra.mxu1 %v2459_v60  ;;  %v2966_v46 = vadd.f32 %v2965_v10, %v2901_v49 }
 0x36b   :  { %v2968_v58 = vpop.f32.mrf.mxu2 }
 0x36d   :  { %v3030_v24 = vpop.f32.mrf.mxu3 }
 0x36e   :  { %v3031_v2 = vadd.f32 %v3030_v24, %v2966_v46  ;;  %v2903_v39 = vpop.f32.mrf.mxu1  ;;  %v3095_v44 = vpop.f32.mrf.mxu0 }
 0x36f   :  { %v2904_v40 = vadd.f32 %v2903_v39, %v2839_v3 }
 0x370   :  { %v5833_v12 = vadd.f32 %v3095_v44, %v3031_v2 }
 0x371   :  { %3162 = vmatmul.f32.gmra.mxu1 %v2460_v51  ;;  %v2969_v28 = vadd.f32 %v2968_v58, %v2904_v40 }
 0x373   :  { %v2971_v53 = vpop.f32.mrf.mxu2 }
 0x375   :  { %v3033_v47 = vpop.f32.mrf.mxu3 }
 0x376   :  { %v3034_v38 = vadd.f32 %v3033_v47, %v2969_v28  ;;  %v2906_v1 = vpop.f32.mrf.mxu1  ;;  %v3098_v17 = vpop.f32.mrf.mxu0 }
 0x377   :  { %v2907_v48 = vadd.f32 %v2906_v1, %v2842_v31 }
 0x378   :  { %v3099_v30 = vadd.f32 %v3098_v17, %v3034_v38 }
 0x379   :  { %3165 = vmatmul.f32.gmra.mxu1 %v2461_v19  ;;  %v2972_v0 = vadd.f32 %v2971_v53, %v2907_v48 }
 0x37d   :  { %v3036_v33 = vpop.f32.mrf.mxu3 }
 0x37e   :  { %v3037_v21 = vadd.f32 %v3036_v33, %v2972_v0  ;;  %v5837_v15 = vpop.f32.mrf.mxu1  ;;  %v3101_v8 = vpop.f32.mrf.mxu0 }
 0x380   :  { %v3102_v55 = vadd.f32 %v3101_v8, %v3037_v21 }
 0x381   :  { %3168 = vmatmul.f32.gmra.mxu1 %v2462_v43 }
 0x385   :  { %v3039_v3 = vpop.f32.mrf.mxu3 }
 0x386   :  { %v5839_v16 = vpop.f32.mrf.mxu1 }
 0x389   :  { %3171 = vmatmul.f32.gmra.mxu1 %v5737_v25  ;;  %v2467_v25 = vld [vmem:[#allocation2 + $0xe2] sm:$0xff] }
 0x38d   :  { %v3042_v58 = vpop.f32.mrf.mxu3 }
 0x38e   :  { %v5842_v61 = vpop.f32.mrf.mxu1 }
 0x391   :  { %3174 = vmatmul.f32.gmra.mxu1 %v2464_v26 }
 0x396   :  { %v2918_v50 = vpop.f32.mrf.mxu1 }
 0x397   :  { %v5845_v27 = vadd.f32 %v2918_v50, %v5767_v29 }
 0x399   :  { %3177 = vmatmul.f32.gmra.mxu1 %v2465_v20 }
 0x39e   :  { %v2921_v62 = vpop.f32.mrf.mxu1 }
 0x39f   :  { %v5848_v18 = vadd.f32 %v2921_v62, %v5776_v34 }
 0x3a1   :  { %3180 = vmatmul.f32.gmra.mxu1 %v2466_v41 }
 0x3a6   :  { %v2924_v10 = vpop.f32.mrf.mxu1 }
 0x3a7   :  { %v5851_v63 = vadd.f32 %v2924_v10, %v5785_v23  ;;  %v2845_v10 = vadd.f32 %v5735_v57, %v5733_v7 }
 0x3a9   :  { %3183 = vmatmul.f32.gmra.mxu1 %v2467_v25  ;;  %v2848_v25 = vadd.f32 %v5748_v37, %v5746_v11 }
 0x3ae   :  { %v2927_v4 = vpop.f32.mrf.mxu1 }
 0x3af   :  { %v5854_v54 = vadd.f32 %v2927_v4, %v5794_v32  ;;  %v2910_v4 = vadd.f32 %v5837_v15, %v2845_v10 }
 0x3b1   :  { %3186 = vmatmul.f32.gmra.mxu1 %v5619_v45  ;;  %v2472_v45 = vld [vmem:[#allocation2 + $0x132] sm:$0xff] }
 0x3b6   :  { %v2930_v29 = vpop.f32.mrf.mxu1 }
 0x3b7   :  { %v5858_v49 = vadd.f32 %v2930_v29, %v5800_v5  ;;  %v2851_v29 = vadd.f32 %v5759_v6, %v5757_v9 }
 0x3b9   :  { %3189 = vmatmul.f32.gmra.mxu1 %v5642_v59 }
 0x3be   :  { %v2933_v34 = vpop.f32.mrf.mxu1 }
 0x3bf   :  { %v5862_v56 = vadd.f32 %v2933_v34, %v5808_v13  ;;  %v2913_v34 = vadd.f32 %v5839_v16, %v2848_v25 }
 0x3c1   :  { %3192 = vmatmul.f32.gmra.mxu1 %v5656_v36  ;;  %v2974_v36 = vpop.f32.mrf.mxu2 }
 0x3c6   :  { %v2936_v23 = vpop.f32.mrf.mxu1 }
 0x3c7   :  { %v5866_v60 = vadd.f32 %v2936_v23, %v5816_v52  ;;  %v3104_v52 = vpop.f32.mrf.mxu0 }
 0x3c9   :  { %3195 = vmatmul.f32.gmra.mxu1 %v5806_v22  ;;  %v2977_v39 = vpop.f32.mrf.mxu2 }
 0x3ce   :  { %v2939_v32 = vpop.f32.mrf.mxu1 }
 0x3cf   :  { %v5870_v46 = vadd.f32 %v2939_v32, %v5821_v35  ;;  %v3107_v44 = vpop.f32.mrf.mxu0  ;;  %v2916_v32 = vadd.f32 %v5842_v61, %v2851_v29 }
 0x3d1   :  { %3198 = vmatmul.f32.gmra.mxu1 %v2472_v45  ;;  %v2980_v51 = vpop.f32.mrf.mxu2 }
 0x3d2   :  { %v2981_v11 = vadd.f32 %v2980_v51, %v2916_v32 }
 0x3d6   :  { %v3154_v5 = vpop.f32.mrf.mxu1 }
 0x3d7   :  { %v5873_v59 = vadd.f32 %v3154_v5, %v5825_v42  ;;  %v3045_v42 = vpop.f32.mrf.mxu3  ;;  %v2975_v5 = vadd.f32 %v2974_v36, %v2910_v4 }
 0x3d8   :  { %v3046_v15 = vadd.f32 %v3045_v42, %v2981_v11 }
 0x3d9   :  { %v2983_v38 = vpop.f32.mrf.mxu2  ;;  %v3224_v16 = vmul.f32 %v5873_v59, %v5873_v59 }
 0x3da   :  { %v2984_v9 = vadd.f32 %v2983_v38, %v5845_v27 }
 0x3de   :  { %v3157_v13 = vpop.f32.mrf.mxu1 }
 0x3df   :  { %v5876_v24 = vadd.f32 %v3157_v13, %v5829_v14  ;;  %v3110_v14 = vpop.f32.mrf.mxu0  ;;  %v3048_v1 = vpop.f32.mrf.mxu3  ;;  %v2978_v13 = vadd.f32 %v2977_v39, %v2913_v34 }
 0x3e0   :  { %v3049_v39 = vadd.f32 %v3048_v1, %v2984_v9  ;;  %v3111_v38 = vadd.f32 %v3110_v14, %v3046_v15 }
 0x3e1   :  { %v2986_v19 = vpop.f32.mrf.mxu2  ;;  %v3225_v37 = vmul.f32 %v5876_v24, %v5876_v24  ;;  %v3202_v61 = vadd.f32 %v5876_v24, %v5873_v59 }
 0x3e3   :  { %v3240_v10 = vadd.f32 %v3225_v37, %v3224_v16 }
 0x3e6   :  { %v3160_v2 = vpop.f32.mrf.mxu1 }
 0x3e7   :  { %v5879_v22 = vadd.f32 %v3160_v2, %v5833_v12  ;;  %v3113_v48 = vpop.f32.mrf.mxu0  ;;  %v3051_v12 = vpop.f32.mrf.mxu3  ;;  %v3040_v2 = vadd.f32 %v3039_v3, %v2975_v5 }
 0x3e9   :  { %v2989_v33 = vpop.f32.mrf.mxu2  ;;  %v3105_v6 = vadd.f32 %v3104_v52, %v3040_v2  ;;  %v3226_v36 = vmul.f32 %v5879_v22, %v5879_v22  ;;  %v3203_v42 = vadd.f32 %v3202_v61, %v5879_v22 }
 0x3ea   :  { %v2990_v4 = vadd.f32 %v2989_v33, %v5851_v63 }
 0x3eb   :  { %v3241_v29 = vadd.f32 %v3240_v10, %v3226_v36 }
 0x3ee   :  { %v3163_v35 = vpop.f32.mrf.mxu1 }
 0x3ef   :  { %v5881_v40 = vadd.f32 %v3163_v35, %v3099_v30  ;;  %v3116_v53 = vpop.f32.mrf.mxu0  ;;  %v3054_v21 = vpop.f32.mrf.mxu3  ;;  %v3043_v35 = vadd.f32 %v3042_v58, %v2978_v13  ;;  %v2987_v58 = vadd.f32 %v2986_v19, %v5848_v18  ;;  %v3114_v19 = vadd.f32 %v3113_v48, %v3049_v39 }
 0x3f0   :  { %v3055_v34 = vadd.f32 %v3054_v21, %v2990_v4 }
 0x3f1   :  { %v2992_v43 = vpop.f32.mrf.mxu2  ;;  %v3108_v3 = vadd.f32 %v3107_v44, %v3043_v35  ;;  %v3227_v27 = vmul.f32 %v5881_v40, %v5881_v40  ;;  %v3052_v25 = vadd.f32 %v3051_v12, %v2987_v58  ;;  %v3204_v44 = vadd.f32 %v3203_v42, %v5881_v40 }
 0x3f2   :  { %v2993_v32 = vadd.f32 %v2992_v43, %v5854_v54 }
 0x3f3   :  { %v3117_v33 = vadd.f32 %v3116_v53, %v3052_v25 }
 0x3f6   :  { %v3166_v28 = vpop.f32.mrf.mxu1 }
 0x3f7   :  { %v5883_v47 = vadd.f32 %v3166_v28, %v3102_v55  ;;  %v3119_v8 = vpop.f32.mrf.mxu0  ;;  %v3057_v26 = vpop.f32.mrf.mxu3 }
 0x3f8   :  { %v3058_v2 = vadd.f32 %v3057_v26, %v2993_v32  ;;  %v3120_v43 = vadd.f32 %v3119_v8, %v3055_v34 }
 0x3f9   :  { %v2995_v62 = vpop.f32.mrf.mxu2  ;;  %v3228_v18 = vmul.f32 %v5883_v47, %v5883_v47  ;;  %v3205_v14 = vadd.f32 %v3204_v44, %v5883_v47 }
 0x3fa   :  { %v2996_v35 = vadd.f32 %v2995_v62, %v5858_v49 }
 0x3fe   :  { %v3169_v31 = vpop.f32.mrf.mxu1 }
 0x3ff   :  { %v5887_v55 = vpop.f32.mrf.mxu0  ;;  %v3060_v41 = vpop.f32.mrf.mxu3  ;;  %v5917_v52 = vadd.f32 %v3169_v31, %v3105_v6  ;;  %v3242_v31 = vadd.f32 %v3241_v29, %v3227_v27 }
 0x400   :  { %v3061_v11 = vadd.f32 %v3060_v41, %v2996_v35  ;;  %v3123_v26 = vadd.f32 %v5887_v55, %v3058_v2 }
 0x401   :  { %v2998_v7 = vpop.f32.mrf.mxu2  ;;  %v3229_v63 = vmul.f32 %v5917_v52, %v5917_v52  ;;  %v3206_v48 = vadd.f32 %v3205_v14, %v5917_v52 }
 0x402   :  { %v2999_v37 = vadd.f32 %v2998_v7, %v5862_v56 }
 0x406   :  { %v3172_v17 = vpop.f32.mrf.mxu1 }
 0x407   :  { %v5899_v23 = vpop.f32.mrf.mxu0  ;;  %v3063_v57 = vpop.f32.mrf.mxu3  ;;  %v5923_v1 = vadd.f32 %v3172_v17, %v3108_v3  ;;  %v3243_v17 = vadd.f32 %v3242_v31, %v3228_v18 }
 0x408   :  { %v3064_v62 = vadd.f32 %v3063_v57, %v2999_v37  ;;  %v3126_v16 = vadd.f32 %v5899_v23, %v3061_v11 }
 0x409   :  { %v3001_v5 = vpop.f32.mrf.mxu2  ;;  %v3230_v54 = vmul.f32 %v5923_v1, %v5923_v1  ;;  %v3244_v9 = vadd.f32 %v3243_v17, %v3229_v63 }
 0x40b   :  { %v3245_v8 = vadd.f32 %v3244_v9, %v3230_v54 }
 0x40e   :  { %v3175_v0 = vpop.f32.mrf.mxu1 }
 0x40f   :  { %v3128_v51 = vpop.f32.mrf.mxu0  ;;  %v3066_v13 = vpop.f32.mrf.mxu3  ;;  %v5929_v12 = vadd.f32 %v3175_v0, %v3111_v38  ;;  %v3207_v0 = vadd.f32 %v3206_v48, %v5923_v1 }
 0x410   :  { %v3129_v57 = vadd.f32 %v3128_v51, %v3064_v62 }
 0x411   :  { %v3231_v53 = vmul.f32 %v5929_v12, %v5929_v12  ;;  %v3208_v41 = vadd.f32 %v3207_v0, %v5929_v12  ;;  %v3004_v3 = vpop.f32.mrf.mxu2 }
 0x412   :  { %v3005_v27 = vadd.f32 %v3004_v3, %v5870_v46 }
 0x416   :  { %v3178_v30 = vpop.f32.mrf.mxu1 }
 0x417   :  { %v5935_v21 = vadd.f32 %v3178_v30, %v3114_v19  ;;  %v3002_v30 = vadd.f32 %v3001_v5, %v5866_v60  ;;  %v3131_v6 = vpop.f32.mrf.mxu0  ;;  %v3069_v39 = vpop.f32.mrf.mxu3 }
 0x418   :  { %v3070_v29 = vadd.f32 %v3069_v39, %v3005_v27 }
 0x419   :  { %v3232_v56 = vmul.f32 %v5935_v21, %v5935_v21  ;;  %v3067_v61 = vadd.f32 %v3066_v13, %v3002_v30  ;;  %v3209_v36 = vadd.f32 %v3208_v41, %v5935_v21 }
 0x41b   :  { %v3132_v42 = vadd.f32 %v3131_v6, %v3067_v61 }
 0x41e   :  { %v5885_v50 = vpop.f32.mrf.mxu1 }
 0x41f   :  { %v5942_v49 = vadd.f32 %v5885_v50, %v3117_v33  ;;  %v3246_v50 = vadd.f32 %v3245_v8, %v3231_v53  ;;  %v3134_v34 = vpop.f32.mrf.mxu0 }
 0x420   :  { %v3135_v13 = vadd.f32 %v3134_v34, %v3070_v29 }
 0x421   :  { %v3233_v55 = vmul.f32 %v5942_v49, %v5942_v49  ;;  %v3247_v58 = vadd.f32 %v3246_v50, %v3232_v56  ;;  %v3210_v10 = vadd.f32 %v3209_v36, %v5942_v49 }
 0x423   :  { %v3248_v25 = vadd.f32 %v3247_v58, %v3233_v55 }
 0x426   :  { %v5889_v20 = vpop.f32.mrf.mxu1 }
 0x427   :  { %v5950_v7 = vadd.f32 %v5889_v20, %v3120_v43 }
 0x429   :  { %v3234_v20 = vmul.f32 %v5950_v7, %v5950_v7  ;;  %v3211_v4 = vadd.f32 %v3210_v10, %v5950_v7 }
 0x42b   :  { %v3249_v44 = vadd.f32 %v3248_v25, %v3234_v20 }
 0x42e   :  { %v5902_v45 = vpop.f32.mrf.mxu1 }
 0x42f   :  { %v5957_v60 = vadd.f32 %v5902_v45, %v3123_v26 }
 0x431   :  { %v3235_v45 = vmul.f32 %v5957_v60, %v5957_v60  ;;  %v3212_v18 = vadd.f32 %v3211_v4, %v5957_v60  ;;  %v3278_v4 = vld [vmem:[%s6051_s6] sm:$0x1] }
 0x433   :  { %v3250_v32 = vadd.f32 %v3249_v44, %v3235_v45 }
 0x436   :  { %v3190_v28 = vpop.f32.mrf.mxu1 }
 0x437   :  { %v5962_v23 = vadd.f32 %v3190_v28, %v3126_v16 }
 0x439   :  { %v3236_v28 = vmul.f32 %v5962_v23, %v5962_v23  ;;  %v3213_v46 = vadd.f32 %v3212_v18, %v5962_v23 }
 0x43b   :  { %v3251_v31 = vadd.f32 %v3250_v32, %v3236_v28 }
 0x43e   :  { %v3193_v15 = vpop.f32.mrf.mxu1 }
 0x43f   :  { %v5968_v51 = vadd.f32 %v3193_v15, %v3129_v57 }
 0x441   :  { %v3237_v5 = vmul.f32 %v5968_v51, %v5968_v51  ;;  %v3214_v14 = vadd.f32 %v3213_v46, %v5968_v51 }
 0x443   :  { %v3252_v2 = vadd.f32 %v3251_v31, %v3237_v5 }
 0x446   :  { %v3196_v38 = vpop.f32.mrf.mxu1 }
 0x447   :  { %v3197_v19 = vadd.f32 %v3196_v38, %v3132_v42  ;;  %v3265_v42 = vld [vmem:[%s6050_s5] sm:$0x1] }
 0x449   :  { %v3238_v63 = vmul.f32 %v3197_v19, %v3197_v19  ;;  %v3215_v35 = vadd.f32 %v3214_v14, %v3197_v19 }
 0x44b   :  { %v3253_v48 = vadd.f32 %v3252_v2, %v3238_v63 }
 0x44e   :  { %v3199_v33 = vpop.f32.mrf.mxu1 }
 0x44f   :  { %v3200_v17 = vadd.f32 %v3199_v33, %v3135_v13 }
 0x451   :  { %v3216_v54 = vadd.f32 %v3215_v35, %v3200_v17  ;;  %v3239_v43 = vmul.f32 %v3200_v17, %v3200_v17 }
 0x453   :  { %v3217_v11 = vrot.slane %v3216_v54, 4  ;;  %v3254_v37 = vadd.f32 %v3253_v48, %v3239_v43 }
 0x455   :  { %v3218_v15 = vadd.f32 %v3217_v11, %v3216_v54  ;;  %v3255_v9 = vrot.slane %v3254_v37, 4 }
 0x457   :  { %v3219_v0 = vrot.slane %v3218_v15, 2  ;;  %v3256_v53 = vadd.f32 %v3255_v9, %v3254_v37 }
 0x459   :  { %v3220_v26 = vadd.f32 %v3219_v0, %v3218_v15  ;;  %v3257_v62 = vrot.slane %v3256_v53, 2 }
 0x45b   :  { %v3221_v30 = vrot.slane %v3220_v26, 1  ;;  %v3258_v6 = vadd.f32 %v3257_v62, %v3256_v53 }
 0x45d   :  { %v3222_v8 = vadd.f32 %v3221_v30, %v3220_v26  ;;  %v3259_v41 = vrot.slane %v3258_v6, 1 }
 0x45f   :  { %v3223_v56 = vmul.f32 0.0078125, %v3222_v8  ;;  %v3260_v16 = vadd.f32 %v3259_v41, %v3258_v6 }
 0x461   :  { %v3261_v61 = vmul.f32 0.0078125, %v3260_v16  ;;  %v3262_v50 = vmul.f32 %v3223_v56, %v3223_v56 }
 0x463   :  { %v3263_v36 = vsub.f32 %v3261_v61, %v3262_v50 }
 0x465   :  { %v3264_v55 = vmax.f32 %v3263_v36, 0.0 }
 0x467   :  { %v3266_v57 = vadd.f32 1e-05, %v3264_v55 }
 0x469   :  { %3518 = vrsqrt.f32 %v3266_v57  ;;  %vm3273_vm11 = vweird.f32 %v3266_v57 }
 0x46f   :  { %v3519_v3 = vpop.eup %3518 }
 0x470   :  { %v3268_v39 = vmul.f32 %v3519_v3, %v3266_v57  ;;  %vm3274_vm10 = vweird.f32 %v3519_v3 }
 0x471   :  { %vm3275_vm12 = vmor %vm3273_vm11, %vm3274_vm10 }
 0x472   :  { %v3269_v58 = vmul.f32 %v3519_v3, %v3268_v39 }
 0x474   :  { %v3270_v10 = vmul.f32 0.5, %v3269_v58 }
 0x476   :  { %v3271_v20 = vsub.f32 1.5, %v3270_v10 }
 0x478   :  { %v3272_v27 = vmul.f32 %v3519_v3, %v3271_v20 }
 0x47a   :  { %v3276_v38 = vsel %vm3275_vm12, %v3519_v3, %v3272_v27 }
 0x47b   :  { %v3277_v25 = vmul.f32 %v3276_v38, %v3265_v42 }
 0x47d   :  { %v3279_v45 = vmul.f32 %v3277_v25, %v3223_v56  ;;  %v3282_v29 = vperm.slane %v3277_v25, 0 }
 0x47f   :  { %v3280_v44 = vsub.f32 %v3278_v4, %v3279_v45  ;;  %v3284_v18 = vmul.f32 %v3282_v29, %v5873_v59  ;;  %v3285_v28 = vmul.f32 %v3282_v29, %v5876_v24  ;;  %v3286_v34 = vmul.f32 %v3282_v29, %v5879_v22 }
 0x480   :  { %v3287_v32 = vmul.f32 %v3282_v29, %v5881_v40  ;;  %v3288_v46 = vmul.f32 %v3282_v29, %v5883_v47  ;;  %v3289_v5 = vmul.f32 %v3282_v29, %v5917_v52  ;;  %v3290_v13 = vmul.f32 %v3282_v29, %v5923_v1 }
 0x481   :  { %v3291_v31 = vmul.f32 %v3282_v29, %v5929_v12  ;;  %v3298_v14 = vmul.f32 %v3282_v29, %v3197_v19  ;;  %v3292_v63 = vmul.f32 %v3282_v29, %v5935_v21  ;;  %v3293_v33 = vmul.f32 %v3282_v29, %v5942_v49 }
 0x482   :  { %v3299_v59 = vmul.f32 %v3282_v29, %v3200_v17  ;;  %v3301_v2 = vperm.slane %v3280_v44, 0  ;;  %v3294_v24 = vmul.f32 %v3282_v29, %v5950_v7  ;;  %v3295_v22 = vmul.f32 %v3282_v29, %v5957_v60 }
 0x483   :  { %v3296_v40 = vmul.f32 %v3282_v29, %v5962_v23  ;;  %v3297_v47 = vmul.f32 %v3282_v29, %v5968_v51 }
 0x484   :  { %v3303_v52 = vadd.f32 %v3301_v2, %v3284_v18  ;;  %v3304_v35 = vadd.f32 %v3301_v2, %v3285_v28  ;;  %v3305_v1 = vadd.f32 %v3301_v2, %v3286_v34  ;;  %v3306_v48 = vadd.f32 %v3301_v2, %v3287_v32 }
 0x485   :  { %v3307_v12 = vadd.f32 %v3301_v2, %v3288_v46  ;;  %v3308_v19 = vadd.f32 %v3301_v2, %v3289_v5  ;;  %v3309_v54 = vadd.f32 %v3301_v2, %v3290_v13  ;;  %v3310_v21 = vadd.f32 %v3301_v2, %v3291_v31 }
 0x486   :  { %v3311_v43 = vadd.f32 %v3301_v2, %v3292_v63  ;;  %v3312_v49 = vadd.f32 %v3301_v2, %v3293_v33  ;;  %v3313_v17 = vadd.f32 %v3301_v2, %v3294_v24  ;;  %v3314_v11 = vadd.f32 %v3301_v2, %v3295_v22 }
 0x487   :  { %v3315_v37 = vadd.f32 %v3301_v2, %v3296_v40  ;;  %v3316_v7 = vadd.f32 %v3301_v2, %v3297_v47  ;;  %v3317_v15 = vadd.f32 %v3301_v2, %v3298_v14  ;;  %v3318_v60 = vadd.f32 %v3301_v2, %v3299_v59 }
 0x488   :  { %v3319_v9 = vmax.f32 %v3303_v52, 0.0  ;;  %v3320_v23 = vmax.f32 %v3304_v35, 0.0  ;;  %v3321_v0 = vmax.f32 %v3305_v1, 0.0  ;;  %v3322_v51 = vmax.f32 %v3306_v48, 0.0 }
 0x489   :  { %v3323_v53 = vmax.f32 %v3307_v12, 0.0  ;;  %v3324_v26 = vmax.f32 %v3308_v19, 0.0  ;;  %v3325_v62 = vmax.f32 %v3309_v54, 0.0  ;;  %v3326_v30 = vmax.f32 %v3310_v21, 0.0 }
 0x48a   :  { %3335 = vst [vmem:[%s6052_s7] sm:$0xff] %v3319_v9  ;;  %v3327_v6 = vmax.f32 %v3311_v43, 0.0  ;;  %v3328_v8 = vmax.f32 %v3312_v49, 0.0  ;;  %v3329_v41 = vmax.f32 %v3313_v17, 0.0  ;;  %v3330_v56 = vmax.f32 %v3314_v11, 0.0 }
 0x48b   :  { %3336 = vst [vmem:[%s6052_s7 + $0x8] sm:$0xff] %v3320_v23  ;;  %v3331_v16 = vmax.f32 %v3315_v37, 0.0  ;;  %v3332_v61 = vmax.f32 %v3316_v7, 0.0  ;;  %v3333_v50 = vmax.f32 %v3317_v15, 0.0  ;;  %v3334_v36 = vmax.f32 %v3318_v60, 0.0 }
 0x48c   :  { %3337 = vst [vmem:[%s6052_s7 + $0x10] sm:$0xff] %v3321_v0 }
 0x48d   :  { %3338 = vst [vmem:[%s6052_s7 + $0x18] sm:$0xff] %v3322_v51 }
 0x48e   :  { %3339 = vst [vmem:[%s6052_s7 + $0x20] sm:$0xff] %v3323_v53 }
 0x48f   :  { %3340 = vst [vmem:[%s6052_s7 + $0x28] sm:$0xff] %v3324_v26 }
 0x490   :  { %3341 = vst [vmem:[%s6052_s7 + $0x30] sm:$0xff] %v3325_v62 }
 0x491   :  { %3342 = vst [vmem:[%s6052_s7 + $0x38] sm:$0xff] %v3326_v30 }
 0x492   :  { %3343 = vst [vmem:[%s6052_s7 + $0x40] sm:$0xff] %v3327_v6 }
 0x493   :  { %3344 = vst [vmem:[%s6052_s7 + $0x48] sm:$0xff] %v3328_v8 }
 0x494   :  { %3345 = vst [vmem:[%s6052_s7 + $0x50] sm:$0xff] %v3329_v41 }
 0x495   :  { %3346 = vst [vmem:[%s6052_s7 + $0x58] sm:$0xff] %v3330_v56 }
 0x496   :  { %3347 = vst [vmem:[%s6052_s7 + $0x60] sm:$0xff] %v3331_v16 }
 0x497   :  { %3348 = vst [vmem:[%s6052_s7 + $0x68] sm:$0xff] %v3332_v61 }
 0x498   :  { %3349 = vst [vmem:[%s6052_s7 + $0x70] sm:$0xff] %v3333_v50 }
 0x499   :  { %3350 = vst [vmem:[%s6052_s7 + $0x78] sm:$0xff] %v3334_v36 }

</bundles_post_ra>
